<compile_context>
chip_gen: v6e
topology: v6e:2x2x1
jax: 0.10.0
libtpu: 0.0.40
codegen_flags: <defaults>
</compile_context>

<pallas_src>
import jax
import jax.numpy as jnp
from jax import lax
from jax.experimental import pallas as pl
from jax.experimental.pallas import tpu as pltpu

HEADS = 4          # TransformerConv heads
NUM_LAYERS = 3     # gat1..gat3
LANES = 128


def _round_up(x, m):
    return (x + m - 1) // m * m


def _vmem_limit_bytes():
    """Generation-aware scoped-VMEM cap (v5e/v6e: 128 MiB physical, v7x: 64 MiB)."""
    try:
        cap = pltpu.get_tpu_info().vmem_capacity_bytes
        return min(int(cap * 0.7), 100 * 1024 * 1024)
    except Exception:
        return 48 * 1024 * 1024


# --------------------------------------------------------------------------
# shared math (works on VMEM refs inside the kernel OR plain arrays for the
# pure-JAX reference: `obj[...]` / `obj[l]` are lazy loads on refs)
# --------------------------------------------------------------------------
def _layer_norm(v, gamma, beta, eps=1e-5):
    mu = jnp.mean(v, axis=-1, keepdims=True)
    d = v - mu
    var = jnp.mean(d * d, axis=-1, keepdims=True)
    return d * lax.rsqrt(var + eps) * gamma + beta


def _elu(v):
    return jnp.where(v > 0, v, jnp.exp(jnp.minimum(v, 0.0)) - 1.0)


def _transformer_conv(x, neg, has_nbr, head_masks, w_f, b_f, recip):
    """PyG TransformerConv (4 heads, concat, root_weight=True, no edge attrs).

    Q/K/V/skip come from one fused [H, 4H] matmul (128 output lanes at H=32).
    Heads stay a 4-way unrolled loop; each head accumulates into the full H
    lanes via a precomputed lane mask on V (no output concat)."""
    n, hdim = x.shape
    c = hdim // HEADS
    scale = 1.0 / float(c) ** 0.5

    qkvs = jnp.dot(x, w_f, preferred_element_type=jnp.float32) + b_f   # [N, 4H]
    v_all = qkvs[:, 2 * hdim:3 * hdim]
    skip = qkvs[:, 3 * hdim:4 * hdim]

    acc = jnp.zeros((n, hdim), jnp.float32)
    for h in range(HEADS):
        qh = qkvs[:, h * c:(h + 1) * c]
        kh = qkvs[:, hdim + h * c:hdim + (h + 1) * c]
        # scores[i, j] = <q_i, k_j>/sqrt(c); contraction expressed without kh.T
        s = lax.dot_general(qh, kh, (((1,), (1,)), ((), ())),
                            preferred_element_type=jnp.float32) * scale + neg
        m = jnp.max(s, axis=-1, keepdims=True)            # masked row max
        e = jnp.exp(s - m)                                # non-neighbours -> exactly 0
        denom = jnp.sum(e, axis=-1, keepdims=True)
        alpha = e * recip(jnp.maximum(denom, 1e-16))
        # wide alpha @ (V masked to this head's lanes): output is full H lanes
        acc = acc + jnp.dot(alpha, v_all * head_masks[h],
                            preferred_element_type=jnp.float32)
    # isolated nodes (no incoming edges) get the skip term only, as in PyG
    return acc * has_nbr + skip


def _forward(x_in, adj_in, bmat_in, p, recip):
    x = x_in[...]
    adjf = adj_in[...]                                  # f32 {0,1} adjacency mask
    bmat = bmat_in[...]
    hm = p["head_mask"][...]                            # [HEADS, H] lane masks

    neg = (adjf - 1.0) * 1e30                           # additive mask, computed once
    has_nbr = (jnp.sum(adjf, axis=-1, keepdims=True) > 0).astype(jnp.float32)
    head_masks = [hm[h:h + 1, :] for h in range(HEADS)]

    # input_proj: Linear -> LayerNorm -> ReLU (Dropout = identity in eval)
    z = jnp.dot(x, p["w_in"][...], preferred_element_type=jnp.float32) + p["b_in"][...]
    z = _layer_norm(z, p["ln_g"][0], p["ln_b"][0])
    z = jnp.maximum(z, 0.0)

    # 3 residual TransformerConv blocks: x = ELU(LN(conv(x) + x)).
    # Layer weights are sliced lazily from the stacked refs inside the loop.
    for l in range(NUM_LAYERS):
        identity = z
        z = _transformer_conv(z, neg, has_nbr, head_masks,
                              p["w_f"][l], p["b_f"][l], recip)
        z = _layer_norm(z + identity, p["ln_g"][l + 1], p["ln_b"][l + 1])
        z = _elu(z)

    # cluster-score weighting + global max/mean pooling per graph
    cs = jax.nn.sigmoid(jnp.sum(z, axis=-1, keepdims=True))             # [N, 1]
    xw = z * cs                                                         # [N, H]

    counts = jnp.maximum(jnp.sum(bmat, axis=-1, keepdims=True), 1.0)    # [G, 1]
    # exact reciprocal here: counts are small exact integers, approx would bias
    # every pooled lane; approx EUP reciprocal is reserved for the softmax denom.
    mean_pool = jnp.dot(bmat, xw, preferred_element_type=jnp.float32) / counts
    # TODO(synk): at batch scale, replace the [G,N,H] broadcast with per-graph
    # pl.ds tiles (or a [G, N/G, H] reshape for uniform counts); fine at G=2.
    masked = jnp.where(bmat[:, :, None] > 0, xw[None, :, :], -1e30)     # [G, N, H]
    max_pool = jnp.max(masked, axis=1)                                  # [G, H]
    pooled = jnp.concatenate([max_pool, mean_pool], axis=-1)            # [G, 2H]

    o = jnp.dot(pooled, p["w1"][...], preferred_element_type=jnp.float32) + p["b1"][...]
    o = _elu(o)
    o = jnp.dot(o, p["w2"][...], preferred_element_type=jnp.float32) + p["b2"][...]
    # F.normalize(p=2, dim=1); padded output columns are exactly zero (zero-padded
    # w2/b2) so they do not perturb the norm.
    ssq = jnp.sum(o * o, axis=-1, keepdims=True)
    return o * lax.rsqrt(jnp.maximum(ssq, 1e-24))


# --------------------------------------------------------------------------
# Pallas kernel + wrapper
# --------------------------------------------------------------------------
def graph_encoder_kernel(x_ref, adj_ref, bmat_ref, hm_ref,
                         w_in_ref, b_in_ref, ln_g_ref, ln_b_ref,
                         w_f_ref, b_f_ref, w1_ref, b1_ref, w2_ref, b2_ref,
                         out_ref):
    p = dict(head_mask=hm_ref,
             w_in=w_in_ref, b_in=b_in_ref, ln_g=ln_g_ref, ln_b=ln_b_ref,
             w_f=w_f_ref, b_f=b_f_ref, w1=w1_ref, b1=b1_ref,
             w2=w2_ref, b2=b2_ref)
    out_ref[...] = _forward(x_ref, adj_ref, bmat_ref, p,
                            recip=lambda t: pl.reciprocal(t, approx=True))


def prepare_params(params, output_dim):
    """One-time weight prep (hoisted out of the per-call path): fuse Q/K/V/skip
    weights into a [L, H, 4H] stack (single wide MXU matmul per layer), zero-pad
    the output head to 128 lanes (lane-dense stores), and build the per-head
    lane masks used to accumulate head outputs without a concat."""
    hidden_dim = params["w_in"].shape[-1]
    c = hidden_dim // HEADS
    w_f = jnp.concatenate(
        [params["wq"], params["wk"], params["wv"], params["ws"]], axis=-1)
    b_f = jnp.concatenate(
        [params["bq"], params["bk"], params["bv"], params["bs"]], axis=-1)
    out_pad = _round_up(output_dim, LANES)
    pad = out_pad - output_dim
    w2p = jnp.pad(params["w2"], ((0, 0), (0, pad)))
    b2p = jnp.pad(params["b2"], ((0, 0), (0, pad)))
    lane = jnp.arange(hidden_dim)
    head_mask = (lane[None, :] // c == jnp.arange(HEADS)[:, None]).astype(jnp.float32)
    prep = dict(head_mask=head_mask,
                w_in=params["w_in"], b_in=params["b_in"],
                ln_g=params["ln_g"], ln_b=params["ln_b"],
                w_f=w_f, b_f=b_f,
                w1=params["w1"], b1=params["b1"],
                w2=w2p, b2=b2p)
    return prep, out_pad


def graph_encoder_forward(prep, out_pad, x, adj_f32, bmat, num_graphs, output_dim):
    inputs = [x, adj_f32, bmat, prep["head_mask"],
              prep["w_in"], prep["b_in"], prep["ln_g"], prep["ln_b"],
              prep["w_f"], prep["b_f"], prep["w1"], prep["b1"],
              prep["w2"], prep["b2"]]
    vmem = pl.BlockSpec(memory_space=pltpu.MemorySpace.VMEM)
    out = pl.pallas_call(
        graph_encoder_kernel,
        out_shape=jax.ShapeDtypeStruct((num_graphs, out_pad), jnp.float32),
        in_specs=[vmem] * len(inputs),
        out_specs=vmem,
        compiler_params=pltpu.CompilerParams(
            # v5e's default scoped cap is 16 MiB; v7x has only 64 MiB physical —
            # derive the limit from the actual chip instead of hardcoding.
            vmem_limit_bytes=_vmem_limit_bytes()),
    )(*inputs)
    return out[:, :output_dim]


# --------------------------------------------------------------------------
# deterministic parameter init (shapes from GraphEncoder.__init__)
# --------------------------------------------------------------------------
def init_params(key, input_dim, hidden_dim, output_dim):
    keys = jax.random.split(key, 14)

    def w(k, shape, scale=0.1):
        return (scale * jax.random.normal(k, shape)).astype(jnp.float32)

    return dict(
        w_in=w(keys[0], (input_dim, hidden_dim)),
        b_in=w(keys[1], (1, hidden_dim), 0.01),
        ln_g=jnp.ones((NUM_LAYERS + 1, 1, hidden_dim), jnp.float32),
        ln_b=jnp.zeros((NUM_LAYERS + 1, 1, hidden_dim), jnp.float32),
        wq=w(keys[2], (NUM_LAYERS, hidden_dim, hidden_dim)),
        bq=w(keys[3], (NUM_LAYERS, 1, hidden_dim), 0.01),
        wk=w(keys[4], (NUM_LAYERS, hidden_dim, hidden_dim)),
        bk=w(keys[5], (NUM_LAYERS, 1, hidden_dim), 0.01),
        wv=w(keys[6], (NUM_LAYERS, hidden_dim, hidden_dim)),
        bv=w(keys[7], (NUM_LAYERS, 1, hidden_dim), 0.01),
        ws=w(keys[8], (NUM_LAYERS, hidden_dim, hidden_dim)),
        bs=w(keys[9], (NUM_LAYERS, 1, hidden_dim), 0.01),
        w1=w(keys[10], (2 * hidden_dim, hidden_dim)),
        b1=w(keys[11], (1, hidden_dim), 0.01),
        w2=w(keys[12], (hidden_dim, output_dim)),
        b2=w(keys[13], (1, output_dim), 0.01),
    )


# --------------------------------------------------------------------------
if __name__ == "__main__":
    INPUT_DIM, HIDDEN_DIM, OUTPUT_DIM = 12, 32, 16
    NUM_GRAPHS, NODES_PER_GRAPH = 2, 8
    N = NUM_GRAPHS * NODES_PER_GRAPH

    key = jax.random.PRNGKey(0)
    k_x, k_p = jax.random.split(key)

    # node features
    x = jax.random.normal(k_x, (N, INPUT_DIM), dtype=jnp.float32)

    # edge_index (src, dst): bidirectional ring + chords inside each graph
    edges = []
    for g in range(NUM_GRAPHS):
        base = g * NODES_PER_GRAPH
        for i in range(NODES_PER_GRAPH):
            j = (i + 1) % NODES_PER_GRAPH
            edges.append((base + i, base + j))
            edges.append((base + j, base + i))
        edges.append((base + 0, base + 4))
        edges.append((base + 4, base + 0))
        edges.append((base + 2, base + 6))
        edges.append((base + 6, base + 2))
    src = jnp.array([e[0] for e in edges], dtype=jnp.int32)
    dst = jnp.array([e[1] for e in edges], dtype=jnp.int32)
    # adj[i, j] = 1 iff edge j -> i exists; f32 at this tiny N (an int8 [16,16]
    # tile pads to (32,128) anyway — int8 only pays off with per-block conversion
    # in the flash-tiled large-N path, see TODO at top).
    adj = jnp.zeros((N, N), jnp.float32).at[dst, src].set(1.0)

    # batch assignment as one-hot [G, N] (counts derived in-kernel)
    batch = jnp.repeat(jnp.arange(NUM_GRAPHS), NODES_PER_GRAPH)
    bmat = (jnp.arange(NUM_GRAPHS)[:, None] == batch[None, :]).astype(jnp.float32)

    params = init_params(k_p, INPUT_DIM, HIDDEN_DIM, OUTPUT_DIM)
    # one-time weight prep, hoisted out of the forward call path
    prep, out_pad = prepare_params(params, OUTPUT_DIM)
    prep = jax.tree_util.tree_map(jax.block_until_ready, prep)

    out = graph_encoder_forward(prep, out_pad, x, adj, bmat, NUM_GRAPHS, OUTPUT_DIM)
    out = jax.block_until_ready(out)

    # pure-JAX reference (identical math outside Pallas; exact reciprocal)
    ref = _forward(x, adj, bmat, prep, recip=lambda t: 1.0 / t)[:, :OUTPUT_DIM]

    assert out.shape == (NUM_GRAPHS, OUTPUT_DIM)
    assert bool(jnp.all(jnp.isfinite(out)))
    assert jnp.allclose(out, ref, atol=5e-3, rtol=5e-3), (out, ref)

    print("KERNEL_OK")
</pallas_src>

<mosaic_0001>
module attributes {stable_mosaic.version = 11 : i64} {
  func.func @graph_encoder_kernel(%arg0: memref<16x12xf32, #tpu.memory_space<vmem>>, %arg1: memref<16x16xf32, #tpu.memory_space<vmem>>, %arg2: memref<2x16xf32, #tpu.memory_space<vmem>>, %arg3: memref<4x32xf32, #tpu.memory_space<vmem>>, %arg4: memref<12x32xf32, #tpu.memory_space<vmem>>, %arg5: memref<1x32xf32, #tpu.memory_space<vmem>>, %arg6: memref<4x1x32xf32, #tpu.memory_space<vmem>>, %arg7: memref<4x1x32xf32, #tpu.memory_space<vmem>>, %arg8: memref<3x32x128xf32, #tpu.memory_space<vmem>>, %arg9: memref<3x1x128xf32, #tpu.memory_space<vmem>>, %arg10: memref<64x32xf32, #tpu.memory_space<vmem>>, %arg11: memref<1x32xf32, #tpu.memory_space<vmem>>, %arg12: memref<32x128xf32, #tpu.memory_space<vmem>>, %arg13: memref<1x128xf32, #tpu.memory_space<vmem>>, %arg14: memref<2x128xf32, #tpu.memory_space<vmem>>) attributes {dimension_semantics = [], scalar_prefetch = 0 : i64, scratch_operands = 0 : i64, tpu.core_type = #tpu.core_type<tc>} {
    %c0 = arith.constant 0 : index
    %c0_0 = arith.constant 0 : index
    %0 = vector.load %arg0[%c0, %c0_0] : memref<16x12xf32, #tpu.memory_space<vmem>>, vector<16x12xf32>
    %c0_1 = arith.constant 0 : index
    %c0_2 = arith.constant 0 : index
    %1 = vector.load %arg1[%c0_1, %c0_2] : memref<16x16xf32, #tpu.memory_space<vmem>>, vector<16x16xf32>
    %c0_3 = arith.constant 0 : index
    %c0_4 = arith.constant 0 : index
    %2 = vector.load %arg2[%c0_3, %c0_4] : memref<2x16xf32, #tpu.memory_space<vmem>>, vector<2x16xf32>
    %c0_5 = arith.constant 0 : index
    %c0_6 = arith.constant 0 : index
    %3 = vector.load %arg3[%c0_5, %c0_6] : memref<4x32xf32, #tpu.memory_space<vmem>>, vector<4x32xf32>
    %cst = arith.constant 1.000000e+00 : f32
    %4 = vector.broadcast %cst : f32 to vector<16x16xf32>
    %5 = arith.subf %1, %4 : vector<16x16xf32>
    %cst_7 = arith.constant 1.000000e+30 : f32
    %6 = vector.broadcast %cst_7 : f32 to vector<16x16xf32>
    %7 = arith.mulf %5, %6 : vector<16x16xf32>
    %cst_8 = arith.constant dense<0.000000e+00> : vector<16xf32>
    %8 = vector.multi_reduction <add>, %1, %cst_8 [1] : vector<16x16xf32> to vector<16xf32>
    %9 = vector.shape_cast %8 : vector<16xf32> to vector<16x1xf32>
    %cst_9 = arith.constant 0.000000e+00 : f32
    %10 = vector.broadcast %cst_9 : f32 to vector<16x1xf32>
    %11 = arith.cmpf ogt, %9, %10 : vector<16x1xf32>
    %12 = arith.extui %11 : vector<16x1xi1> to vector<16x1xi32>
    %13 = arith.sitofp %12 : vector<16x1xi32> to vector<16x1xf32>
    %14 = vector.extract_strided_slice %3 {offsets = [0, 0], sizes = [1, 32], strides = [1, 1]} : vector<4x32xf32> to vector<1x32xf32>
    %15 = vector.extract_strided_slice %3 {offsets = [1, 0], sizes = [1, 32], strides = [1, 1]} : vector<4x32xf32> to vector<1x32xf32>
    %16 = vector.extract_strided_slice %3 {offsets = [2, 0], sizes = [1, 32], strides = [1, 1]} : vector<4x32xf32> to vector<1x32xf32>
    %17 = vector.extract_strided_slice %3 {offsets = [3, 0], sizes = [1, 32], strides = [1, 1]} : vector<4x32xf32> to vector<1x32xf32>
    %c0_10 = arith.constant 0 : index
    %c0_11 = arith.constant 0 : index
    %18 = vector.load %arg4[%c0_10, %c0_11] : memref<12x32xf32, #tpu.memory_space<vmem>>, vector<12x32xf32>
    %cst_12 = arith.constant dense<0.000000e+00> : vector<16x32xf32>
    %19 = tpu.matmul %0, %18, %cst_12 {dimension_numbers = #tpu.dot_dimension_numbers<[1], [0], [0], [1], [0, 0, 1, 1], [], []>} : vector<16x12xf32>, vector<12x32xf32>, vector<16x32xf32> -> vector<16x32xf32>
    %c0_13 = arith.constant 0 : index
    %c0_14 = arith.constant 0 : index
    %20 = vector.load %arg5[%c0_13, %c0_14] : memref<1x32xf32, #tpu.memory_space<vmem>>, vector<1x32xf32>
    %21 = vector.broadcast %20 : vector<1x32xf32> to vector<16x32xf32>
    %22 = arith.addf %19, %21 : vector<16x32xf32>
    %c0_15 = arith.constant 0 : index
    %c0_16 = arith.constant 0 : index
    %c0_17 = arith.constant 0 : index
    %23 = vector.load %arg6[%c0_15, %c0_16, %c0_17] : memref<4x1x32xf32, #tpu.memory_space<vmem>>, vector<1x1x32xf32>
    %24 = vector.shape_cast %23 : vector<1x1x32xf32> to vector<1x32xf32>
    %c0_18 = arith.constant 0 : index
    %c0_19 = arith.constant 0 : index
    %c0_20 = arith.constant 0 : index
    %25 = vector.load %arg7[%c0_18, %c0_19, %c0_20] : memref<4x1x32xf32, #tpu.memory_space<vmem>>, vector<1x1x32xf32>
    %26 = vector.shape_cast %25 : vector<1x1x32xf32> to vector<1x32xf32>
    %cst_21 = arith.constant dense<0.000000e+00> : vector<16xf32>
    %27 = vector.multi_reduction <add>, %22, %cst_21 [1] : vector<16x32xf32> to vector<16xf32>
    %28 = vector.shape_cast %27 : vector<16xf32> to vector<16x1xf32>
    %cst_22 = arith.constant 3.200000e+01 : f32
    %29 = vector.broadcast %cst_22 : f32 to vector<16x1xf32>
    %30 = arith.divf %28, %29 : vector<16x1xf32>
    %31 = vector.broadcast %30 : vector<16x1xf32> to vector<16x32xf32>
    %32 = arith.subf %22, %31 : vector<16x32xf32>
    %33 = arith.mulf %32, %32 : vector<16x32xf32>
    %cst_23 = arith.constant dense<0.000000e+00> : vector<16xf32>
    %34 = vector.multi_reduction <add>, %33, %cst_23 [1] : vector<16x32xf32> to vector<16xf32>
    %35 = vector.shape_cast %34 : vector<16xf32> to vector<16x1xf32>
    %cst_24 = arith.constant 3.200000e+01 : f32
    %36 = vector.broadcast %cst_24 : f32 to vector<16x1xf32>
    %37 = arith.divf %35, %36 : vector<16x1xf32>
    %cst_25 = arith.constant 9.99999974E-6 : f32
    %38 = vector.broadcast %cst_25 : f32 to vector<16x1xf32>
    %39 = arith.addf %37, %38 : vector<16x1xf32>
    %40 = math.rsqrt %39 : vector<16x1xf32>
    %41 = vector.broadcast %40 : vector<16x1xf32> to vector<16x32xf32>
    %42 = arith.mulf %32, %41 : vector<16x32xf32>
    %43 = vector.broadcast %24 : vector<1x32xf32> to vector<16x32xf32>
    %44 = arith.mulf %42, %43 : vector<16x32xf32>
    %45 = vector.broadcast %26 : vector<1x32xf32> to vector<16x32xf32>
    %46 = arith.addf %44, %45 : vector<16x32xf32>
    %cst_26 = arith.constant 0.000000e+00 : f32
    %47 = vector.broadcast %cst_26 : f32 to vector<16x32xf32>
    %48 = arith.maximumf %46, %47 : vector<16x32xf32>
    %c0_27 = arith.constant 0 : index
    %c0_28 = arith.constant 0 : index
    %c0_29 = arith.constant 0 : index
    %49 = vector.load %arg8[%c0_27, %c0_28, %c0_29] : memref<3x32x128xf32, #tpu.memory_space<vmem>>, vector<1x32x128xf32>
    %50 = vector.shape_cast %49 : vector<1x32x128xf32> to vector<32x128xf32>
    %c0_30 = arith.constant 0 : index
    %c0_31 = arith.constant 0 : index
    %c0_32 = arith.constant 0 : index
    %51 = vector.load %arg9[%c0_30, %c0_31, %c0_32] : memref<3x1x128xf32, #tpu.memory_space<vmem>>, vector<1x1x128xf32>
    %52 = vector.shape_cast %51 : vector<1x1x128xf32> to vector<1x128xf32>
    %cst_33 = arith.constant dense<0.000000e+00> : vector<16x128xf32>
    %53 = tpu.matmul %48, %50, %cst_33 {dimension_numbers = #tpu.dot_dimension_numbers<[1], [0], [0], [1], [0, 0, 1, 1], [], []>} : vector<16x32xf32>, vector<32x128xf32>, vector<16x128xf32> -> vector<16x128xf32>
    %54 = vector.broadcast %52 : vector<1x128xf32> to vector<16x128xf32>
    %55 = arith.addf %53, %54 : vector<16x128xf32>
    %56 = vector.extract_strided_slice %55 {offsets = [0, 64], sizes = [16, 32], strides = [1, 1]} : vector<16x128xf32> to vector<16x32xf32>
    %57 = vector.extract_strided_slice %55 {offsets = [0, 96], sizes = [16, 32], strides = [1, 1]} : vector<16x128xf32> to vector<16x32xf32>
    %cst_34 = arith.constant 0.000000e+00 : f32
    %58 = vector.broadcast %cst_34 : f32 to vector<16x32xf32>
    %59 = vector.extract_strided_slice %55 {offsets = [0, 0], sizes = [16, 8], strides = [1, 1]} : vector<16x128xf32> to vector<16x8xf32>
    %60 = vector.extract_strided_slice %55 {offsets = [0, 32], sizes = [16, 8], strides = [1, 1]} : vector<16x128xf32> to vector<16x8xf32>
    %cst_35 = arith.constant dense<0.000000e+00> : vector<16x16xf32>
    %61 = tpu.matmul %59, %60, %cst_35 {dimension_numbers = #tpu.dot_dimension_numbers<[1], [1], [0], [0], [0, 0, 1, 0], [], []>} : vector<16x8xf32>, vector<16x8xf32>, vector<16x16xf32> -> vector<16x16xf32>
    %cst_36 = arith.constant 0.353553385 : f32
    %62 = vector.broadcast %cst_36 : f32 to vector<16x16xf32>
    %63 = arith.mulf %61, %62 : vector<16x16xf32>
    %64 = arith.addf %63, %7 : vector<16x16xf32>
    %cst_37 = arith.constant dense<0xFF800000> : vector<16xf32>
    %65 = vector.multi_reduction <maximumf>, %64, %cst_37 [1] : vector<16x16xf32> to vector<16xf32>
    %66 = vector.shape_cast %65 : vector<16xf32> to vector<16x1xf32>
    %67 = vector.broadcast %66 : vector<16x1xf32> to vector<16x16xf32>
    %68 = arith.subf %64, %67 : vector<16x16xf32>
    %69 = math.exp %68 : vector<16x16xf32>
    %cst_38 = arith.constant dense<0.000000e+00> : vector<16xf32>
    %70 = vector.multi_reduction <add>, %69, %cst_38 [1] : vector<16x16xf32> to vector<16xf32>
    %71 = vector.shape_cast %70 : vector<16xf32> to vector<16x1xf32>
    %cst_39 = arith.constant 1.000000e-16 : f32
    %72 = vector.broadcast %cst_39 : f32 to vector<16x1xf32>
    %73 = arith.maximumf %71, %72 : vector<16x1xf32>
    %74 = tpu.reciprocal %73 {approx = true} : vector<16x1xf32> -> vector<16x1xf32>
    %75 = vector.broadcast %74 : vector<16x1xf32> to vector<16x16xf32>
    %76 = arith.mulf %69, %75 : vector<16x16xf32>
    %77 = vector.broadcast %14 : vector<1x32xf32> to vector<16x32xf32>
    %78 = arith.mulf %56, %77 : vector<16x32xf32>
    %cst_40 = arith.constant dense<0.000000e+00> : vector<16x32xf32>
    %79 = tpu.matmul %76, %78, %cst_40 {dimension_numbers = #tpu.dot_dimension_numbers<[1], [0], [0], [1], [0, 0, 1, 1], [], []>} : vector<16x16xf32>, vector<16x32xf32>, vector<16x32xf32> -> vector<16x32xf32>
    %80 = arith.addf %58, %79 : vector<16x32xf32>
    %81 = vector.extract_strided_slice %55 {offsets = [0, 8], sizes = [16, 8], strides = [1, 1]} : vector<16x128xf32> to vector<16x8xf32>
    %82 = vector.extract_strided_slice %55 {offsets = [0, 40], sizes = [16, 8], strides = [1, 1]} : vector<16x128xf32> to vector<16x8xf32>
    %cst_41 = arith.constant dense<0.000000e+00> : vector<16x16xf32>
    %83 = tpu.matmul %81, %82, %cst_41 {dimension_numbers = #tpu.dot_dimension_numbers<[1], [1], [0], [0], [0, 0, 1, 0], [], []>} : vector<16x8xf32>, vector<16x8xf32>, vector<16x16xf32> -> vector<16x16xf32>
    %cst_42 = arith.constant 0.353553385 : f32
    %84 = vector.broadcast %cst_42 : f32 to vector<16x16xf32>
    %85 = arith.mulf %83, %84 : vector<16x16xf32>
    %86 = arith.addf %85, %7 : vector<16x16xf32>
    %cst_43 = arith.constant dense<0xFF800000> : vector<16xf32>
    %87 = vector.multi_reduction <maximumf>, %86, %cst_43 [1] : vector<16x16xf32> to vector<16xf32>
    %88 = vector.shape_cast %87 : vector<16xf32> to vector<16x1xf32>
    %89 = vector.broadcast %88 : vector<16x1xf32> to vector<16x16xf32>
    %90 = arith.subf %86, %89 : vector<16x16xf32>
    %91 = math.exp %90 : vector<16x16xf32>
    %cst_44 = arith.constant dense<0.000000e+00> : vector<16xf32>
    %92 = vector.multi_reduction <add>, %91, %cst_44 [1] : vector<16x16xf32> to vector<16xf32>
    %93 = vector.shape_cast %92 : vector<16xf32> to vector<16x1xf32>
    %cst_45 = arith.constant 1.000000e-16 : f32
    %94 = vector.broadcast %cst_45 : f32 to vector<16x1xf32>
    %95 = arith.maximumf %93, %94 : vector<16x1xf32>
    %96 = tpu.reciprocal %95 {approx = true} : vector<16x1xf32> -> vector<16x1xf32>
    %97 = vector.broadcast %96 : vector<16x1xf32> to vector<16x16xf32>
    %98 = arith.mulf %91, %97 : vector<16x16xf32>
    %99 = vector.broadcast %15 : vector<1x32xf32> to vector<16x32xf32>
    %100 = arith.mulf %56, %99 : vector<16x32xf32>
    %cst_46 = arith.constant dense<0.000000e+00> : vector<16x32xf32>
    %101 = tpu.matmul %98, %100, %cst_46 {dimension_numbers = #tpu.dot_dimension_numbers<[1], [0], [0], [1], [0, 0, 1, 1], [], []>} : vector<16x16xf32>, vector<16x32xf32>, vector<16x32xf32> -> vector<16x32xf32>
    %102 = arith.addf %80, %101 : vector<16x32xf32>
    %103 = vector.extract_strided_slice %55 {offsets = [0, 16], sizes = [16, 8], strides = [1, 1]} : vector<16x128xf32> to vector<16x8xf32>
    %104 = vector.extract_strided_slice %55 {offsets = [0, 48], sizes = [16, 8], strides = [1, 1]} : vector<16x128xf32> to vector<16x8xf32>
    %cst_47 = arith.constant dense<0.000000e+00> : vector<16x16xf32>
    %105 = tpu.matmul %103, %104, %cst_47 {dimension_numbers = #tpu.dot_dimension_numbers<[1], [1], [0], [0], [0, 0, 1, 0], [], []>} : vector<16x8xf32>, vector<16x8xf32>, vector<16x16xf32> -> vector<16x16xf32>
    %cst_48 = arith.constant 0.353553385 : f32
    %106 = vector.broadcast %cst_48 : f32 to vector<16x16xf32>
    %107 = arith.mulf %105, %106 : vector<16x16xf32>
    %108 = arith.addf %107, %7 : vector<16x16xf32>
    %cst_49 = arith.constant dense<0xFF800000> : vector<16xf32>
    %109 = vector.multi_reduction <maximumf>, %108, %cst_49 [1] : vector<16x16xf32> to vector<16xf32>
    %110 = vector.shape_cast %109 : vector<16xf32> to vector<16x1xf32>
    %111 = vector.broadcast %110 : vector<16x1xf32> to vector<16x16xf32>
    %112 = arith.subf %108, %111 : vector<16x16xf32>
    %113 = math.exp %112 : vector<16x16xf32>
    %cst_50 = arith.constant dense<0.000000e+00> : vector<16xf32>
    %114 = vector.multi_reduction <add>, %113, %cst_50 [1] : vector<16x16xf32> to vector<16xf32>
    %115 = vector.shape_cast %114 : vector<16xf32> to vector<16x1xf32>
    %cst_51 = arith.constant 1.000000e-16 : f32
    %116 = vector.broadcast %cst_51 : f32 to vector<16x1xf32>
    %117 = arith.maximumf %115, %116 : vector<16x1xf32>
    %118 = tpu.reciprocal %117 {approx = true} : vector<16x1xf32> -> vector<16x1xf32>
    %119 = vector.broadcast %118 : vector<16x1xf32> to vector<16x16xf32>
    %120 = arith.mulf %113, %119 : vector<16x16xf32>
    %121 = vector.broadcast %16 : vector<1x32xf32> to vector<16x32xf32>
    %122 = arith.mulf %56, %121 : vector<16x32xf32>
    %cst_52 = arith.constant dense<0.000000e+00> : vector<16x32xf32>
    %123 = tpu.matmul %120, %122, %cst_52 {dimension_numbers = #tpu.dot_dimension_numbers<[1], [0], [0], [1], [0, 0, 1, 1], [], []>} : vector<16x16xf32>, vector<16x32xf32>, vector<16x32xf32> -> vector<16x32xf32>
    %124 = arith.addf %102, %123 : vector<16x32xf32>
    %125 = vector.extract_strided_slice %55 {offsets = [0, 24], sizes = [16, 8], strides = [1, 1]} : vector<16x128xf32> to vector<16x8xf32>
    %126 = vector.extract_strided_slice %55 {offsets = [0, 56], sizes = [16, 8], strides = [1, 1]} : vector<16x128xf32> to vector<16x8xf32>
    %cst_53 = arith.constant dense<0.000000e+00> : vector<16x16xf32>
    %127 = tpu.matmul %125, %126, %cst_53 {dimension_numbers = #tpu.dot_dimension_numbers<[1], [1], [0], [0], [0, 0, 1, 0], [], []>} : vector<16x8xf32>, vector<16x8xf32>, vector<16x16xf32> -> vector<16x16xf32>
    %cst_54 = arith.constant 0.353553385 : f32
    %128 = vector.broadcast %cst_54 : f32 to vector<16x16xf32>
    %129 = arith.mulf %127, %128 : vector<16x16xf32>
    %130 = arith.addf %129, %7 : vector<16x16xf32>
    %cst_55 = arith.constant dense<0xFF800000> : vector<16xf32>
    %131 = vector.multi_reduction <maximumf>, %130, %cst_55 [1] : vector<16x16xf32> to vector<16xf32>
    %132 = vector.shape_cast %131 : vector<16xf32> to vector<16x1xf32>
    %133 = vector.broadcast %132 : vector<16x1xf32> to vector<16x16xf32>
    %134 = arith.subf %130, %133 : vector<16x16xf32>
    %135 = math.exp %134 : vector<16x16xf32>
    %cst_56 = arith.constant dense<0.000000e+00> : vector<16xf32>
    %136 = vector.multi_reduction <add>, %135, %cst_56 [1] : vector<16x16xf32> to vector<16xf32>
    %137 = vector.shape_cast %136 : vector<16xf32> to vector<16x1xf32>
    %cst_57 = arith.constant 1.000000e-16 : f32
    %138 = vector.broadcast %cst_57 : f32 to vector<16x1xf32>
    %139 = arith.maximumf %137, %138 : vector<16x1xf32>
    %140 = tpu.reciprocal %139 {approx = true} : vector<16x1xf32> -> vector<16x1xf32>
    %141 = vector.broadcast %140 : vector<16x1xf32> to vector<16x16xf32>
    %142 = arith.mulf %135, %141 : vector<16x16xf32>
    %143 = vector.broadcast %17 : vector<1x32xf32> to vector<16x32xf32>
    %144 = arith.mulf %56, %143 : vector<16x32xf32>
    %cst_58 = arith.constant dense<0.000000e+00> : vector<16x32xf32>
    %145 = tpu.matmul %142, %144, %cst_58 {dimension_numbers = #tpu.dot_dimension_numbers<[1], [0], [0], [1], [0, 0, 1, 1], [], []>} : vector<16x16xf32>, vector<16x32xf32>, vector<16x32xf32> -> vector<16x32xf32>
    %146 = arith.addf %124, %145 : vector<16x32xf32>
    %147 = vector.broadcast %13 : vector<16x1xf32> to vector<16x32xf32>
    %148 = arith.mulf %146, %147 : vector<16x32xf32>
    %149 = arith.addf %148, %57 : vector<16x32xf32>
    %150 = arith.addf %149, %48 : vector<16x32xf32>
    %c1 = arith.constant 1 : index
    %c0_59 = arith.constant 0 : index
    %c0_60 = arith.constant 0 : index
    %151 = vector.load %arg6[%c1, %c0_59, %c0_60] : memref<4x1x32xf32, #tpu.memory_space<vmem>>, vector<1x1x32xf32>
    %152 = vector.shape_cast %151 : vector<1x1x32xf32> to vector<1x32xf32>
    %c1_61 = arith.constant 1 : index
    %c0_62 = arith.constant 0 : index
    %c0_63 = arith.constant 0 : index
    %153 = vector.load %arg7[%c1_61, %c0_62, %c0_63] : memref<4x1x32xf32, #tpu.memory_space<vmem>>, vector<1x1x32xf32>
    %154 = vector.shape_cast %153 : vector<1x1x32xf32> to vector<1x32xf32>
    %cst_64 = arith.constant dense<0.000000e+00> : vector<16xf32>
    %155 = vector.multi_reduction <add>, %150, %cst_64 [1] : vector<16x32xf32> to vector<16xf32>
    %156 = vector.shape_cast %155 : vector<16xf32> to vector<16x1xf32>
    %cst_65 = arith.constant 3.200000e+01 : f32
    %157 = vector.broadcast %cst_65 : f32 to vector<16x1xf32>
    %158 = arith.divf %156, %157 : vector<16x1xf32>
    %159 = vector.broadcast %158 : vector<16x1xf32> to vector<16x32xf32>
    %160 = arith.subf %150, %159 : vector<16x32xf32>
    %161 = arith.mulf %160, %160 : vector<16x32xf32>
    %cst_66 = arith.constant dense<0.000000e+00> : vector<16xf32>
    %162 = vector.multi_reduction <add>, %161, %cst_66 [1] : vector<16x32xf32> to vector<16xf32>
    %163 = vector.shape_cast %162 : vector<16xf32> to vector<16x1xf32>
    %cst_67 = arith.constant 3.200000e+01 : f32
    %164 = vector.broadcast %cst_67 : f32 to vector<16x1xf32>
    %165 = arith.divf %163, %164 : vector<16x1xf32>
    %cst_68 = arith.constant 9.99999974E-6 : f32
    %166 = vector.broadcast %cst_68 : f32 to vector<16x1xf32>
    %167 = arith.addf %165, %166 : vector<16x1xf32>
    %168 = math.rsqrt %167 : vector<16x1xf32>
    %169 = vector.broadcast %168 : vector<16x1xf32> to vector<16x32xf32>
    %170 = arith.mulf %160, %169 : vector<16x32xf32>
    %171 = vector.broadcast %152 : vector<1x32xf32> to vector<16x32xf32>
    %172 = arith.mulf %170, %171 : vector<16x32xf32>
    %173 = vector.broadcast %154 : vector<1x32xf32> to vector<16x32xf32>
    %174 = arith.addf %172, %173 : vector<16x32xf32>
    %cst_69 = arith.constant 0.000000e+00 : f32
    %175 = vector.broadcast %cst_69 : f32 to vector<16x32xf32>
    %176 = arith.cmpf ogt, %174, %175 : vector<16x32xf32>
    %cst_70 = arith.constant 0.000000e+00 : f32
    %177 = vector.broadcast %cst_70 : f32 to vector<16x32xf32>
    %178 = arith.minimumf %174, %177 : vector<16x32xf32>
    %179 = math.exp %178 : vector<16x32xf32>
    %cst_71 = arith.constant 1.000000e+00 : f32
    %180 = vector.broadcast %cst_71 : f32 to vector<16x32xf32>
    %181 = arith.subf %179, %180 : vector<16x32xf32>
    %182 = arith.select %176, %174, %181 : vector<16x32xi1>, vector<16x32xf32>
    %c1_72 = arith.constant 1 : index
    %c0_73 = arith.constant 0 : index
    %c0_74 = arith.constant 0 : index
    %183 = vector.load %arg8[%c1_72, %c0_73, %c0_74] : memref<3x32x128xf32, #tpu.memory_space<vmem>>, vector<1x32x128xf32>
    %184 = vector.shape_cast %183 : vector<1x32x128xf32> to vector<32x128xf32>
    %c1_75 = arith.constant 1 : index
    %c0_76 = arith.constant 0 : index
    %c0_77 = arith.constant 0 : index
    %185 = vector.load %arg9[%c1_75, %c0_76, %c0_77] : memref<3x1x128xf32, #tpu.memory_space<vmem>>, vector<1x1x128xf32>
    %186 = vector.shape_cast %185 : vector<1x1x128xf32> to vector<1x128xf32>
    %cst_78 = arith.constant dense<0.000000e+00> : vector<16x128xf32>
    %187 = tpu.matmul %182, %184, %cst_78 {dimension_numbers = #tpu.dot_dimension_numbers<[1], [0], [0], [1], [0, 0, 1, 1], [], []>} : vector<16x32xf32>, vector<32x128xf32>, vector<16x128xf32> -> vector<16x128xf32>
    %188 = vector.broadcast %186 : vector<1x128xf32> to vector<16x128xf32>
    %189 = arith.addf %187, %188 : vector<16x128xf32>
    %190 = vector.extract_strided_slice %189 {offsets = [0, 64], sizes = [16, 32], strides = [1, 1]} : vector<16x128xf32> to vector<16x32xf32>
    %191 = vector.extract_strided_slice %189 {offsets = [0, 96], sizes = [16, 32], strides = [1, 1]} : vector<16x128xf32> to vector<16x32xf32>
    %cst_79 = arith.constant 0.000000e+00 : f32
    %192 = vector.broadcast %cst_79 : f32 to vector<16x32xf32>
    %193 = vector.extract_strided_slice %189 {offsets = [0, 0], sizes = [16, 8], strides = [1, 1]} : vector<16x128xf32> to vector<16x8xf32>
    %194 = vector.extract_strided_slice %189 {offsets = [0, 32], sizes = [16, 8], strides = [1, 1]} : vector<16x128xf32> to vector<16x8xf32>
    %cst_80 = arith.constant dense<0.000000e+00> : vector<16x16xf32>
    %195 = tpu.matmul %193, %194, %cst_80 {dimension_numbers = #tpu.dot_dimension_numbers<[1], [1], [0], [0], [0, 0, 1, 0], [], []>} : vector<16x8xf32>, vector<16x8xf32>, vector<16x16xf32> -> vector<16x16xf32>
    %cst_81 = arith.constant 0.353553385 : f32
    %196 = vector.broadcast %cst_81 : f32 to vector<16x16xf32>
    %197 = arith.mulf %195, %196 : vector<16x16xf32>
    %198 = arith.addf %197, %7 : vector<16x16xf32>
    %cst_82 = arith.constant dense<0xFF800000> : vector<16xf32>
    %199 = vector.multi_reduction <maximumf>, %198, %cst_82 [1] : vector<16x16xf32> to vector<16xf32>
    %200 = vector.shape_cast %199 : vector<16xf32> to vector<16x1xf32>
    %201 = vector.broadcast %200 : vector<16x1xf32> to vector<16x16xf32>
    %202 = arith.subf %198, %201 : vector<16x16xf32>
    %203 = math.exp %202 : vector<16x16xf32>
    %cst_83 = arith.constant dense<0.000000e+00> : vector<16xf32>
    %204 = vector.multi_reduction <add>, %203, %cst_83 [1] : vector<16x16xf32> to vector<16xf32>
    %205 = vector.shape_cast %204 : vector<16xf32> to vector<16x1xf32>
    %cst_84 = arith.constant 1.000000e-16 : f32
    %206 = vector.broadcast %cst_84 : f32 to vector<16x1xf32>
    %207 = arith.maximumf %205, %206 : vector<16x1xf32>
    %208 = tpu.reciprocal %207 {approx = true} : vector<16x1xf32> -> vector<16x1xf32>
    %209 = vector.broadcast %208 : vector<16x1xf32> to vector<16x16xf32>
    %210 = arith.mulf %203, %209 : vector<16x16xf32>
    %211 = vector.broadcast %14 : vector<1x32xf32> to vector<16x32xf32>
    %212 = arith.mulf %190, %211 : vector<16x32xf32>
    %cst_85 = arith.constant dense<0.000000e+00> : vector<16x32xf32>
    %213 = tpu.matmul %210, %212, %cst_85 {dimension_numbers = #tpu.dot_dimension_numbers<[1], [0], [0], [1], [0, 0, 1, 1], [], []>} : vector<16x16xf32>, vector<16x32xf32>, vector<16x32xf32> -> vector<16x32xf32>
    %214 = arith.addf %192, %213 : vector<16x32xf32>
    %215 = vector.extract_strided_slice %189 {offsets = [0, 8], sizes = [16, 8], strides = [1, 1]} : vector<16x128xf32> to vector<16x8xf32>
    %216 = vector.extract_strided_slice %189 {offsets = [0, 40], sizes = [16, 8], strides = [1, 1]} : vector<16x128xf32> to vector<16x8xf32>
    %cst_86 = arith.constant dense<0.000000e+00> : vector<16x16xf32>
    %217 = tpu.matmul %215, %216, %cst_86 {dimension_numbers = #tpu.dot_dimension_numbers<[1], [1], [0], [0], [0, 0, 1, 0], [], []>} : vector<16x8xf32>, vector<16x8xf32>, vector<16x16xf32> -> vector<16x16xf32>
    %cst_87 = arith.constant 0.353553385 : f32
    %218 = vector.broadcast %cst_87 : f32 to vector<16x16xf32>
    %219 = arith.mulf %217, %218 : vector<16x16xf32>
    %220 = arith.addf %219, %7 : vector<16x16xf32>
    %cst_88 = arith.constant dense<0xFF800000> : vector<16xf32>
    %221 = vector.multi_reduction <maximumf>, %220, %cst_88 [1] : vector<16x16xf32> to vector<16xf32>
    %222 = vector.shape_cast %221 : vector<16xf32> to vector<16x1xf32>
    %223 = vector.broadcast %222 : vector<16x1xf32> to vector<16x16xf32>
    %224 = arith.subf %220, %223 : vector<16x16xf32>
    %225 = math.exp %224 : vector<16x16xf32>
    %cst_89 = arith.constant dense<0.000000e+00> : vector<16xf32>
    %226 = vector.multi_reduction <add>, %225, %cst_89 [1] : vector<16x16xf32> to vector<16xf32>
    %227 = vector.shape_cast %226 : vector<16xf32> to vector<16x1xf32>
    %cst_90 = arith.constant 1.000000e-16 : f32
    %228 = vector.broadcast %cst_90 : f32 to vector<16x1xf32>
    %229 = arith.maximumf %227, %228 : vector<16x1xf32>
    %230 = tpu.reciprocal %229 {approx = true} : vector<16x1xf32> -> vector<16x1xf32>
    %231 = vector.broadcast %230 : vector<16x1xf32> to vector<16x16xf32>
    %232 = arith.mulf %225, %231 : vector<16x16xf32>
    %233 = vector.broadcast %15 : vector<1x32xf32> to vector<16x32xf32>
    %234 = arith.mulf %190, %233 : vector<16x32xf32>
    %cst_91 = arith.constant dense<0.000000e+00> : vector<16x32xf32>
    %235 = tpu.matmul %232, %234, %cst_91 {dimension_numbers = #tpu.dot_dimension_numbers<[1], [0], [0], [1], [0, 0, 1, 1], [], []>} : vector<16x16xf32>, vector<16x32xf32>, vector<16x32xf32> -> vector<16x32xf32>
    %236 = arith.addf %214, %235 : vector<16x32xf32>
    %237 = vector.extract_strided_slice %189 {offsets = [0, 16], sizes = [16, 8], strides = [1, 1]} : vector<16x128xf32> to vector<16x8xf32>
    %238 = vector.extract_strided_slice %189 {offsets = [0, 48], sizes = [16, 8], strides = [1, 1]} : vector<16x128xf32> to vector<16x8xf32>
    %cst_92 = arith.constant dense<0.000000e+00> : vector<16x16xf32>
    %239 = tpu.matmul %237, %238, %cst_92 {dimension_numbers = #tpu.dot_dimension_numbers<[1], [1], [0], [0], [0, 0, 1, 0], [], []>} : vector<16x8xf32>, vector<16x8xf32>, vector<16x16xf32> -> vector<16x16xf32>
    %cst_93 = arith.constant 0.353553385 : f32
    %240 = vector.broadcast %cst_93 : f32 to vector<16x16xf32>
    %241 = arith.mulf %239, %240 : vector<16x16xf32>
    %242 = arith.addf %241, %7 : vector<16x16xf32>
    %cst_94 = arith.constant dense<0xFF800000> : vector<16xf32>
    %243 = vector.multi_reduction <maximumf>, %242, %cst_94 [1] : vector<16x16xf32> to vector<16xf32>
    %244 = vector.shape_cast %243 : vector<16xf32> to vector<16x1xf32>
    %245 = vector.broadcast %244 : vector<16x1xf32> to vector<16x16xf32>
    %246 = arith.subf %242, %245 : vector<16x16xf32>
    %247 = math.exp %246 : vector<16x16xf32>
    %cst_95 = arith.constant dense<0.000000e+00> : vector<16xf32>
    %248 = vector.multi_reduction <add>, %247, %cst_95 [1] : vector<16x16xf32> to vector<16xf32>
    %249 = vector.shape_cast %248 : vector<16xf32> to vector<16x1xf32>
    %cst_96 = arith.constant 1.000000e-16 : f32
    %250 = vector.broadcast %cst_96 : f32 to vector<16x1xf32>
    %251 = arith.maximumf %249, %250 : vector<16x1xf32>
    %252 = tpu.reciprocal %251 {approx = true} : vector<16x1xf32> -> vector<16x1xf32>
    %253 = vector.broadcast %252 : vector<16x1xf32> to vector<16x16xf32>
    %254 = arith.mulf %247, %253 : vector<16x16xf32>
    %255 = vector.broadcast %16 : vector<1x32xf32> to vector<16x32xf32>
    %256 = arith.mulf %190, %255 : vector<16x32xf32>
    %cst_97 = arith.constant dense<0.000000e+00> : vector<16x32xf32>
    %257 = tpu.matmul %254, %256, %cst_97 {dimension_numbers = #tpu.dot_dimension_numbers<[1], [0], [0], [1], [0, 0, 1, 1], [], []>} : vector<16x16xf32>, vector<16x32xf32>, vector<16x32xf32> -> vector<16x32xf32>
    %258 = arith.addf %236, %257 : vector<16x32xf32>
    %259 = vector.extract_strided_slice %189 {offsets = [0, 24], sizes = [16, 8], strides = [1, 1]} : vector<16x128xf32> to vector<16x8xf32>
    %260 = vector.extract_strided_slice %189 {offsets = [0, 56], sizes = [16, 8], strides = [1, 1]} : vector<16x128xf32> to vector<16x8xf32>
    %cst_98 = arith.constant dense<0.000000e+00> : vector<16x16xf32>
    %261 = tpu.matmul %259, %260, %cst_98 {dimension_numbers = #tpu.dot_dimension_numbers<[1], [1], [0], [0], [0, 0, 1, 0], [], []>} : vector<16x8xf32>, vector<16x8xf32>, vector<16x16xf32> -> vector<16x16xf32>
    %cst_99 = arith.constant 0.353553385 : f32
    %262 = vector.broadcast %cst_99 : f32 to vector<16x16xf32>
    %263 = arith.mulf %261, %262 : vector<16x16xf32>
    %264 = arith.addf %263, %7 : vector<16x16xf32>
    %cst_100 = arith.constant dense<0xFF800000> : vector<16xf32>
    %265 = vector.multi_reduction <maximumf>, %264, %cst_100 [1] : vector<16x16xf32> to vector<16xf32>
    %266 = vector.shape_cast %265 : vector<16xf32> to vector<16x1xf32>
    %267 = vector.broadcast %266 : vector<16x1xf32> to vector<16x16xf32>
    %268 = arith.subf %264, %267 : vector<16x16xf32>
    %269 = math.exp %268 : vector<16x16xf32>
    %cst_101 = arith.constant dense<0.000000e+00> : vector<16xf32>
    %270 = vector.multi_reduction <add>, %269, %cst_101 [1] : vector<16x16xf32> to vector<16xf32>
    %271 = vector.shape_cast %270 : vector<16xf32> to vector<16x1xf32>
    %cst_102 = arith.constant 1.000000e-16 : f32
    %272 = vector.broadcast %cst_102 : f32 to vector<16x1xf32>
    %273 = arith.maximumf %271, %272 : vector<16x1xf32>
    %274 = tpu.reciprocal %273 {approx = true} : vector<16x1xf32> -> vector<16x1xf32>
    %275 = vector.broadcast %274 : vector<16x1xf32> to vector<16x16xf32>
    %276 = arith.mulf %269, %275 : vector<16x16xf32>
    %277 = vector.broadcast %17 : vector<1x32xf32> to vector<16x32xf32>
    %278 = arith.mulf %190, %277 : vector<16x32xf32>
    %cst_103 = arith.constant dense<0.000000e+00> : vector<16x32xf32>
    %279 = tpu.matmul %276, %278, %cst_103 {dimension_numbers = #tpu.dot_dimension_numbers<[1], [0], [0], [1], [0, 0, 1, 1], [], []>} : vector<16x16xf32>, vector<16x32xf32>, vector<16x32xf32> -> vector<16x32xf32>
    %280 = arith.addf %258, %279 : vector<16x32xf32>
    %281 = vector.broadcast %13 : vector<16x1xf32> to vector<16x32xf32>
    %282 = arith.mulf %280, %281 : vector<16x32xf32>
    %283 = arith.addf %282, %191 : vector<16x32xf32>
    %284 = arith.addf %283, %182 : vector<16x32xf32>
    %c2 = arith.constant 2 : index
    %c0_104 = arith.constant 0 : index
    %c0_105 = arith.constant 0 : index
    %285 = vector.load %arg6[%c2, %c0_104, %c0_105] : memref<4x1x32xf32, #tpu.memory_space<vmem>>, vector<1x1x32xf32>
    %286 = vector.shape_cast %285 : vector<1x1x32xf32> to vector<1x32xf32>
    %c2_106 = arith.constant 2 : index
    %c0_107 = arith.constant 0 : index
    %c0_108 = arith.constant 0 : index
    %287 = vector.load %arg7[%c2_106, %c0_107, %c0_108] : memref<4x1x32xf32, #tpu.memory_space<vmem>>, vector<1x1x32xf32>
    %288 = vector.shape_cast %287 : vector<1x1x32xf32> to vector<1x32xf32>
    %cst_109 = arith.constant dense<0.000000e+00> : vector<16xf32>
    %289 = vector.multi_reduction <add>, %284, %cst_109 [1] : vector<16x32xf32> to vector<16xf32>
    %290 = vector.shape_cast %289 : vector<16xf32> to vector<16x1xf32>
    %cst_110 = arith.constant 3.200000e+01 : f32
    %291 = vector.broadcast %cst_110 : f32 to vector<16x1xf32>
    %292 = arith.divf %290, %291 : vector<16x1xf32>
    %293 = vector.broadcast %292 : vector<16x1xf32> to vector<16x32xf32>
    %294 = arith.subf %284, %293 : vector<16x32xf32>
    %295 = arith.mulf %294, %294 : vector<16x32xf32>
    %cst_111 = arith.constant dense<0.000000e+00> : vector<16xf32>
    %296 = vector.multi_reduction <add>, %295, %cst_111 [1] : vector<16x32xf32> to vector<16xf32>
    %297 = vector.shape_cast %296 : vector<16xf32> to vector<16x1xf32>
    %cst_112 = arith.constant 3.200000e+01 : f32
    %298 = vector.broadcast %cst_112 : f32 to vector<16x1xf32>
    %299 = arith.divf %297, %298 : vector<16x1xf32>
    %cst_113 = arith.constant 9.99999974E-6 : f32
    %300 = vector.broadcast %cst_113 : f32 to vector<16x1xf32>
    %301 = arith.addf %299, %300 : vector<16x1xf32>
    %302 = math.rsqrt %301 : vector<16x1xf32>
    %303 = vector.broadcast %302 : vector<16x1xf32> to vector<16x32xf32>
    %304 = arith.mulf %294, %303 : vector<16x32xf32>
    %305 = vector.broadcast %286 : vector<1x32xf32> to vector<16x32xf32>
    %306 = arith.mulf %304, %305 : vector<16x32xf32>
    %307 = vector.broadcast %288 : vector<1x32xf32> to vector<16x32xf32>
    %308 = arith.addf %306, %307 : vector<16x32xf32>
    %cst_114 = arith.constant 0.000000e+00 : f32
    %309 = vector.broadcast %cst_114 : f32 to vector<16x32xf32>
    %310 = arith.cmpf ogt, %308, %309 : vector<16x32xf32>
    %cst_115 = arith.constant 0.000000e+00 : f32
    %311 = vector.broadcast %cst_115 : f32 to vector<16x32xf32>
    %312 = arith.minimumf %308, %311 : vector<16x32xf32>
    %313 = math.exp %312 : vector<16x32xf32>
    %cst_116 = arith.constant 1.000000e+00 : f32
    %314 = vector.broadcast %cst_116 : f32 to vector<16x32xf32>
    %315 = arith.subf %313, %314 : vector<16x32xf32>
    %316 = arith.select %310, %308, %315 : vector<16x32xi1>, vector<16x32xf32>
    %c2_117 = arith.constant 2 : index
    %c0_118 = arith.constant 0 : index
    %c0_119 = arith.constant 0 : index
    %317 = vector.load %arg8[%c2_117, %c0_118, %c0_119] : memref<3x32x128xf32, #tpu.memory_space<vmem>>, vector<1x32x128xf32>
    %318 = vector.shape_cast %317 : vector<1x32x128xf32> to vector<32x128xf32>
    %c2_120 = arith.constant 2 : index
    %c0_121 = arith.constant 0 : index
    %c0_122 = arith.constant 0 : index
    %319 = vector.load %arg9[%c2_120, %c0_121, %c0_122] : memref<3x1x128xf32, #tpu.memory_space<vmem>>, vector<1x1x128xf32>
    %320 = vector.shape_cast %319 : vector<1x1x128xf32> to vector<1x128xf32>
    %cst_123 = arith.constant dense<0.000000e+00> : vector<16x128xf32>
    %321 = tpu.matmul %316, %318, %cst_123 {dimension_numbers = #tpu.dot_dimension_numbers<[1], [0], [0], [1], [0, 0, 1, 1], [], []>} : vector<16x32xf32>, vector<32x128xf32>, vector<16x128xf32> -> vector<16x128xf32>
    %322 = vector.broadcast %320 : vector<1x128xf32> to vector<16x128xf32>
    %323 = arith.addf %321, %322 : vector<16x128xf32>
    %324 = vector.extract_strided_slice %323 {offsets = [0, 64], sizes = [16, 32], strides = [1, 1]} : vector<16x128xf32> to vector<16x32xf32>
    %325 = vector.extract_strided_slice %323 {offsets = [0, 96], sizes = [16, 32], strides = [1, 1]} : vector<16x128xf32> to vector<16x32xf32>
    %cst_124 = arith.constant 0.000000e+00 : f32
    %326 = vector.broadcast %cst_124 : f32 to vector<16x32xf32>
    %327 = vector.extract_strided_slice %323 {offsets = [0, 0], sizes = [16, 8], strides = [1, 1]} : vector<16x128xf32> to vector<16x8xf32>
    %328 = vector.extract_strided_slice %323 {offsets = [0, 32], sizes = [16, 8], strides = [1, 1]} : vector<16x128xf32> to vector<16x8xf32>
    %cst_125 = arith.constant dense<0.000000e+00> : vector<16x16xf32>
    %329 = tpu.matmul %327, %328, %cst_125 {dimension_numbers = #tpu.dot_dimension_numbers<[1], [1], [0], [0], [0, 0, 1, 0], [], []>} : vector<16x8xf32>, vector<16x8xf32>, vector<16x16xf32> -> vector<16x16xf32>
    %cst_126 = arith.constant 0.353553385 : f32
    %330 = vector.broadcast %cst_126 : f32 to vector<16x16xf32>
    %331 = arith.mulf %329, %330 : vector<16x16xf32>
    %332 = arith.addf %331, %7 : vector<16x16xf32>
    %cst_127 = arith.constant dense<0xFF800000> : vector<16xf32>
    %333 = vector.multi_reduction <maximumf>, %332, %cst_127 [1] : vector<16x16xf32> to vector<16xf32>
    %334 = vector.shape_cast %333 : vector<16xf32> to vector<16x1xf32>
    %335 = vector.broadcast %334 : vector<16x1xf32> to vector<16x16xf32>
    %336 = arith.subf %332, %335 : vector<16x16xf32>
    %337 = math.exp %336 : vector<16x16xf32>
    %cst_128 = arith.constant dense<0.000000e+00> : vector<16xf32>
    %338 = vector.multi_reduction <add>, %337, %cst_128 [1] : vector<16x16xf32> to vector<16xf32>
    %339 = vector.shape_cast %338 : vector<16xf32> to vector<16x1xf32>
    %cst_129 = arith.constant 1.000000e-16 : f32
    %340 = vector.broadcast %cst_129 : f32 to vector<16x1xf32>
    %341 = arith.maximumf %339, %340 : vector<16x1xf32>
    %342 = tpu.reciprocal %341 {approx = true} : vector<16x1xf32> -> vector<16x1xf32>
    %343 = vector.broadcast %342 : vector<16x1xf32> to vector<16x16xf32>
    %344 = arith.mulf %337, %343 : vector<16x16xf32>
    %345 = vector.broadcast %14 : vector<1x32xf32> to vector<16x32xf32>
    %346 = arith.mulf %324, %345 : vector<16x32xf32>
    %cst_130 = arith.constant dense<0.000000e+00> : vector<16x32xf32>
    %347 = tpu.matmul %344, %346, %cst_130 {dimension_numbers = #tpu.dot_dimension_numbers<[1], [0], [0], [1], [0, 0, 1, 1], [], []>} : vector<16x16xf32>, vector<16x32xf32>, vector<16x32xf32> -> vector<16x32xf32>
    %348 = arith.addf %326, %347 : vector<16x32xf32>
    %349 = vector.extract_strided_slice %323 {offsets = [0, 8], sizes = [16, 8], strides = [1, 1]} : vector<16x128xf32> to vector<16x8xf32>
    %350 = vector.extract_strided_slice %323 {offsets = [0, 40], sizes = [16, 8], strides = [1, 1]} : vector<16x128xf32> to vector<16x8xf32>
    %cst_131 = arith.constant dense<0.000000e+00> : vector<16x16xf32>
    %351 = tpu.matmul %349, %350, %cst_131 {dimension_numbers = #tpu.dot_dimension_numbers<[1], [1], [0], [0], [0, 0, 1, 0], [], []>} : vector<16x8xf32>, vector<16x8xf32>, vector<16x16xf32> -> vector<16x16xf32>
    %cst_132 = arith.constant 0.353553385 : f32
    %352 = vector.broadcast %cst_132 : f32 to vector<16x16xf32>
    %353 = arith.mulf %351, %352 : vector<16x16xf32>
    %354 = arith.addf %353, %7 : vector<16x16xf32>
    %cst_133 = arith.constant dense<0xFF800000> : vector<16xf32>
    %355 = vector.multi_reduction <maximumf>, %354, %cst_133 [1] : vector<16x16xf32> to vector<16xf32>
    %356 = vector.shape_cast %355 : vector<16xf32> to vector<16x1xf32>
    %357 = vector.broadcast %356 : vector<16x1xf32> to vector<16x16xf32>
    %358 = arith.subf %354, %357 : vector<16x16xf32>
    %359 = math.exp %358 : vector<16x16xf32>
    %cst_134 = arith.constant dense<0.000000e+00> : vector<16xf32>
    %360 = vector.multi_reduction <add>, %359, %cst_134 [1] : vector<16x16xf32> to vector<16xf32>
    %361 = vector.shape_cast %360 : vector<16xf32> to vector<16x1xf32>
    %cst_135 = arith.constant 1.000000e-16 : f32
    %362 = vector.broadcast %cst_135 : f32 to vector<16x1xf32>
    %363 = arith.maximumf %361, %362 : vector<16x1xf32>
    %364 = tpu.reciprocal %363 {approx = true} : vector<16x1xf32> -> vector<16x1xf32>
    %365 = vector.broadcast %364 : vector<16x1xf32> to vector<16x16xf32>
    %366 = arith.mulf %359, %365 : vector<16x16xf32>
    %367 = vector.broadcast %15 : vector<1x32xf32> to vector<16x32xf32>
    %368 = arith.mulf %324, %367 : vector<16x32xf32>
    %cst_136 = arith.constant dense<0.000000e+00> : vector<16x32xf32>
    %369 = tpu.matmul %366, %368, %cst_136 {dimension_numbers = #tpu.dot_dimension_numbers<[1], [0], [0], [1], [0, 0, 1, 1], [], []>} : vector<16x16xf32>, vector<16x32xf32>, vector<16x32xf32> -> vector<16x32xf32>
    %370 = arith.addf %348, %369 : vector<16x32xf32>
    %371 = vector.extract_strided_slice %323 {offsets = [0, 16], sizes = [16, 8], strides = [1, 1]} : vector<16x128xf32> to vector<16x8xf32>
    %372 = vector.extract_strided_slice %323 {offsets = [0, 48], sizes = [16, 8], strides = [1, 1]} : vector<16x128xf32> to vector<16x8xf32>
    %cst_137 = arith.constant dense<0.000000e+00> : vector<16x16xf32>
    %373 = tpu.matmul %371, %372, %cst_137 {dimension_numbers = #tpu.dot_dimension_numbers<[1], [1], [0], [0], [0, 0, 1, 0], [], []>} : vector<16x8xf32>, vector<16x8xf32>, vector<16x16xf32> -> vector<16x16xf32>
    %cst_138 = arith.constant 0.353553385 : f32
    %374 = vector.broadcast %cst_138 : f32 to vector<16x16xf32>
    %375 = arith.mulf %373, %374 : vector<16x16xf32>
    %376 = arith.addf %375, %7 : vector<16x16xf32>
    %cst_139 = arith.constant dense<0xFF800000> : vector<16xf32>
    %377 = vector.multi_reduction <maximumf>, %376, %cst_139 [1] : vector<16x16xf32> to vector<16xf32>
    %378 = vector.shape_cast %377 : vector<16xf32> to vector<16x1xf32>
    %379 = vector.broadcast %378 : vector<16x1xf32> to vector<16x16xf32>
    %380 = arith.subf %376, %379 : vector<16x16xf32>
    %381 = math.exp %380 : vector<16x16xf32>
    %cst_140 = arith.constant dense<0.000000e+00> : vector<16xf32>
    %382 = vector.multi_reduction <add>, %381, %cst_140 [1] : vector<16x16xf32> to vector<16xf32>
    %383 = vector.shape_cast %382 : vector<16xf32> to vector<16x1xf32>
    %cst_141 = arith.constant 1.000000e-16 : f32
    %384 = vector.broadcast %cst_141 : f32 to vector<16x1xf32>
    %385 = arith.maximumf %383, %384 : vector<16x1xf32>
    %386 = tpu.reciprocal %385 {approx = true} : vector<16x1xf32> -> vector<16x1xf32>
    %387 = vector.broadcast %386 : vector<16x1xf32> to vector<16x16xf32>
    %388 = arith.mulf %381, %387 : vector<16x16xf32>
    %389 = vector.broadcast %16 : vector<1x32xf32> to vector<16x32xf32>
    %390 = arith.mulf %324, %389 : vector<16x32xf32>
    %cst_142 = arith.constant dense<0.000000e+00> : vector<16x32xf32>
    %391 = tpu.matmul %388, %390, %cst_142 {dimension_numbers = #tpu.dot_dimension_numbers<[1], [0], [0], [1], [0, 0, 1, 1], [], []>} : vector<16x16xf32>, vector<16x32xf32>, vector<16x32xf32> -> vector<16x32xf32>
    %392 = arith.addf %370, %391 : vector<16x32xf32>
    %393 = vector.extract_strided_slice %323 {offsets = [0, 24], sizes = [16, 8], strides = [1, 1]} : vector<16x128xf32> to vector<16x8xf32>
    %394 = vector.extract_strided_slice %323 {offsets = [0, 56], sizes = [16, 8], strides = [1, 1]} : vector<16x128xf32> to vector<16x8xf32>
    %cst_143 = arith.constant dense<0.000000e+00> : vector<16x16xf32>
    %395 = tpu.matmul %393, %394, %cst_143 {dimension_numbers = #tpu.dot_dimension_numbers<[1], [1], [0], [0], [0, 0, 1, 0], [], []>} : vector<16x8xf32>, vector<16x8xf32>, vector<16x16xf32> -> vector<16x16xf32>
    %cst_144 = arith.constant 0.353553385 : f32
    %396 = vector.broadcast %cst_144 : f32 to vector<16x16xf32>
    %397 = arith.mulf %395, %396 : vector<16x16xf32>
    %398 = arith.addf %397, %7 : vector<16x16xf32>
    %cst_145 = arith.constant dense<0xFF800000> : vector<16xf32>
    %399 = vector.multi_reduction <maximumf>, %398, %cst_145 [1] : vector<16x16xf32> to vector<16xf32>
    %400 = vector.shape_cast %399 : vector<16xf32> to vector<16x1xf32>
    %401 = vector.broadcast %400 : vector<16x1xf32> to vector<16x16xf32>
    %402 = arith.subf %398, %401 : vector<16x16xf32>
    %403 = math.exp %402 : vector<16x16xf32>
    %cst_146 = arith.constant dense<0.000000e+00> : vector<16xf32>
    %404 = vector.multi_reduction <add>, %403, %cst_146 [1] : vector<16x16xf32> to vector<16xf32>
    %405 = vector.shape_cast %404 : vector<16xf32> to vector<16x1xf32>
    %cst_147 = arith.constant 1.000000e-16 : f32
    %406 = vector.broadcast %cst_147 : f32 to vector<16x1xf32>
    %407 = arith.maximumf %405, %406 : vector<16x1xf32>
    %408 = tpu.reciprocal %407 {approx = true} : vector<16x1xf32> -> vector<16x1xf32>
    %409 = vector.broadcast %408 : vector<16x1xf32> to vector<16x16xf32>
    %410 = arith.mulf %403, %409 : vector<16x16xf32>
    %411 = vector.broadcast %17 : vector<1x32xf32> to vector<16x32xf32>
    %412 = arith.mulf %324, %411 : vector<16x32xf32>
    %cst_148 = arith.constant dense<0.000000e+00> : vector<16x32xf32>
    %413 = tpu.matmul %410, %412, %cst_148 {dimension_numbers = #tpu.dot_dimension_numbers<[1], [0], [0], [1], [0, 0, 1, 1], [], []>} : vector<16x16xf32>, vector<16x32xf32>, vector<16x32xf32> -> vector<16x32xf32>
    %414 = arith.addf %392, %413 : vector<16x32xf32>
    %415 = vector.broadcast %13 : vector<16x1xf32> to vector<16x32xf32>
    %416 = arith.mulf %414, %415 : vector<16x32xf32>
    %417 = arith.addf %416, %325 : vector<16x32xf32>
    %418 = arith.addf %417, %316 : vector<16x32xf32>
    %c3 = arith.constant 3 : index
    %c0_149 = arith.constant 0 : index
    %c0_150 = arith.constant 0 : index
    %419 = vector.load %arg6[%c3, %c0_149, %c0_150] : memref<4x1x32xf32, #tpu.memory_space<vmem>>, vector<1x1x32xf32>
    %420 = vector.shape_cast %419 : vector<1x1x32xf32> to vector<1x32xf32>
    %c3_151 = arith.constant 3 : index
    %c0_152 = arith.constant 0 : index
    %c0_153 = arith.constant 0 : index
    %421 = vector.load %arg7[%c3_151, %c0_152, %c0_153] : memref<4x1x32xf32, #tpu.memory_space<vmem>>, vector<1x1x32xf32>
    %422 = vector.shape_cast %421 : vector<1x1x32xf32> to vector<1x32xf32>
    %cst_154 = arith.constant dense<0.000000e+00> : vector<16xf32>
    %423 = vector.multi_reduction <add>, %418, %cst_154 [1] : vector<16x32xf32> to vector<16xf32>
    %424 = vector.shape_cast %423 : vector<16xf32> to vector<16x1xf32>
    %cst_155 = arith.constant 3.200000e+01 : f32
    %425 = vector.broadcast %cst_155 : f32 to vector<16x1xf32>
    %426 = arith.divf %424, %425 : vector<16x1xf32>
    %427 = vector.broadcast %426 : vector<16x1xf32> to vector<16x32xf32>
    %428 = arith.subf %418, %427 : vector<16x32xf32>
    %429 = arith.mulf %428, %428 : vector<16x32xf32>
    %cst_156 = arith.constant dense<0.000000e+00> : vector<16xf32>
    %430 = vector.multi_reduction <add>, %429, %cst_156 [1] : vector<16x32xf32> to vector<16xf32>
    %431 = vector.shape_cast %430 : vector<16xf32> to vector<16x1xf32>
    %cst_157 = arith.constant 3.200000e+01 : f32
    %432 = vector.broadcast %cst_157 : f32 to vector<16x1xf32>
    %433 = arith.divf %431, %432 : vector<16x1xf32>
    %cst_158 = arith.constant 9.99999974E-6 : f32
    %434 = vector.broadcast %cst_158 : f32 to vector<16x1xf32>
    %435 = arith.addf %433, %434 : vector<16x1xf32>
    %436 = math.rsqrt %435 : vector<16x1xf32>
    %437 = vector.broadcast %436 : vector<16x1xf32> to vector<16x32xf32>
    %438 = arith.mulf %428, %437 : vector<16x32xf32>
    %439 = vector.broadcast %420 : vector<1x32xf32> to vector<16x32xf32>
    %440 = arith.mulf %438, %439 : vector<16x32xf32>
    %441 = vector.broadcast %422 : vector<1x32xf32> to vector<16x32xf32>
    %442 = arith.addf %440, %441 : vector<16x32xf32>
    %cst_159 = arith.constant 0.000000e+00 : f32
    %443 = vector.broadcast %cst_159 : f32 to vector<16x32xf32>
    %444 = arith.cmpf ogt, %442, %443 : vector<16x32xf32>
    %cst_160 = arith.constant 0.000000e+00 : f32
    %445 = vector.broadcast %cst_160 : f32 to vector<16x32xf32>
    %446 = arith.minimumf %442, %445 : vector<16x32xf32>
    %447 = math.exp %446 : vector<16x32xf32>
    %cst_161 = arith.constant 1.000000e+00 : f32
    %448 = vector.broadcast %cst_161 : f32 to vector<16x32xf32>
    %449 = arith.subf %447, %448 : vector<16x32xf32>
    %450 = arith.select %444, %442, %449 : vector<16x32xi1>, vector<16x32xf32>
    %cst_162 = arith.constant dense<0.000000e+00> : vector<16xf32>
    %451 = vector.multi_reduction <add>, %450, %cst_162 [1] : vector<16x32xf32> to vector<16xf32>
    %452 = vector.shape_cast %451 : vector<16xf32> to vector<16x1xf32>
    %453 = arith.negf %452 : vector<16x1xf32>
    %454 = math.exp %453 : vector<16x1xf32>
    %cst_163 = arith.constant 1.000000e+00 : f32
    %455 = vector.broadcast %cst_163 : f32 to vector<16x1xf32>
    %456 = arith.addf %455, %454 : vector<16x1xf32>
    %457 = arith.divf %455, %456 : vector<16x1xf32>
    %458 = vector.broadcast %457 : vector<16x1xf32> to vector<16x32xf32>
    %459 = arith.mulf %450, %458 : vector<16x32xf32>
    %cst_164 = arith.constant dense<0.000000e+00> : vector<2xf32>
    %460 = vector.multi_reduction <add>, %2, %cst_164 [1] : vector<2x16xf32> to vector<2xf32>
    %461 = vector.shape_cast %460 : vector<2xf32> to vector<2x1xf32>
    %cst_165 = arith.constant 1.000000e+00 : f32
    %462 = vector.broadcast %cst_165 : f32 to vector<2x1xf32>
    %463 = arith.maximumf %461, %462 : vector<2x1xf32>
    %cst_166 = arith.constant dense<0.000000e+00> : vector<2x32xf32>
    %464 = tpu.matmul %2, %459, %cst_166 {dimension_numbers = #tpu.dot_dimension_numbers<[1], [0], [0], [1], [0, 0, 1, 1], [], []>} : vector<2x16xf32>, vector<16x32xf32>, vector<2x32xf32> -> vector<2x32xf32>
    %465 = vector.broadcast %463 : vector<2x1xf32> to vector<2x32xf32>
    %466 = arith.divf %464, %465 : vector<2x32xf32>
    %467 = vector.shape_cast %2 : vector<2x16xf32> to vector<2x16x1xf32>
    %cst_167 = arith.constant 0.000000e+00 : f32
    %468 = vector.broadcast %cst_167 : f32 to vector<2x16x1xf32>
    %469 = arith.cmpf ogt, %467, %468 : vector<2x16x1xf32>
    %470 = vector.shape_cast %459 : vector<16x32xf32> to vector<1x16x32xf32>
    %cst_168 = arith.constant -1.000000e+30 : f32
    %471 = vector.shape_cast %469 : vector<2x16x1xi1> to vector<2x16x1xi1>
    %472 = vector.broadcast %471 : vector<2x16x1xi1> to vector<2x16x32xi1>
    %473 = vector.shape_cast %470 : vector<1x16x32xf32> to vector<1x16x32xf32>
    %474 = vector.broadcast %473 : vector<1x16x32xf32> to vector<2x16x32xf32>
    %475 = vector.broadcast %cst_168 : f32 to vector<2x16x32xf32>
    %476 = arith.select %472, %474, %475 : vector<2x16x32xi1>, vector<2x16x32xf32>
    %cst_169 = arith.constant dense<0xFF800000> : vector<2x32xf32>
    %477 = vector.multi_reduction <maximumf>, %476, %cst_169 [1] : vector<2x16x32xf32> to vector<2x32xf32>
    %478 = tpu.concatenate %477, %466 in 1 : vector<2x32xf32>, vector<2x32xf32> -> vector<2x64xf32>
    %c0_170 = arith.constant 0 : index
    %c0_171 = arith.constant 0 : index
    %479 = vector.load %arg10[%c0_170, %c0_171] : memref<64x32xf32, #tpu.memory_space<vmem>>, vector<64x32xf32>
    %cst_172 = arith.constant dense<0.000000e+00> : vector<2x32xf32>
    %480 = tpu.matmul %478, %479, %cst_172 {dimension_numbers = #tpu.dot_dimension_numbers<[1], [0], [0], [1], [0, 0, 1, 1], [], []>} : vector<2x64xf32>, vector<64x32xf32>, vector<2x32xf32> -> vector<2x32xf32>
    %c0_173 = arith.constant 0 : index
    %c0_174 = arith.constant 0 : index
    %481 = vector.load %arg11[%c0_173, %c0_174] : memref<1x32xf32, #tpu.memory_space<vmem>>, vector<1x32xf32>
    %482 = vector.broadcast %481 : vector<1x32xf32> to vector<2x32xf32>
    %483 = arith.addf %480, %482 : vector<2x32xf32>
    %cst_175 = arith.constant 0.000000e+00 : f32
    %484 = vector.broadcast %cst_175 : f32 to vector<2x32xf32>
    %485 = arith.cmpf ogt, %483, %484 : vector<2x32xf32>
    %cst_176 = arith.constant 0.000000e+00 : f32
    %486 = vector.broadcast %cst_176 : f32 to vector<2x32xf32>
    %487 = arith.minimumf %483, %486 : vector<2x32xf32>
    %488 = math.exp %487 : vector<2x32xf32>
    %cst_177 = arith.constant 1.000000e+00 : f32
    %489 = vector.broadcast %cst_177 : f32 to vector<2x32xf32>
    %490 = arith.subf %488, %489 : vector<2x32xf32>
    %491 = arith.select %485, %483, %490 : vector<2x32xi1>, vector<2x32xf32>
    %c0_178 = arith.constant 0 : index
    %c0_179 = arith.constant 0 : index
    %492 = vector.load %arg12[%c0_178, %c0_179] : memref<32x128xf32, #tpu.memory_space<vmem>>, vector<32x128xf32>
    %cst_180 = arith.constant dense<0.000000e+00> : vector<2x128xf32>
    %493 = tpu.matmul %491, %492, %cst_180 {dimension_numbers = #tpu.dot_dimension_numbers<[1], [0], [0], [1], [0, 0, 1, 1], [], []>} : vector<2x32xf32>, vector<32x128xf32>, vector<2x128xf32> -> vector<2x128xf32>
    %c0_181 = arith.constant 0 : index
    %c0_182 = arith.constant 0 : index
    %494 = vector.load %arg13[%c0_181, %c0_182] : memref<1x128xf32, #tpu.memory_space<vmem>>, vector<1x128xf32>
    %495 = vector.broadcast %494 : vector<1x128xf32> to vector<2x128xf32>
    %496 = arith.addf %493, %495 : vector<2x128xf32>
    %497 = arith.mulf %496, %496 : vector<2x128xf32>
    %cst_183 = arith.constant dense<0.000000e+00> : vector<2xf32>
    %498 = vector.multi_reduction <add>, %497, %cst_183 [1] : vector<2x128xf32> to vector<2xf32>
    %499 = vector.shape_cast %498 : vector<2xf32> to vector<2x1xf32>
    %cst_184 = arith.constant 1.000000e-24 : f32
    %500 = vector.broadcast %cst_184 : f32 to vector<2x1xf32>
    %501 = arith.maximumf %499, %500 : vector<2x1xf32>
    %502 = math.rsqrt %501 : vector<2x1xf32>
    %503 = vector.broadcast %502 : vector<2x1xf32> to vector<2x128xf32>
    %504 = arith.mulf %496, %503 : vector<2x128xf32>
    %c0_185 = arith.constant 0 : index
    %c0_186 = arith.constant 0 : index
    %505 = vector.load %arg14[%c0_185, %c0_186] : memref<2x128xf32, #tpu.memory_space<vmem>>, vector<2x128xf32>
    tpu.vector_store %arg14[%c0_185, %c0_186], %504 {strides = array<i32>} : memref<2x128xf32, #tpu.memory_space<vmem>>, vector<2x128xf32>,
    return
  }
}

</mosaic_0001>

<bundles_post_ra>
// kernel: tpu_custom_call.1
= control target key start
LH: loop header
LB: loop body
LE: loop exit
PB: predicated region body
PF: predicated region fallthrough
CT: control target
= control target key end

     0   :  { %19 = vsyncpa [#allocation3], 0  ;;  %s5244_s0 = inlined_call_operand.hbm [shape: f32[16,12], index: 0, kind: input, shape index: {}]   ;;  %s5245_s1 = inlined_call_operand.hbm [shape: f32[16,16], index: 1, kind: input, shape index: {}]   ;;  %s5246_s2 = inlined_call_operand.hbm [shape: f32[2,16], index: 2, kind: input, shape index: {}]   ;;  %s5247_s3 = inlined_call_operand.vmem [shape: f32[4,32], index: 3, kind: input, shape index: {}]   ;;  %s5248_s4 = inlined_call_operand.hbm [shape: f32[12,32], index: 4, kind: input, shape index: {}]   ;;  %s5249_s5 = inlined_call_operand.vmem [shape: f32[1,32], index: 5, kind: input, shape index: {}]   ;;  %s5250_s6 = inlined_call_operand.vmem [shape: f32[4,1,32], index: 6, kind: input, shape index: {}]   ;;  %s5251_s7 = inlined_call_operand.vmem [shape: f32[4,1,32], index: 7, kind: input, shape index: {}]   ;;  %s5252_s8 = inlined_call_operand.vmem [shape: f32[3,32,128], index: 8, kind: input, shape index: {}]   ;;  %s5253_s9 = inlined_call_operand.vmem [shape: f32[3,1,128], index: 9, kind: input, shape index: {}]   ;;  %s5254_s10 = inlined_call_operand.vmem [shape: f32[64,32], index: 10, kind: input, shape index: {}]   ;;  %s5255_s11 = inlined_call_operand.vmem [shape: f32[1,32], index: 11, kind: input, shape index: {}]   ;;  %s5256_s12 = inlined_call_operand.hbm [shape: f32[32,128], index: 12, kind: input, shape index: {}]   ;;  %s5257_s13 = inlined_call_operand.vmem [shape: f32[1,128], index: 13, kind: input, shape index: {}]   ;;  %s5258_s14 = inlined_call_operand.hbm [shape: f32[2,128], index: 14, kind: output, shape index: {}]  }
   0x1   :  { %20 = vsyncpa [#allocation6], 0 }
   0x2   :  { %21 = vsyncpa [#allocation9], 0 }
   0x3   :  { %22 = vsyncpa [#allocation4], 0  ;;  %s4492_s29 = smov [#allocation5]   ;;  %s4493_s15 = smov [#allocation8]  }
   0x4   :  { %s40_s30 = sshll.u32 %s4492_s29, 4  ;;  %s64_s16 = sshll.u32 %s4493_s15, 4  ;;  %s41_s30 = int_to_ptr.vmem [resolvable:$true] %s40_s30  ;;  %s65_s16 = int_to_ptr.vmem [resolvable:$true] %s64_s16 }
   0x5   :  { %s4372_s17 = scalar_lea.vmem %s41_s30, 256  ;;  %p4377_p1 = scmp.lt.s32.totalorder %s41_s30, %s41_s30 }
   0x6   :  { %p4373_p0 = scmp.ne.s32.totalorder %s41_s30, %s4372_s17  ;;  %p4378_p2 = scmp.lt.s32.totalorder %s4372_s17, %s4372_s17 }
   0x8   :  { %p4379_p3 = por %p4378_p2, %p4377_p1 }
   0xa   :  { %p4380_p4 = pnand %p4379_p3, %p4373_p0 }
   0xc   :  { %4383 = shalt.err (!%p4380_p4)
}
   0xd   :  { %s4494_s18 = smov 128   ;;  %s4495_s19 = smov 8  }
   0xe   :  { %46 = dma.hbm_to_vmem [thread:$0]  %s5245_s1, 256, %s41_s30, [#allocation6], %s4494_s18, %s4494_s18, %s4495_s19  }
   0xf   :  { %s4392_s22 = scalar_lea.vmem %s65_s16, 256  ;;  %p4397_p6 = scmp.lt.s32.totalorder %s65_s16, %s65_s16 }
  0x10   :  { %p4393_p5 = scmp.ne.s32.totalorder %s65_s16, %s4392_s22  ;;  %p4398_p7 = scmp.lt.s32.totalorder %s4392_s22, %s4392_s22 }
  0x12   :  { %p4399_p8 = por %p4398_p7, %p4397_p6 }
  0x14   :  { %p4400_p9 = pnand %p4399_p8, %p4393_p5 }
  0x16   :  { %4403 = shalt.err (!%p4400_p9)
}
  0x17   :  { %70 = dma.hbm_to_vmem [thread:$0]  %s5248_s4, 256, %s65_s16, [#allocation9], %s4494_s18, %s4494_s18, %s4495_s19  }
  0x18   :  { %s4496_s25 = smov [#allocation2]   ;;  %s4497_s27 = smov [#allocation7]  }
  0x19   :  { %s28_s26 = sshll.u32 %s4496_s25, 4  ;;  %s53_s28 = sshll.u32 %s4497_s27, 4  ;;  %s29_s26 = int_to_ptr.vmem [resolvable:$true] %s28_s26  ;;  %s54_s28 = int_to_ptr.vmem [resolvable:$true] %s53_s28 }
  0x1a   :  { %s4412_s1 = scalar_lea.vmem %s29_s26, 256  ;;  %p4417_p11 = scmp.lt.s32.totalorder %s29_s26, %s29_s26 }
  0x1b   :  { %p4413_p10 = scmp.ne.s32.totalorder %s29_s26, %s4412_s1  ;;  %p4418_p12 = scmp.lt.s32.totalorder %s4412_s1, %s4412_s1 }
  0x1d   :  { %p4419_p13 = por %p4418_p12, %p4417_p11 }
  0x1f   :  { %p4420_p0 = pnand %p4419_p13, %p4413_p10 }
  0x21   :  { %4423 = shalt.err (!%p4420_p0)
}
  0x22   :  { %34 = dma.hbm_to_vmem [thread:$0]  %s5244_s0, 256, %s29_s26, [#allocation3], %s4494_s18, %s4494_s18, %s4495_s19  }
  0x23   :  { %s4432_s4 = scalar_lea.vmem %s54_s28, 32  ;;  %p4437_p2 = scmp.lt.s32.totalorder %s54_s28, %s54_s28 }
  0x24   :  { %p4433_p1 = scmp.ne.s32.totalorder %s54_s28, %s4432_s4  ;;  %p4438_p3 = scmp.lt.s32.totalorder %s4432_s4, %s4432_s4 }
  0x26   :  { %p4439_p4 = por %p4438_p3, %p4437_p2 }
  0x28   :  { %p4440_p5 = pnand %p4439_p4, %p4433_p1 }
  0x2a   :  { %4443 = shalt.err (!%p4440_p5)
}
  0x2b   :  { %56 = dma.hbm_to_vmem [thread:$0]  %s5246_s2, 32, %s54_s28, [#allocation6]  }
  0x2c   :  { %s4498_s17 = smov [#allocation10]  }
  0x2d   :  { %s90_s20 = sshll.u32 %s4498_s17, 4  ;;  %s91_s20 = int_to_ptr.vmem [resolvable:$true] %s90_s20 }
  0x2e   :  { %s4452_s21 = scalar_lea.vmem %s91_s20, 512  ;;  %p4457_p7 = scmp.lt.s32.totalorder %s91_s20, %s91_s20 }
  0x2f   :  { %p4453_p6 = scmp.ne.s32.totalorder %s91_s20, %s4452_s21  ;;  %p4458_p8 = scmp.lt.s32.totalorder %s4452_s21, %s4452_s21 }
  0x31   :  { %p4459_p9 = por %p4458_p8, %p4457_p7 }
  0x33   :  { %p4460_p10 = pnand %p4459_p9, %p4453_p6 }
  0x35   :  { %4463 = shalt.err (!%p4460_p10)
}
  0x36   :  { %96 = dma.hbm_to_vmem [thread:$0]  %s5256_s12, 512, %s91_s20, [#allocation9], %s4494_s18, %s4494_s18, %s4495_s19  }
  0x37   :  { %4484 = dma.done.wait [#allocation3], 256  }
  0x38   :  { %4485 = vsyncadd [#allocation3], 4294967040 }
  0x39   :  { %4486 = dma.done.wait [#allocation6], 288  }
  0x3a   :  { %4487 = vsyncadd [#allocation6], 4294967008 }
  0x3b   :  { %4488 = dma.done.wait [#allocation9], 768  }
  0x3c   :  { %4489 = vsyncadd [#allocation9], 4294966528  ;;  %vm153_vm0 = vcmask 1043456   ;;  %vm146_vm1 = vcmask 97280   ;;  %v138_v0 = vld [vmem:[#allocation8 + $0x8] sm:$0xf] }
  0x3d   :  { %v137_v1 = vld [vmem:[#allocation8] sm:$0xff]  ;;  %3962 = vmatprep.subr.msk.mxu1 %vm153_vm0, %v138_v0  ;;  %v3704_v5 = vld [vmem:[%s5249_s5] ss:$0 sm:$0xff]  ;;  %vm234_vm2 = vcmask 261120   ;;  %v283_v21 = vld [vmem:[%s5252_s8 + $0x18] sm:$0xff]  ;;  %vm378_vm3 = vcmask 64512  }
  0x3e   :  { %v114_v2 = vld [vmem:[#allocation2] sm:$0xff]  ;;  %3963 = vmatpush3.msk.msra.mxu1 %vm153_vm0, %v138_v0  ;;  %v115_v3 = vld [vmem:[#allocation2 + $0x8] sm:$0xff]  ;;  %v282_v22 = vld [vmem:[%s5252_s8 + $0x10] sm:$0xff]  ;;  %s4499_s16 = smov 96   ;;  %s4500_s17 = smov 88   ;;  %vm124_vm4 = vcmask 130048  }
  0x3f   :  { %3966 = vmatprep.mubr.msk.f32.mxu1 %vm146_vm1, %v114_v2  ;;  %3964 = vmatprep.subr.mxu1 %v137_v1  ;;  %v281_v23 = vld [vmem:[%s5252_s8 + $0x8] sm:$0xff]  ;;  %v280_v24 = vld [vmem:[%s5252_s8] sm:$0xff]  ;;  %s4501_s20 = smov 80   ;;  %s4502_s21 = smov 120   ;;  %v4697_v58 = vld [vmem:[#allocation5 + $0x8] sm:$0xff]  ;;  %vm3349_vm12 = vcmask 123904  }
  0x40   :  { %3965 = vmatpush3.msra.mxu1 %v137_v1  ;;  %v3708_v32 = vld [vmem:[%s5250_s6] ss:$0 sm:$0xff]  ;;  %s4503_s0 = smov 112   ;;  %v3701_v59 = vadd.f32 -1.0, %v4697_v58  ;;  %v4702_v62 = vld [vmem:[#allocation5] sm:$0xff]  ;;  %s4504_s12 = smov 64  }
  0x41   :  { %3967 = vmatmul.mubr.msk.f32.vlgmr.msra.gmra.mxu1 %vm146_vm1, %v115_v3  ;;  %3969 = vmatprep.subr.mxu1 %v283_v21  ;;  %v3709_v34 = vld [vmem:[%s5251_s7] ss:$0 sm:$0xff]  ;;  %v3700_v1 = vadd.f32 -1.0, %v4702_v62  ;;  %s4506_s5 = smov 104   ;;  %s4507_s18 = smov 32   ;;  %vm4509_vm14 = vmmov 0  }
  0x42   :  { %3970 = vmatpush3.msra.mxu1 %v283_v21  ;;  %v3710_v43 = vld [vmem:[%s5253_s9] ss:$0 sm:$0xff]  ;;  %v4700_v60 = vmul.f32 1e+30, %v3701_v59 }
  0x43   :  { %3971 = vmatprep.subr.mxu1 %v282_v22 }
  0x44   :  { %3972 = vmatpush3.msra.mxu1 %v282_v22 }
  0x45   :  { %3973 = vmatprep.subr.mxu1 %v281_v23 }
  0x46   :  { %3974 = vmatpush3.msra.mxu1 %v281_v23 }
  0x47   :  { %3975 = vmatprep.subr.mxu1 %v280_v24 }
  0x48   :  { %3976 = vmatpush3.msra.mxu1 %v280_v24  ;;  %v490_v24 = vlaneseq }
 0x101   :  { %v3968_v4 = vpop.f32.mrf.mxu1 }
 0x102   :  { %v229_v8 = vadd.f32 %v3968_v4, %v3704_v5 }
 0x103   :  { %v223_v6 = vpop.f32.mrf.mxu1 }
 0x104   :  { %v224_v7 = vadd.f32 %v3704_v5, %v223_v6  ;;  %v238_v10 = vsel %vm234_vm2, %v229_v8, 0.0 }
 0x106   :  { %v235_v9 = vsel %vm234_vm2, %v224_v7, 0.0 }
 0x107   :  { %236 = vadd.xlane.f32.xlu0 %v235_v9 }
 0x10b   :  { %239 = vadd.xlane.f32.xlu0 %v238_v10  ;;  %v4711_v10 = vmul.f32 1e+30, %v3700_v1 }
 0x190   :  { %v237_v11 = vpop.xlane.xlu0 %236 }
 0x191   :  { %v242_v12 = vmul.f32 0.03125, %v237_v11 }
 0x193   :  { %v244_v13 = vsub.f32 %v224_v7, %v242_v12 }
 0x194   :  { %v240_v14 = vpop.xlane.xlu0 %239 }
 0x195   :  { %v243_v15 = vmul.f32 0.03125, %v240_v14  ;;  %v246_v16 = vmul.f32 %v244_v13, %v244_v13 }
 0x197   :  { %v245_v17 = vsub.f32 %v229_v8, %v243_v15  ;;  %v248_v18 = vsel %vm234_vm2, %v246_v16, 0.0 }
 0x198   :  { %249 = vadd.xlane.f32.xlu1 %v248_v18 }
 0x199   :  { %v247_v19 = vmul.f32 %v245_v17, %v245_v17 }
 0x19b   :  { %v251_v20 = vsel %vm234_vm2, %v247_v19, 0.0 }
 0x19c   :  { %252 = vadd.xlane.f32.xlu1 %v251_v20 }
 0x221   :  { %v250_v25 = vpop.xlane.xlu1 %249 }
 0x222   :  { %v254_v26 = vmul.f32 0.03125, %v250_v25  ;;  %v4725_v25 = vshrl.u32 %v490_v24, 7 }
 0x224   :  { %v256_v27 = vadd.f32 1e-05, %v254_v26  ;;  %v492_v26 = vsub.s32 0, %v4725_v25 }
 0x225   :  { %v253_v28 = vpop.xlane.xlu1 %252 }
 0x226   :  { %4226 = vrsqrt.f32 %v256_v27  ;;  %v255_v29 = vmul.f32 0.03125, %v253_v28  ;;  %v4731_v27 = vld [vmem:[%s5247_s3] sm:$0xf]  ;;  %s4505_s3 = smov 72  }
 0x227   :  { %v493_v28 = vrot.slane %v4731_v27, %v492_v26 }
 0x228   :  { %v257_v30 = vadd.f32 1e-05, %v255_v29  ;;  %v928_v29 = vsub.s32 2, %v4725_v25 }
 0x22a   :  { %4228 = vrsqrt.f32 %v257_v30  ;;  %v621_v30 = vsub.s32 1, %v4725_v25 }
 0x233   :  { %v4227_v31 = vpop.eup %4226 }
 0x234   :  { %v260_v33 = vmul.f32 %v4227_v31, %v244_v13  ;;  %v929_v31 = vrot.slane %v4731_v27, %v928_v29 }
 0x236   :  { %v268_v35 = vmul.f32 %v3708_v32, %v260_v33 }
 0x237   :  { %v4229_v36 = vpop.eup %4228 }
 0x238   :  { %v261_v37 = vmul.f32 %v4229_v36, %v245_v17  ;;  %v4638_v38 = vadd.f32 %v3709_v34, %v268_v35 }
 0x23a   :  { %v269_v39 = vmul.f32 %v3708_v32, %v261_v37  ;;  %v278_v40 = vmax.f32 %v4638_v38, 0.0  ;;  %v622_v32 = vrot.slane %v4731_v27, %v621_v30  ;;  %v3746_v38 = vld [vmem:[%s5252_s8 + $0x38] sm:$0xff] }
 0x23c   :  { %v4641_v41 = vadd.f32 %v3709_v34, %v269_v39  ;;  %3977 = vmatprep.mubr.msk.f32.mxu1 %vm234_vm2, %v278_v40 }
 0x23e   :  { %v279_v42 = vmax.f32 %v4641_v41, 0.0 }
 0x240   :  { %3978 = vmatmul.mubr.msk.f32.vlgmr.msra.gmra.mxu1 %vm234_vm2, %v279_v42 }
 0x300   :  { %v3979_v44 = vpop.f32.mrf.mxu1 }
 0x301   :  { %v4653_v45 = vadd.f32 %v3979_v44, %v3710_v43 }
 0x302   :  { %v363_v46 = vpop.f32.mrf.mxu1 }
 0x303   :  { %v4655_v47 = vadd.f32 %v3710_v43, %v363_v46  ;;  %376 = vrot.lane.b32.xlu1 %v4653_v45, %s4499_s16  ;;  %506 = vrot.lane.b32.xlu0 %v4653_v45, %s4500_s17 }
 0x305   :  { %3984 = vmatprep.mubr.msk.f32.mxu0 %vm378_vm3, %v4655_v47 }
 0x307   :  { %374 = vrot.lane.b32.xlu0 %v4655_v47, %s4499_s16  ;;  %504 = vrot.lane.b32.xlu1 %v4655_v47, %s4500_s17 }
 0x30b   :  { %813 = vrot.lane.b32.xlu0 %v4653_v45, %s4501_s20  ;;  %500 = vrot.lane.b32.xlu1 %v4655_v47, %s4502_s21 }
 0x30f   :  { %807 = vrot.lane.b32.xlu0 %v4655_v47, %s4503_s0  ;;  %502 = vrot.lane.b32.xlu1 %v4653_v45, %s4502_s21 }
 0x313   :  { %811 = vrot.lane.b32.xlu1 %v4655_v47, %s4501_s20 }
 0x317   :  { %809 = vrot.lane.b32.xlu1 %v4653_v45, %s4503_s0 }
 0x375   :  { %v377_v48 = vpop.permute.xlu1 %376  ;;  %v507_v49 = vpop.permute.xlu0 %506 }
 0x376   :  { %3980 = vmatprep.subr.msk.mxu0 %vm378_vm3, %v377_v48  ;;  %3987 = vmatprep.subr.msk.mxu1 %vm378_vm3, %v507_v49 }
 0x377   :  { %3981 = vmatpush3.xpose.msk.msra.mxu0 %vm378_vm3, %v377_v48  ;;  %3988 = vmatpush3.xpose.msk.msra.mxu1 %vm378_vm3, %v507_v49 }
 0x379   :  { %v375_v50 = vpop.permute.xlu0 %374  ;;  %v505_v51 = vpop.permute.xlu1 %504 }
 0x37a   :  { %3982 = vmatprep.subr.msk.mxu0 %vm378_vm3, %v375_v50  ;;  %3989 = vmatprep.subr.msk.mxu1 %vm378_vm3, %v505_v51 }
 0x37b   :  { %3983 = vmatpush3.xpose.msk.msra.mxu0 %vm378_vm3, %v375_v50  ;;  %3990 = vmatpush3.xpose.msk.msra.mxu1 %vm378_vm3, %v505_v51 }
 0x37d   :  { %v814_v52 = vpop.permute.xlu0 %813  ;;  %v501_v53 = vpop.permute.xlu1 %500 }
 0x37e   :  { %3985 = vmatmul.mubr.msk.f32.vlgmr.msra.gmra.mxu0 %vm378_vm3, %v4653_v45  ;;  %3991 = vmatprep.mubr.msk.f32.mxu1 %vm378_vm3, %v501_v53 }
 0x37f   :  { %4008 = vmatprep.subr.msk.mxu1 %vm378_vm3, %v814_v52 }
 0x381   :  { %v808_v54 = vpop.permute.xlu0 %807  ;;  %v503_v55 = vpop.permute.xlu1 %502 }
 0x382   :  { %3992 = vmatmul.mubr.msk.f32.vlgmr.msra.gmra.mxu1 %vm378_vm3, %v503_v55 }
 0x383   :  { %4009 = vmatpush3.xpose.msk.msra.mxu1 %vm378_vm3, %v814_v52  ;;  %4012 = vmatprep.mubr.msk.f32.mxu1 %vm378_vm3, %v808_v54 }
 0x385   :  { %v812_v56 = vpop.permute.xlu1 %811 }
 0x386   :  { %4010 = vmatprep.subr.msk.mxu1 %vm378_vm3, %v812_v56 }
 0x387   :  { %4011 = vmatpush3.xpose.msk.msra.mxu1 %vm378_vm3, %v812_v56 }
 0x389   :  { %v810_v57 = vpop.permute.xlu1 %809 }
 0x38a   :  { %4013 = vmatmul.mubr.msk.f32.vlgmr.msra.gmra.mxu1 %vm378_vm3, %v810_v57 }
 0x43e   :  { %v3986_v61 = vpop.f32.mrf.mxu0 }
 0x43f   :  { %v463_v63 = vmul.f32 0.35355338, %v3986_v61 }
 0x440   :  { %v453_v2 = vpop.f32.mrf.mxu0 }
 0x441   :  { %v4705_v0 = vadd.f32 %v463_v63, %v4700_v60  ;;  %v462_v7 = vmul.f32 0.35355338, %v453_v2 }
 0x442   :  { %v3993_v3 = vpop.f32.mrf.mxu1 }
 0x443   :  { %v592_v4 = vmul.f32 0.35355338, %v3993_v3  ;;  %v469_v5 = vsel %vm124_vm4, %v4705_v0, -inf  ;;  %v464_v14 = vadd.f32 %v462_v7, %v4711_v10 }
 0x444   :  { %v582_v6 = vpop.f32.mrf.mxu1  ;;  %470 = vmax.xlane.f32.xlu0 %v469_v5 }
 0x445   :  { %v591_v8 = vmul.f32 0.35355338, %v582_v6  ;;  %v594_v9 = vadd.f32 %v592_v4, %v4700_v60  ;;  %v466_v19 = vsel %vm124_vm4, %v464_v14, -inf }
 0x447   :  { %v598_v11 = vsel %vm124_vm4, %v594_v9, -inf  ;;  %v4715_v12 = vadd.f32 %v591_v8, %v4711_v10 }
 0x448   :  { %599 = vmax.xlane.f32.xlu1 %v598_v11 }
 0x449   :  { %v595_v13 = vsel %vm124_vm4, %v4715_v12, -inf }
 0x44a   :  { %v4014_v15 = vpop.f32.mrf.mxu1  ;;  %596 = vmax.xlane.f32.xlu0 %v595_v13 }
 0x44b   :  { %v899_v16 = vmul.f32 0.35355338, %v4014_v15 }
 0x44c   :  { %v889_v17 = vpop.f32.mrf.mxu1 }
 0x44d   :  { %v898_v18 = vmul.f32 0.35355338, %v889_v17  ;;  %v901_v20 = vadd.f32 %v899_v16, %v4700_v60 }
 0x44e   :  { %467 = vmax.xlane.f32.xlu0 %v466_v19 }
 0x44f   :  { %v905_v21 = vsel %vm124_vm4, %v901_v20, -inf  ;;  %v900_v22 = vadd.f32 %v898_v18, %v4711_v10 }
 0x450   :  { %906 = vmax.xlane.f32.xlu1 %v905_v21 }
 0x451   :  { %v902_v23 = vsel %vm124_vm4, %v900_v22, -inf }
 0x452   :  { %903 = vmax.xlane.f32.xlu0 %v902_v23 }
 0x461   :  { %495 = vrot.lane.b32.xlu1 %v493_v28, %s4504_s12 }
 0x465   :  { %931 = vrot.lane.b32.xlu1 %v929_v31, %s4504_s12 }
 0x468   :  { %624 = vrot.lane.b32.xlu0 %v622_v32, %s4504_s12 }
 0x4cd   :  { %v471_v33 = vpop.xlane.xlu0 %470 }
 0x4ce   :  { %v473_v53 = vsub.f32 %v4705_v0, %v471_v33 }
 0x4d0   :  { %v476_v56 = vmul.f32 1.442695, %v473_v53 }
 0x4d1   :  { %v600_v35 = vpop.xlane.xlu1 %599 }
 0x4d2   :  { %v602_v50 = vsub.f32 %v594_v9, %v600_v35 }
 0x4d3   :  { %v597_v34 = vpop.xlane.xlu0 %596 }
 0x4d4   :  { %v605_v54 = vmul.f32 1.442695, %v602_v50  ;;  %v601_v1 = vsub.f32 %v4715_v12, %v597_v34 }
 0x4d6   :  { %4230 = vpow2.f32 %v605_v54  ;;  %v603_v0 = vmul.f32 1.442695, %v601_v1 }
 0x4d7   :  { %v468_v36 = vpop.xlane.xlu0 %467  ;;  %4232 = vpow2.f32 %v476_v56 }
 0x4d8   :  { %v472_v57 = vsub.f32 %v464_v14, %v468_v36 }
 0x4d9   :  { %v907_v37 = vpop.xlane.xlu1 %906 }
 0x4da   :  { %v474_v59 = vmul.f32 1.442695, %v472_v57  ;;  %v909_v61 = vsub.f32 %v901_v20, %v907_v37 }
 0x4db   :  { %v904_v39 = vpop.xlane.xlu0 %903 }
 0x4dc   :  { %4234 = vpow2.f32 %v474_v59  ;;  %v912_v63 = vmul.f32 1.442695, %v909_v61  ;;  %v908_v3 = vsub.f32 %v900_v22, %v904_v39 }
 0x4dd   :  { %v4751_v48 = vpop.permute.xlu1 %495 }
 0x4de   :  { %v499_v49 = vmul.f32 %v4751_v48, %v4653_v45  ;;  %v498_v51 = vmul.f32 %v4751_v48, %v4655_v47  ;;  %4236 = vpow2.f32 %v912_v63  ;;  %v910_v6 = vmul.f32 1.442695, %v908_v3 }
 0x4df   :  { %v4745_v43 = vpop.permute.xlu0 %624  ;;  %4238 = vpow2.f32 %v603_v0 }
 0x4e0   :  { %v628_v44 = vmul.f32 %v4745_v43, %v4653_v45  ;;  %v627_v46 = vmul.f32 %v4745_v43, %v4655_v47  ;;  %4240 = vpow2.f32 %v910_v6 }
 0x4e1   :  { %v4760_v52 = vpop.permute.xlu1 %931 }
 0x4e2   :  { %633 = vrot.lane.b32.xlu1 %v628_v44, %s4504_s12  ;;  %631 = vrot.lane.b32.xlu0 %v627_v46, %s4504_s12  ;;  %v935_v55 = vmul.f32 %v4760_v52, %v4653_v45  ;;  %v934_v17 = vmul.f32 %v4760_v52, %v4655_v47 }
 0x4e3   :  { %v4768_v2 = vpop.eup %4230 }
 0x4e4   :  { %v610_v4 = vsel %vm124_vm4, %v4768_v2, 0.0  ;;  %v4772_v5 = vpop.eup %4232 }
 0x4e5   :  { %v481_v7 = vsel %vm124_vm4, %v4772_v5, 0.0 }
 0x4e6   :  { %722 = vrot.lane.b32.xlu1 %v499_v49, %s4504_s12 }
 0x4e9   :  { %v4235_v8 = vpop.eup %4234 }
 0x4ea   :  { %720 = vrot.lane.b32.xlu1 %v498_v51, %s4504_s12  ;;  %v478_v9 = vsel %vm124_vm4, %v4235_v8, 0.0 }
 0x4eb   :  { %v4777_v11 = vpop.eup %4236 }
 0x4ec   :  { %v917_v12 = vsel %vm124_vm4, %v4777_v11, 0.0  ;;  %v4239_v13 = vpop.eup %4238 }
 0x4ed   :  { %v607_v14 = vsel %vm124_vm4, %v4239_v13, 0.0  ;;  %v4241_v15 = vpop.eup %4240 }
 0x4ee   :  { %940 = vrot.lane.b32.xlu1 %v935_v55, %s4504_s12  ;;  %v914_v16 = vsel %vm124_vm4, %v4241_v15, 0.0 }
 0x501   :  { %611 = vadd.xlane.f32.xlu0 %v610_v4 }
 0x505   :  { %482 = vadd.xlane.f32.xlu0 %v481_v7 }
 0x509   :  { %479 = vadd.xlane.f32.xlu0 %v478_v9 }
 0x50d   :  { %918 = vadd.xlane.f32.xlu0 %v917_v12 }
 0x512   :  { %608 = vadd.xlane.f32.xlu1 %v607_v14 }
 0x516   :  { %915 = vadd.xlane.f32.xlu1 %v914_v16 }
 0x523   :  { %938 = vrot.lane.b32.xlu0 %v934_v17, %s4504_s12 }
 0x527   :  { %1033 = vrot.lane.b32.xlu1 %v4653_v45, %s4505_s3  ;;  %1031 = vrot.lane.b32.xlu0 %v4655_v47, %s4505_s3 }
 0x52b   :  { %1027 = vrot.lane.b32.xlu1 %v4655_v47, %s4506_s5  ;;  %1029 = vrot.lane.b32.xlu0 %v4653_v45, %s4506_s5 }
 0x554   :  { %v634_v18 = vpop.permute.xlu1 %633  ;;  %v632_v19 = vpop.permute.xlu0 %631 }
 0x555   :  { %3994 = vmatprep.subr.mxu0 %v634_v18 }
 0x556   :  { %3995 = vmatpush3.msra.mxu0 %v634_v18 }
 0x557   :  { %3996 = vmatprep.subr.mxu0 %v632_v19 }
 0x558   :  { %v723_v20 = vpop.permute.xlu1 %722  ;;  %3997 = vmatpush3.msra.mxu0 %v632_v19 }
 0x559   :  { %4001 = vmatprep.subr.mxu0 %v723_v20 }
 0x55c   :  { %v721_v23 = vpop.permute.xlu1 %720 }
 0x560   :  { %v941_v28 = vpop.permute.xlu1 %940 }
 0x58a   :  { %v612_v21 = vpop.xlane.xlu0 %611 }
 0x58b   :  { %v614_v29 = vmax.f32 %v612_v21, 1e-16 }
 0x58d   :  { %4242 = vrcp.f32 %v614_v29 }
 0x58e   :  { %v483_v22 = vpop.xlane.xlu0 %482 }
 0x58f   :  { %v485_v34 = vmax.f32 %v483_v22, 1e-16 }
 0x592   :  { %v480_v24 = vpop.xlane.xlu0 %479 }
 0x593   :  { %v484_v31 = vmax.f32 %v480_v24, 1e-16 }
 0x595   :  { %4244 = vrcp.f32 %v484_v31 }
 0x596   :  { %v919_v35 = vpop.xlane.xlu0 %918 }
 0x597   :  { %v921_v39 = vmax.f32 %v919_v35, 1e-16 }
 0x59a   :  { %v4243_v44 = vpop.eup %4242  ;;  %v939_v61 = vpop.permute.xlu0 %938 }
 0x59b   :  { %v609_v32 = vpop.xlane.xlu1 %608  ;;  %v618_v51 = vmul.f32 %v4243_v44, %v4768_v2 }
 0x59c   :  { %v613_v33 = vmax.f32 %v609_v32, 1e-16 }
 0x59e   :  { %4246 = vrcp.f32 %v613_v33  ;;  %v1032_v0 = vpop.permute.xlu0 %1031 }
 0x59f   :  { %v916_v36 = vpop.xlane.xlu1 %915  ;;  %4248 = vrcp.f32 %v485_v34 }
 0x5a0   :  { %v920_v37 = vmax.f32 %v916_v36, 1e-16 }
 0x5a2   :  { %4250 = vrcp.f32 %v920_v37  ;;  %v4245_v46 = vpop.eup %4244  ;;  %v1030_v3 = vpop.permute.xlu0 %1029 }
 0x5a3   :  { %4252 = vrcp.f32 %v921_v39  ;;  %v488_v54 = vmul.f32 %v4245_v46, %v4235_v8  ;;  %v1034_v56 = vpop.permute.xlu1 %1033  ;;  %v125_v46 = vsel %vm124_vm4, %v4702_v62, 0.0 }
 0x5a7   :  { %v1028_v2 = vpop.permute.xlu1 %1027 }
 0x5ab   :  { %v4247_v49 = vpop.eup %4246 }
 0x5ac   :  { %v617_v50 = vmul.f32 %v4247_v49, %v4239_v13  ;;  %v4249_v53 = vpop.eup %4248 }
 0x5ad   :  { %v489_v57 = vmul.f32 %v4249_v53, %v4772_v5 }
 0x5ae   :  { %3998 = vmatprep.mubr.msk.f32.mxu0 %vm124_vm4, %v617_v50  ;;  %v128_v50 = vsel %vm124_vm4, %v4697_v58, 0.0 }
 0x5af   :  { %v4251_v55 = vpop.eup %4250  ;;  %3999 = vmatmul.mubr.msk.f32.vlgmr.msra.gmra.mxu0 %vm124_vm4, %v618_v51 }
 0x5b0   :  { %4002 = vmatpush3.msra.mxu0 %v723_v20  ;;  %4005 = vmatprep.mubr.msk.f32.mxu0 %vm124_vm4, %v488_v54  ;;  %v4253_v59 = vpop.eup %4252  ;;  %v924_v63 = vmul.f32 %v4251_v55, %v4241_v15 }
 0x5b1   :  { %4003 = vmatprep.subr.mxu0 %v721_v23  ;;  %v925_v1 = vmul.f32 %v4253_v59, %v4777_v11 }
 0x5b2   :  { %4004 = vmatpush3.msra.mxu0 %v721_v23  ;;  %v1148_v23 = vsub.s32 3, %v4725_v25 }
 0x5b3   :  { %4015 = vmatprep.subr.mxu0 %v941_v28  ;;  %4006 = vmatmul.mubr.msk.f32.vlgmr.msra.gmra.mxu0 %vm124_vm4, %v489_v57 }
 0x5b4   :  { %4016 = vmatpush3.msra.mxu0 %v941_v28  ;;  %4019 = vmatprep.mubr.msk.f32.mxu0 %vm124_vm4, %v924_v63  ;;  %v1149_v24 = vrot.slane %v4731_v27, %v1148_v23  ;;  %v4508_v63 = vmov 0.0  }
 0x5b5   :  { %4017 = vmatprep.subr.mxu0 %v939_v61 }
 0x5b6   :  { %4018 = vmatpush3.msra.mxu0 %v939_v61 }
 0x5b7   :  { %4022 = vmatprep.subr.msk.mxu0 %vm378_vm3, %v1034_v56  ;;  %4020 = vmatmul.mubr.msk.f32.vlgmr.msra.gmra.mxu0 %vm124_vm4, %v925_v1 }
 0x5b8   :  { %4023 = vmatpush3.xpose.msk.msra.mxu0 %vm378_vm3, %v1034_v56  ;;  %4026 = vmatprep.mubr.msk.f32.mxu0 %vm378_vm3, %v1028_v2 }
 0x5b9   :  { %4024 = vmatprep.subr.msk.mxu0 %vm378_vm3, %v1032_v0 }
 0x5bc   :  { %4025 = vmatpush3.xpose.msk.msra.mxu0 %vm378_vm3, %v1032_v0 }
 0x5bf   :  { %4027 = vmatmul.mubr.msk.f32.vlgmr.msra.gmra.mxu0 %vm378_vm3, %v1030_v3 }
 0x66f   :  { %v4000_v4 = vpop.f32.mrf.mxu0 }
 0x671   :  { %v709_v5 = vpop.f32.mrf.mxu0 }
 0x673   :  { %v4007_v6 = vpop.f32.mrf.mxu0 }
 0x674   :  { %v804_v7 = vadd.f32 %v4007_v6, %v4000_v4 }
 0x675   :  { %v798_v8 = vpop.f32.mrf.mxu0 }
 0x676   :  { %v799_v9 = vadd.f32 %v798_v8, %v709_v5 }
 0x677   :  { %v4021_v11 = vpop.f32.mrf.mxu0 }
 0x678   :  { %v4809_v12 = vadd.f32 %v4021_v11, %v804_v7 }
 0x679   :  { %v1016_v13 = vpop.f32.mrf.mxu0 }
 0x67a   :  { %v4811_v14 = vadd.f32 %v1016_v13, %v799_v9 }
 0x67f   :  { %v4028_v15 = vpop.f32.mrf.mxu0 }
 0x680   :  { %v1119_v16 = vmul.f32 0.35355338, %v4028_v15 }
 0x681   :  { %v1109_v17 = vpop.f32.mrf.mxu0 }
 0x682   :  { %v1118_v18 = vmul.f32 0.35355338, %v1109_v17  ;;  %v1121_v19 = vadd.f32 %v1119_v16, %v4700_v60 }
 0x684   :  { %v1125_v20 = vsel %vm124_vm4, %v1121_v19, -inf  ;;  %v1120_v21 = vadd.f32 %v1118_v18, %v4711_v10 }
 0x685   :  { %1126 = vmax.xlane.f32.xlu0 %v1125_v20 }
 0x686   :  { %v1122_v22 = vsel %vm124_vm4, %v1120_v21, -inf }
 0x687   :  { %1123 = vmax.xlane.f32.xlu1 %v1122_v22 }
 0x69b   :  { %1151 = vrot.lane.b32.xlu0 %v1149_v24, %s4504_s12 }
 0x70e   :  { %v1127_v28 = vpop.xlane.xlu0 %1126 }
 0x70f   :  { %v1129_v29 = vsub.f32 %v1121_v19, %v1127_v28  ;;  %v3744_v28 = vld [vmem:[%s5252_s8 + $0x28] sm:$0xff] }
 0x710   :  { %v1124_v31 = vpop.xlane.xlu1 %1123 }
 0x711   :  { %v1132_v32 = vmul.f32 1.442695, %v1129_v29  ;;  %v1128_v33 = vsub.f32 %v1120_v21, %v1124_v31  ;;  %v3743_v29 = vld [vmem:[%s5252_s8 + $0x20] sm:$0xff] }
 0x712   :  { %v4820_v34 = vpop.permute.xlu0 %1151 }
 0x713   :  { %4254 = vpow2.f32 %v1132_v32  ;;  %v1130_v35 = vmul.f32 1.442695, %v1128_v33  ;;  %v1154_v36 = vmul.f32 %v4820_v34, %v4655_v47  ;;  %v1155_v49 = vmul.f32 %v4820_v34, %v4653_v45 }
 0x715   :  { %4256 = vpow2.f32 %v1130_v35  ;;  %1158 = vrot.lane.b32.xlu0 %v1154_v36, %s4504_s12 }
 0x720   :  { %v4255_v37 = vpop.eup %4254 }
 0x721   :  { %v1137_v27 = vsel %vm124_vm4, %v4255_v37, 0.0 }
 0x722   :  { %v4257_v39 = vpop.eup %4256  ;;  %1138 = vadd.xlane.f32.xlu1 %v1137_v27 }
 0x723   :  { %v1134_v44 = vsel %vm124_vm4, %v4257_v39, 0.0 }
 0x726   :  { %1135 = vadd.xlane.f32.xlu1 %v1134_v44 }
 0x734   :  { %126 = vadd.xlane.f32.xlu0 %v125_v46  ;;  %v3740_v46 = vld [vmem:[%s5251_s7 + $0x1] ss:$0 sm:$0xff] }
 0x737   :  { %1160 = vrot.lane.b32.xlu1 %v1155_v49, %s4504_s12 }
 0x74a   :  { %1249 = vrot.lane.b32.xlu0 %v4655_v47, %s4507_s18 }
 0x75b   :  { %129 = vadd.xlane.f32.xlu1 %v128_v50 }
 0x76c   :  { %1251 = vrot.lane.b32.xlu1 %v4653_v45, %s4507_s18 }
 0x787   :  { %v1159_v56 = vpop.permute.xlu0 %1158 }
 0x7ab   :  { %v1139_v51 = vpop.xlane.xlu1 %1138 }
 0x7ac   :  { %v1141_v53 = vmax.f32 %v1139_v51, 1e-16 }
 0x7ae   :  { %4258 = vrcp.f32 %v1141_v53 }
 0x7af   :  { %v1136_v62 = vpop.xlane.xlu1 %1135 }
 0x7b0   :  { %v1140_v54 = vmax.f32 %v1136_v62, 1e-16 }
 0x7b2   :  { %4260 = vrcp.f32 %v1140_v54 }
 0x7b3   :  { %v1161_v55 = vpop.permute.xlu1 %1160 }
 0x7b4   :  { %4029 = vmatprep.subr.mxu1 %v1161_v55 }
 0x7b5   :  { %4030 = vmatpush3.msra.mxu1 %v1161_v55 }
 0x7b6   :  { %4031 = vmatprep.subr.mxu1 %v1159_v56 }
 0x7b7   :  { %4032 = vmatpush3.msra.mxu1 %v1159_v56 }
 0x7b8   :  { %4036 = vmatprep.subr.mxu1 %v3746_v38 }
 0x7bb   :  { %v4259_v47 = vpop.eup %4258 }
 0x7bc   :  { %v1145_v58 = vmul.f32 %v4259_v47, %v4255_v37 }
 0x7bd   :  { %v127_v61 = vpop.xlane.xlu0 %126 }
 0x7be   :  { %vm131_vm6 = vcmp.gt.f32.partialorder %v127_v61, 0.0 }
 0x7bf   :  { %v4261_v57 = vpop.eup %4260  ;;  %v4845_v3 = vsel %vm131_vm6, 1.0, %v4508_v63 }
 0x7c0   :  { %v1144_v59 = vmul.f32 %v4261_v57, %v4257_v39  ;;  %v3739_v39 = vld [vmem:[%s5250_s6 + $0x1] ss:$0 sm:$0xff] }
 0x7c1   :  { %v1250_v11 = vpop.permute.xlu0 %1249 }
 0x7c2   :  { %4033 = vmatprep.mubr.msk.f32.mxu1 %vm124_vm4, %v1144_v59 }
 0x7c3   :  { %4034 = vmatmul.mubr.msk.f32.vlgmr.msra.gmra.mxu1 %vm124_vm4, %v1145_v58 }
 0x7c4   :  { %4037 = vmatpush3.msra.mxu1 %v3746_v38 }
 0x7e4   :  { %v130_v45 = vpop.xlane.xlu1 %129 }
 0x7e5   :  { %vm132_vm5 = vcmp.gt.f32.partialorder %v130_v45, 0.0 }
 0x7e6   :  { %v4841_v1 = vsel %vm132_vm5, 1.0, %v4508_v63  ;;  %vm3487_vm5 = vcmask 1041409  }
 0x7e8   :  { %v1252_v7 = vpop.permute.xlu1 %1251 }
 0x883   :  { %v4035_v2 = vpop.f32.mrf.mxu1 }
 0x884   :  { %v1246_v0 = vadd.f32 %v4035_v2, %v4809_v12 }
 0x885   :  { %v1236_v4 = vpop.f32.mrf.mxu1 }
 0x886   :  { %v1248_v5 = vmul.f32 %v4841_v1, %v1246_v0  ;;  %v1245_v6 = vadd.f32 %v1236_v4, %v4811_v14  ;;  %v3748_v4 = vld [vmem:[%s5253_s9 + $0x1] ss:$0 sm:$0xff] }
 0x888   :  { %v1247_v8 = vmul.f32 %v4845_v3, %v1245_v6  ;;  %v1256_v9 = vadd.f32 %v1252_v7, %v1248_v5 }
 0x88a   :  { %v1258_v13 = vadd.f32 %v1256_v9, %v279_v42  ;;  %v1255_v15 = vadd.f32 %v1250_v11, %v1247_v8 }
 0x88c   :  { %v1266_v16 = vsel %vm234_vm2, %v1258_v13, 0.0  ;;  %v1257_v12 = vadd.f32 %v1255_v15, %v278_v40  ;;  %v3745_v40 = vld [vmem:[%s5252_s8 + $0x30] sm:$0xff] }
 0x88d   :  { %1267 = vadd.xlane.f32.xlu1 %v1266_v16  ;;  %4038 = vmatprep.subr.mxu1 %v3745_v40 }
 0x88e   :  { %v1263_v17 = vsel %vm234_vm2, %v1257_v12, 0.0  ;;  %4039 = vmatpush3.msra.mxu1 %v3745_v40 }
 0x88f   :  { %1264 = vadd.xlane.f32.xlu0 %v1263_v17  ;;  %4040 = vmatprep.subr.mxu1 %v3744_v28 }
 0x890   :  { %4041 = vmatpush3.msra.mxu1 %v3744_v28 }
 0x891   :  { %4042 = vmatprep.subr.mxu1 %v3743_v29 }
 0x892   :  { %4043 = vmatpush3.msra.mxu1 %v3743_v29 }
 0x916   :  { %v1268_v18 = vpop.xlane.xlu1 %1267 }
 0x917   :  { %v1270_v14 = vmul.f32 0.03125, %v1268_v18 }
 0x918   :  { %v1265_v19 = vpop.xlane.xlu0 %1264 }
 0x919   :  { %v1269_v20 = vmul.f32 0.03125, %v1265_v19  ;;  %v1272_v21 = vsub.f32 %v1258_v13, %v1270_v14 }
 0x91b   :  { %v1271_v22 = vsub.f32 %v1257_v12, %v1269_v20  ;;  %v1274_v42 = vmul.f32 %v1272_v21, %v1272_v21 }
 0x91d   :  { %v1273_v23 = vmul.f32 %v1271_v22, %v1271_v22  ;;  %v1278_v24 = vsel %vm234_vm2, %v1274_v42, 0.0 }
 0x91f   :  { %v1275_v41 = vsel %vm234_vm2, %v1273_v23, 0.0 }
 0x920   :  { %1276 = vadd.xlane.f32.xlu0 %v1275_v41 }
 0x924   :  { %1279 = vadd.xlane.f32.xlu0 %v1278_v24 }
 0x9a9   :  { %v1277_v31 = vpop.xlane.xlu0 %1276 }
 0x9aa   :  { %v1281_v32 = vmul.f32 0.03125, %v1277_v31 }
 0x9ac   :  { %v1283_v33 = vadd.f32 1e-05, %v1281_v32 }
 0x9ad   :  { %v1280_v35 = vpop.xlane.xlu0 %1279 }
 0x9ae   :  { %4262 = vrsqrt.f32 %v1283_v33  ;;  %v1282_v36 = vmul.f32 0.03125, %v1280_v35 }
 0x9b0   :  { %v1284_v37 = vadd.f32 1e-05, %v1282_v36 }
 0x9b2   :  { %4264 = vrsqrt.f32 %v1284_v37 }
 0x9bb   :  { %v4263_v27 = vpop.eup %4262 }
 0x9bc   :  { %v1287_v44 = vmul.f32 %v4263_v27, %v1271_v22 }
 0x9be   :  { %v1295_v49 = vmul.f32 %v3739_v39, %v1287_v44 }
 0x9bf   :  { %v4265_v50 = vpop.eup %4264 }
 0x9c0   :  { %v1288_v51 = vmul.f32 %v4265_v50, %v1272_v21  ;;  %v1303_v53 = vadd.f32 %v3740_v46, %v1295_v49 }
 0x9c2   :  { %v1296_v62 = vmul.f32 %v3739_v39, %v1288_v51  ;;  %v1307_v54 = vmin.f32 %v1303_v53, 0.0  ;;  %vm1305_vm7 = vcmp.gt.f32.partialorder %v1303_v53, 0.0 }
 0x9c4   :  { %v1304_v55 = vadd.f32 %v3740_v46, %v1296_v62  ;;  %v1309_v56 = vmul.f32 1.442695, %v1307_v54 }
 0x9c6   :  { %v1308_v47 = vmin.f32 %v1304_v55, 0.0  ;;  %4266 = vpow2.f32 %v1309_v56  ;;  %vm1306_vm8 = vcmp.gt.f32.partialorder %v1304_v55, 0.0 }
 0x9c8   :  { %v1311_v57 = vmul.f32 1.442695, %v1308_v47 }
 0x9ca   :  { %4268 = vpow2.f32 %v1311_v57 }
 0x9d3   :  { %v4267_v59 = vpop.eup %4266 }
 0x9d4   :  { %v3741_v58 = vadd.f32 -1.0, %v4267_v59 }
 0x9d6   :  { %v4876_v45 = vsel %vm1305_vm7, %v1303_v53, %v3741_v58  ;;  %vm3675_vm7 = vcmask 1041408  }
 0x9d7   :  { %v4269_v61 = vpop.eup %4268  ;;  %4044 = vmatprep.mubr.msk.f32.mxu1 %vm234_vm2, %v4876_v45 }
 0x9d8   :  { %v3742_v2 = vadd.f32 -1.0, %v4269_v61 }
 0x9da   :  { %v4880_v0 = vsel %vm1306_vm8, %v1304_v55, %v3742_v2 }
 0x9db   :  { %4045 = vmatmul.mubr.msk.f32.vlgmr.msra.gmra.mxu1 %vm234_vm2, %v4880_v0 }
 0xa9b   :  { %v4046_v5 = vpop.f32.mrf.mxu1 }
 0xa9c   :  { %v4887_v6 = vadd.f32 %v4046_v5, %v3748_v4 }
 0xa9d   :  { %v1402_v7 = vpop.f32.mrf.mxu1 }
 0xa9e   :  { %v4889_v8 = vadd.f32 %v3748_v4, %v1402_v7  ;;  %1415 = vrot.lane.b32.xlu1 %v4887_v6, %s4499_s16  ;;  %1536 = vrot.lane.b32.xlu0 %v4887_v6, %s4500_s17  ;;  %v1529_v62 = vmul.f32 %v4887_v6, %v4751_v48  ;;  %v1650_v54 = vmul.f32 %v4887_v6, %v4745_v43 }
 0xa9f   :  { %v1949_v56 = vmul.f32 %v4887_v6, %v4760_v52 }
 0xaa0   :  { %4051 = vmatprep.mubr.msk.f32.mxu0 %vm378_vm3, %v4889_v8  ;;  %v1649_v53 = vmul.f32 %v4889_v8, %v4745_v43  ;;  %v1528_v55 = vmul.f32 %v4889_v8, %v4751_v48  ;;  %v1948_v47 = vmul.f32 %v4889_v8, %v4760_v52 }
 0xaa2   :  { %1413 = vrot.lane.b32.xlu0 %v4889_v8, %s4499_s16  ;;  %1534 = vrot.lane.b32.xlu1 %v4889_v8, %s4500_s17 }
 0xaa6   :  { %1835 = vrot.lane.b32.xlu0 %v4887_v6, %s4501_s20  ;;  %1530 = vrot.lane.b32.xlu1 %v4889_v8, %s4502_s21 }
 0xaaa   :  { %1829 = vrot.lane.b32.xlu0 %v4889_v8, %s4503_s0  ;;  %1532 = vrot.lane.b32.xlu1 %v4887_v6, %s4502_s21 }
 0xaae   :  { %1833 = vrot.lane.b32.xlu1 %v4889_v8, %s4501_s20 }
 0xab2   :  { %1831 = vrot.lane.b32.xlu1 %v4887_v6, %s4503_s0 }
 0xb10   :  { %v1416_v9 = vpop.permute.xlu1 %1415  ;;  %v1537_v11 = vpop.permute.xlu0 %1536 }
 0xb11   :  { %4047 = vmatprep.subr.msk.mxu0 %vm378_vm3, %v1416_v9  ;;  %4054 = vmatprep.subr.msk.mxu1 %vm378_vm3, %v1537_v11 }
 0xb12   :  { %4048 = vmatpush3.xpose.msk.msra.mxu0 %vm378_vm3, %v1416_v9  ;;  %4055 = vmatpush3.xpose.msk.msra.mxu1 %vm378_vm3, %v1537_v11 }
 0xb14   :  { %v1414_v13 = vpop.permute.xlu0 %1413  ;;  %v1535_v15 = vpop.permute.xlu1 %1534 }
 0xb15   :  { %4049 = vmatprep.subr.msk.mxu0 %vm378_vm3, %v1414_v13  ;;  %4056 = vmatprep.subr.msk.mxu1 %vm378_vm3, %v1535_v15 }
 0xb16   :  { %4050 = vmatpush3.xpose.msk.msra.mxu0 %vm378_vm3, %v1414_v13  ;;  %4057 = vmatpush3.xpose.msk.msra.mxu1 %vm378_vm3, %v1535_v15 }
 0xb18   :  { %v1836_v16 = vpop.permute.xlu0 %1835  ;;  %v1531_v12 = vpop.permute.xlu1 %1530 }
 0xb19   :  { %4052 = vmatmul.mubr.msk.f32.vlgmr.msra.gmra.mxu0 %vm378_vm3, %v4887_v6  ;;  %4058 = vmatprep.mubr.msk.f32.mxu1 %vm378_vm3, %v1531_v12 }
 0xb1a   :  { %4075 = vmatprep.subr.msk.mxu1 %vm378_vm3, %v1836_v16 }
 0xb1c   :  { %v1830_v17 = vpop.permute.xlu0 %1829  ;;  %v1533_v18 = vpop.permute.xlu1 %1532 }
 0xb1d   :  { %4059 = vmatmul.mubr.msk.f32.vlgmr.msra.gmra.mxu1 %vm378_vm3, %v1533_v18 }
 0xb1e   :  { %4076 = vmatpush3.xpose.msk.msra.mxu1 %vm378_vm3, %v1836_v16  ;;  %4079 = vmatprep.mubr.msk.f32.mxu1 %vm378_vm3, %v1830_v17 }
 0xb20   :  { %v1834_v14 = vpop.permute.xlu1 %1833 }
 0xb21   :  { %4077 = vmatprep.subr.msk.mxu1 %vm378_vm3, %v1834_v14 }
 0xb22   :  { %4078 = vmatpush3.xpose.msk.msra.mxu1 %vm378_vm3, %v1834_v14 }
 0xb24   :  { %v1832_v19 = vpop.permute.xlu1 %1831 }
 0xb25   :  { %4080 = vmatmul.mubr.msk.f32.vlgmr.msra.gmra.mxu1 %vm378_vm3, %v1832_v19 }
 0xbd9   :  { %v4053_v20 = vpop.f32.mrf.mxu0 }
 0xbda   :  { %v1501_v21 = vmul.f32 0.35355338, %v4053_v20 }
 0xbdb   :  { %v1491_v23 = vpop.f32.mrf.mxu0 }
 0xbdc   :  { %v1503_v22 = vadd.f32 %v1501_v21, %v4700_v60  ;;  %v1500_v40 = vmul.f32 0.35355338, %v1491_v23 }
 0xbdd   :  { %v4060_v41 = vpop.f32.mrf.mxu1 }
 0xbde   :  { %v1622_v42 = vmul.f32 0.35355338, %v4060_v41  ;;  %v1507_v24 = vsel %vm124_vm4, %v1503_v22, -inf  ;;  %v1502_v35 = vadd.f32 %v1500_v40, %v4711_v10 }
 0xbdf   :  { %v1612_v38 = vpop.f32.mrf.mxu1  ;;  %1508 = vmax.xlane.f32.xlu0 %v1507_v24 }
 0xbe0   :  { %v1621_v28 = vmul.f32 0.35355338, %v1612_v38  ;;  %v1624_v29 = vadd.f32 %v1622_v42, %v4700_v60  ;;  %v1504_v44 = vsel %vm124_vm4, %v1502_v35, -inf }
 0xbe2   :  { %v1628_v31 = vsel %vm124_vm4, %v1624_v29, -inf  ;;  %v1623_v32 = vadd.f32 %v1621_v28, %v4711_v10 }
 0xbe3   :  { %1629 = vmax.xlane.f32.xlu1 %v1628_v31 }
 0xbe4   :  { %v1625_v33 = vsel %vm124_vm4, %v1623_v32, -inf }
 0xbe5   :  { %v4081_v36 = vpop.f32.mrf.mxu1  ;;  %1626 = vmax.xlane.f32.xlu0 %v1625_v33 }
 0xbe6   :  { %v1921_v37 = vmul.f32 0.35355338, %v4081_v36 }
 0xbe7   :  { %v1911_v27 = vpop.f32.mrf.mxu1 }
 0xbe8   :  { %v1920_v39 = vmul.f32 0.35355338, %v1911_v27  ;;  %v1923_v46 = vadd.f32 %v1921_v37, %v4700_v60 }
 0xbe9   :  { %1505 = vmax.xlane.f32.xlu0 %v1504_v44 }
 0xbea   :  { %v1927_v49 = vsel %vm124_vm4, %v1923_v46, -inf  ;;  %v1922_v50 = vadd.f32 %v1920_v39, %v4711_v10 }
 0xbeb   :  { %1928 = vmax.xlane.f32.xlu1 %v1927_v49 }
 0xbec   :  { %v1924_v51 = vsel %vm124_vm4, %v1922_v50, -inf }
 0xbed   :  { %1925 = vmax.xlane.f32.xlu0 %v1924_v51 }
 0xbfc   :  { %1653 = vrot.lane.b32.xlu1 %v1649_v53, %s4504_s12 }
 0xc00   :  { %1744 = vrot.lane.b32.xlu1 %v1529_v62, %s4504_s12 }
 0xc03   :  { %1655 = vrot.lane.b32.xlu0 %v1650_v54, %s4504_s12 }
 0xc04   :  { %1742 = vrot.lane.b32.xlu1 %v1528_v55, %s4504_s12 }
 0xc07   :  { %1954 = vrot.lane.b32.xlu0 %v1949_v56, %s4504_s12 }
 0xc08   :  { %1952 = vrot.lane.b32.xlu1 %v1948_v47, %s4504_s12 }
 0xc68   :  { %v1509_v57 = vpop.xlane.xlu0 %1508 }
 0xc69   :  { %v1511_v59 = vsub.f32 %v1503_v22, %v1509_v57 }
 0xc6b   :  { %v1514_v2 = vmul.f32 1.442695, %v1511_v59 }
 0xc6c   :  { %v1630_v58 = vpop.xlane.xlu1 %1629 }
 0xc6d   :  { %v1632_v61 = vsub.f32 %v1624_v29, %v1630_v58 }
 0xc6e   :  { %v1627_v4 = vpop.xlane.xlu0 %1626 }
 0xc6f   :  { %v1635_v5 = vmul.f32 1.442695, %v1632_v61  ;;  %v1631_v7 = vsub.f32 %v1623_v32, %v1627_v4 }
 0xc71   :  { %4270 = vpow2.f32 %v1635_v5  ;;  %v1633_v9 = vmul.f32 1.442695, %v1631_v7 }
 0xc72   :  { %4272 = vpow2.f32 %v1514_v2  ;;  %v1506_v11 = vpop.xlane.xlu0 %1505 }
 0xc73   :  { %4274 = vpow2.f32 %v1633_v9  ;;  %v1510_v13 = vsub.f32 %v1502_v35, %v1506_v11 }
 0xc74   :  { %v1929_v15 = vpop.xlane.xlu1 %1928 }
 0xc75   :  { %v1512_v16 = vmul.f32 1.442695, %v1510_v13  ;;  %v1931_v12 = vsub.f32 %v1923_v46, %v1929_v15 }
 0xc76   :  { %v1926_v17 = vpop.xlane.xlu0 %1925 }
 0xc77   :  { %4276 = vpow2.f32 %v1512_v16  ;;  %v1934_v18 = vmul.f32 1.442695, %v1931_v12  ;;  %v1930_v14 = vsub.f32 %v1922_v50, %v1926_v17 }
 0xc78   :  { %v1654_v19 = vpop.permute.xlu1 %1653 }
 0xc79   :  { %4278 = vpow2.f32 %v1934_v18  ;;  %v1932_v20 = vmul.f32 1.442695, %v1930_v14 }
 0xc7a   :  { %v1656_v21 = vpop.permute.xlu0 %1655 }
 0xc7b   :  { %4280 = vpow2.f32 %v1932_v20  ;;  %4061 = vmatprep.subr.mxu0 %v1656_v21 }
 0xc7c   :  { %4062 = vmatpush3.msra.mxu0 %v1656_v21  ;;  %v1745_v23 = vpop.permute.xlu1 %1744 }
 0xc7d   :  { %4063 = vmatprep.subr.mxu0 %v1654_v19 }
 0xc7e   :  { %v4271_v22 = vpop.eup %4270  ;;  %4064 = vmatpush3.msra.mxu0 %v1654_v19  ;;  %v1955_v27 = vpop.permute.xlu0 %1954 }
 0xc7f   :  { %v4273_v41 = vpop.eup %4272  ;;  %4068 = vmatprep.subr.mxu0 %v1745_v23  ;;  %v1640_v42 = vsel %vm124_vm4, %v4271_v22, 0.0 }
 0xc80   :  { %v4275_v24 = vpop.eup %4274  ;;  %1641 = vadd.xlane.f32.xlu1 %v1640_v42  ;;  %v1519_v40 = vsel %vm124_vm4, %v4273_v41, 0.0  ;;  %v1743_v36 = vpop.permute.xlu1 %1742 }
 0xc81   :  { %v1637_v38 = vsel %vm124_vm4, %v4275_v24, 0.0 }
 0xc82   :  { %1638 = vadd.xlane.f32.xlu0 %v1637_v38 }
 0xc84   :  { %v4277_v28 = vpop.eup %4276  ;;  %1520 = vadd.xlane.f32.xlu1 %v1519_v40  ;;  %v1953_v37 = vpop.permute.xlu1 %1952 }
 0xc85   :  { %v1516_v29 = vsel %vm124_vm4, %v4277_v28, 0.0 }
 0xc86   :  { %v4279_v31 = vpop.eup %4278  ;;  %1517 = vadd.xlane.f32.xlu0 %v1516_v29 }
 0xc87   :  { %v1939_v32 = vsel %vm124_vm4, %v4279_v31, 0.0 }
 0xc88   :  { %v4281_v33 = vpop.eup %4280  ;;  %1940 = vadd.xlane.f32.xlu1 %v1939_v32 }
 0xc89   :  { %v1936_v35 = vsel %vm124_vm4, %v4281_v33, 0.0 }
 0xc8a   :  { %1937 = vadd.xlane.f32.xlu0 %v1936_v35 }
 0xc99   :  { %2045 = vrot.lane.b32.xlu1 %v4889_v8, %s4505_s3 }
 0xc9d   :  { %2043 = vrot.lane.b32.xlu1 %v4887_v6, %s4506_s5 }
 0xca0   :  { %2047 = vrot.lane.b32.xlu0 %v4887_v6, %s4505_s3 }
 0xca4   :  { %2041 = vrot.lane.b32.xlu0 %v4889_v8, %s4506_s5 }
 0xd09   :  { %v1642_v39 = vpop.xlane.xlu1 %1641 }
 0xd0a   :  { %v1644_v44 = vmax.f32 %v1642_v39, 1e-16 }
 0xd0b   :  { %v1639_v46 = vpop.xlane.xlu0 %1638 }
 0xd0c   :  { %v1643_v49 = vmax.f32 %v1639_v46, 1e-16  ;;  %4282 = vrcp.f32 %v1644_v44 }
 0xd0d   :  { %v1521_v50 = vpop.xlane.xlu1 %1520 }
 0xd0e   :  { %4284 = vrcp.f32 %v1643_v49  ;;  %v1523_v51 = vmax.f32 %v1521_v50, 1e-16 }
 0xd0f   :  { %v1518_v53 = vpop.xlane.xlu0 %1517 }
 0xd10   :  { %v1522_v62 = vmax.f32 %v1518_v53, 1e-16  ;;  %4286 = vrcp.f32 %v1523_v51 }
 0xd11   :  { %v1941_v54 = vpop.xlane.xlu1 %1940 }
 0xd12   :  { %4288 = vrcp.f32 %v1522_v62  ;;  %v1943_v55 = vmax.f32 %v1941_v54, 1e-16 }
 0xd13   :  { %v1938_v56 = vpop.xlane.xlu0 %1937 }
 0xd14   :  { %v1942_v47 = vmax.f32 %v1938_v56, 1e-16  ;;  %4290 = vrcp.f32 %v1943_v55 }
 0xd15   :  { %v2046_v17 = vpop.permute.xlu1 %2045 }
 0xd16   :  { %4292 = vrcp.f32 %v1942_v47 }
 0xd17   :  { %v2048_v7 = vpop.permute.xlu0 %2047 }
 0xd19   :  { %v4283_v57 = vpop.eup %4282  ;;  %v2044_v18 = vpop.permute.xlu1 %2043 }
 0xd1a   :  { %v1648_v61 = vmul.f32 %v4283_v57, %v4271_v22 }
 0xd1b   :  { %v4285_v59 = vpop.eup %4284  ;;  %v2042_v12 = vpop.permute.xlu0 %2041 }
 0xd1c   :  { %v1647_v58 = vmul.f32 %v4285_v59, %v4275_v24 }
 0xd1d   :  { %v4287_v2 = vpop.eup %4286 }
 0xd1e   :  { %4065 = vmatprep.mubr.msk.f32.mxu0 %vm124_vm4, %v1647_v58  ;;  %v1527_v9 = vmul.f32 %v4287_v2, %v4273_v41 }
 0xd1f   :  { %v4289_v4 = vpop.eup %4288  ;;  %4066 = vmatmul.mubr.msk.f32.vlgmr.msra.gmra.mxu0 %vm124_vm4, %v1648_v61 }
 0xd20   :  { %4069 = vmatpush3.msra.mxu0 %v1745_v23  ;;  %v1526_v5 = vmul.f32 %v4289_v4, %v4277_v28 }
 0xd21   :  { %4070 = vmatprep.subr.mxu0 %v1743_v36  ;;  %v4291_v11 = vpop.eup %4290 }
 0xd22   :  { %4071 = vmatpush3.msra.mxu0 %v1743_v36  ;;  %4072 = vmatprep.mubr.msk.f32.mxu0 %vm124_vm4, %v1526_v5  ;;  %v1947_v16 = vmul.f32 %v4291_v11, %v4279_v31 }
 0xd23   :  { %v4293_v13 = vpop.eup %4292  ;;  %4082 = vmatprep.subr.mxu0 %v1955_v27  ;;  %4073 = vmatmul.mubr.msk.f32.vlgmr.msra.gmra.mxu0 %vm124_vm4, %v1527_v9 }
 0xd24   :  { %4083 = vmatpush3.msra.mxu0 %v1955_v27  ;;  %v1946_v15 = vmul.f32 %v4293_v13, %v4281_v33 }
 0xd25   :  { %4084 = vmatprep.subr.mxu0 %v1953_v37 }
 0xd26   :  { %4085 = vmatpush3.msra.mxu0 %v1953_v37  ;;  %4086 = vmatprep.mubr.msk.f32.mxu0 %vm124_vm4, %v1946_v15  ;;  %v2160_v37 = vmul.f32 %v4889_v8, %v4820_v34 }
 0xd27   :  { %4089 = vmatprep.subr.msk.mxu0 %vm378_vm3, %v2048_v7  ;;  %4087 = vmatmul.mubr.msk.f32.vlgmr.msra.gmra.mxu0 %vm124_vm4, %v1947_v16 }
 0xd28   :  { %4090 = vmatpush3.xpose.msk.msra.mxu0 %vm378_vm3, %v2048_v7  ;;  %4093 = vmatprep.mubr.msk.f32.mxu0 %vm378_vm3, %v2042_v12 }
 0xd29   :  { %4091 = vmatprep.subr.msk.mxu0 %vm378_vm3, %v2046_v17 }
 0xd2c   :  { %4092 = vmatpush3.xpose.msk.msra.mxu0 %vm378_vm3, %v2046_v17 }
 0xd2f   :  { %4094 = vmatmul.mubr.msk.f32.vlgmr.msra.gmra.mxu0 %vm378_vm3, %v2044_v18 }
 0xddf   :  { %v4067_v14 = vpop.f32.mrf.mxu0 }
 0xde1   :  { %v1731_v19 = vpop.f32.mrf.mxu0 }
 0xde3   :  { %v4074_v20 = vpop.f32.mrf.mxu0 }
 0xde4   :  { %v1826_v21 = vadd.f32 %v4074_v20, %v4067_v14 }
 0xde5   :  { %v1820_v22 = vpop.f32.mrf.mxu0 }
 0xde6   :  { %v1821_v23 = vadd.f32 %v1820_v22, %v1731_v19 }
 0xde7   :  { %v4088_v41 = vpop.f32.mrf.mxu0 }
 0xde8   :  { %v2040_v42 = vadd.f32 %v4088_v41, %v1826_v21 }
 0xde9   :  { %v2030_v24 = vpop.f32.mrf.mxu0 }
 0xdea   :  { %v2039_v38 = vadd.f32 %v2030_v24, %v1821_v23 }
 0xdef   :  { %v4095_v40 = vpop.f32.mrf.mxu0 }
 0xdf0   :  { %v2133_v28 = vmul.f32 0.35355338, %v4095_v40 }
 0xdf1   :  { %v2123_v29 = vpop.f32.mrf.mxu0 }
 0xdf2   :  { %v2132_v31 = vmul.f32 0.35355338, %v2123_v29  ;;  %v2135_v32 = vadd.f32 %v2133_v28, %v4700_v60 }
 0xdf4   :  { %v2139_v33 = vsel %vm124_vm4, %v2135_v32, -inf  ;;  %v2134_v35 = vadd.f32 %v2132_v31, %v4711_v10  ;;  %v3783_v31 = vld [vmem:[%s5252_s8 + $0x50] sm:$0xff] }
 0xdf5   :  { %2140 = vmax.xlane.f32.xlu1 %v2139_v33  ;;  %v3781_v33 = vld [vmem:[%s5252_s8 + $0x40] sm:$0xff] }
 0xdf6   :  { %v2136_v36 = vsel %vm124_vm4, %v2134_v35, -inf }
 0xdf7   :  { %2137 = vmax.xlane.f32.xlu0 %v2136_v36 }
 0xe06   :  { %2164 = vrot.lane.b32.xlu1 %v2160_v37, %s4504_s12 }
 0xe0a   :  { %2255 = vrot.lane.b32.xlu1 %v4889_v8, %s4507_s18  ;;  %v2161_v8 = vmul.f32 %v4887_v6, %v4820_v34 }
 0xe0e   :  { %2257 = vrot.lane.b32.xlu1 %v4887_v6, %s4507_s18 }
 0xe7e   :  { %v2141_v27 = vpop.xlane.xlu1 %2140 }
 0xe7f   :  { %v2143_v39 = vsub.f32 %v2135_v32, %v2141_v27  ;;  %v3782_v32 = vld [vmem:[%s5252_s8 + $0x48] sm:$0xff] }
 0xe80   :  { %v2138_v44 = vpop.xlane.xlu0 %2137 }
 0xe81   :  { %v2146_v46 = vmul.f32 1.442695, %v2143_v39  ;;  %v2142_v49 = vsub.f32 %v2134_v35, %v2138_v44 }
 0xe82   :  { %v2165_v58 = vpop.permute.xlu1 %2164 }
 0xe83   :  { %4294 = vpow2.f32 %v2146_v46  ;;  %v2144_v50 = vmul.f32 1.442695, %v2142_v49  ;;  %v3777_v49 = vld [vmem:[%s5250_s6 + $0x2] ss:$0 sm:$0xff] }
 0xe85   :  { %4296 = vpow2.f32 %v2144_v50 }
 0xe86   :  { %v2256_v6 = vpop.permute.xlu1 %2255 }
 0xe8a   :  { %v2258_v16 = vpop.permute.xlu1 %2257 }
 0xe90   :  { %v4295_v51 = vpop.eup %4294 }
 0xe91   :  { %v2151_v53 = vsel %vm124_vm4, %v4295_v51, 0.0 }
 0xe92   :  { %v4297_v62 = vpop.eup %4296  ;;  %2152 = vadd.xlane.f32.xlu0 %v2151_v53 }
 0xe93   :  { %v2148_v54 = vsel %vm124_vm4, %v4297_v62, 0.0 }
 0xe96   :  { %2149 = vadd.xlane.f32.xlu0 %v2148_v54 }
 0xeac   :  { %2166 = vrot.lane.b32.xlu0 %v2161_v8, %s4504_s12 }
 0xf1b   :  { %v2153_v55 = vpop.xlane.xlu0 %2152 }
 0xf1c   :  { %v2155_v56 = vmax.f32 %v2153_v55, 1e-16 }
 0xf1e   :  { %4298 = vrcp.f32 %v2155_v56 }
 0xf1f   :  { %v2150_v47 = vpop.xlane.xlu0 %2149 }
 0xf20   :  { %v2154_v57 = vmax.f32 %v2150_v47, 1e-16 }
 0xf22   :  { %4300 = vrcp.f32 %v2154_v57 }
 0xf23   :  { %v2167_v59 = vpop.permute.xlu0 %2166 }
 0xf24   :  { %4096 = vmatprep.subr.mxu1 %v2167_v59 }
 0xf25   :  { %4097 = vmatpush3.msra.mxu1 %v2167_v59 }
 0xf26   :  { %4098 = vmatprep.subr.mxu1 %v2165_v58 }
 0xf27   :  { %4099 = vmatpush3.msra.mxu1 %v2165_v58 }
 0xf2b   :  { %v4299_v61 = vpop.eup %4298 }
 0xf2c   :  { %v2159_v5 = vmul.f32 %v4299_v61, %v4295_v51  ;;  %v3778_v51 = vld [vmem:[%s5251_s7 + $0x2] ss:$0 sm:$0xff] }
 0xf2f   :  { %v4301_v2 = vpop.eup %4300 }
 0xf30   :  { %v2158_v4 = vmul.f32 %v4301_v2, %v4297_v62 }
 0xf32   :  { %4100 = vmatprep.mubr.msk.f32.mxu1 %vm124_vm4, %v2158_v4 }
 0xf33   :  { %4101 = vmatmul.mubr.msk.f32.vlgmr.msra.gmra.mxu1 %vm124_vm4, %v2159_v5 }
 0xff3   :  { %v4102_v7 = vpop.f32.mrf.mxu1 }
 0xff4   :  { %v2252_v9 = vadd.f32 %v4102_v7, %v2040_v42 }
 0xff5   :  { %v2242_v11 = vpop.f32.mrf.mxu1 }
 0xff6   :  { %v2254_v13 = vmul.f32 %v4841_v1, %v2252_v9  ;;  %v2251_v15 = vadd.f32 %v2242_v11, %v2039_v38  ;;  %v3786_v9 = vld [vmem:[%s5253_s9 + $0x2] ss:$0 sm:$0xff] }
 0xff8   :  { %v2253_v12 = vmul.f32 %v4845_v3, %v2251_v15  ;;  %v2262_v17 = vadd.f32 %v2258_v16, %v2254_v13 }
 0xffa   :  { %v2264_v18 = vadd.f32 %v2262_v17, %v4880_v0  ;;  %v2261_v14 = vadd.f32 %v2256_v6, %v2253_v12 }
 0xffc   :  { %v2272_v19 = vsel %vm234_vm2, %v2264_v18, 0.0  ;;  %v2263_v20 = vadd.f32 %v2261_v14, %v4876_v45  ;;  %v3784_v45 = vld [vmem:[%s5252_s8 + $0x58] sm:$0xff] }
 0xffd   :  { %2273 = vadd.xlane.f32.xlu1 %v2272_v19  ;;  %4103 = vmatprep.subr.mxu1 %v3784_v45 }
 0xffe   :  { %v2269_v21 = vsel %vm234_vm2, %v2263_v20, 0.0  ;;  %4104 = vmatpush3.msra.mxu1 %v3784_v45 }
 0xfff   :  { %2270 = vadd.xlane.f32.xlu0 %v2269_v21  ;;  %4105 = vmatprep.subr.mxu1 %v3783_v31 }
0x1000   :  { %4106 = vmatpush3.msra.mxu1 %v3783_v31 }
0x1001   :  { %4107 = vmatprep.subr.mxu1 %v3782_v32 }
0x1002   :  { %4108 = vmatpush3.msra.mxu1 %v3782_v32 }
0x1003   :  { %4109 = vmatprep.subr.mxu1 %v3781_v33 }
0x1004   :  { %4110 = vmatpush3.msra.mxu1 %v3781_v33 }
0x1086   :  { %v2274_v22 = vpop.xlane.xlu1 %2273 }
0x1087   :  { %v2276_v23 = vmul.f32 0.03125, %v2274_v22 }
0x1088   :  { %v2271_v41 = vpop.xlane.xlu0 %2270 }
0x1089   :  { %v2275_v42 = vmul.f32 0.03125, %v2271_v41  ;;  %v2278_v24 = vsub.f32 %v2264_v18, %v2276_v23 }
0x108b   :  { %v2277_v38 = vsub.f32 %v2263_v20, %v2275_v42  ;;  %v2280_v29 = vmul.f32 %v2278_v24, %v2278_v24 }
0x108d   :  { %v2279_v40 = vmul.f32 %v2277_v38, %v2277_v38  ;;  %v2284_v0 = vsel %vm234_vm2, %v2280_v29, 0.0 }
0x108f   :  { %v2281_v28 = vsel %vm234_vm2, %v2279_v40, 0.0 }
0x1090   :  { %2282 = vadd.xlane.f32.xlu0 %v2281_v28 }
0x1094   :  { %2285 = vadd.xlane.f32.xlu0 %v2284_v0 }
0x1119   :  { %v2283_v35 = vpop.xlane.xlu0 %2282 }
0x111a   :  { %v2287_v36 = vmul.f32 0.03125, %v2283_v35 }
0x111c   :  { %v2289_v37 = vadd.f32 1e-05, %v2287_v36 }
0x111d   :  { %v2286_v27 = vpop.xlane.xlu0 %2285 }
0x111e   :  { %4302 = vrsqrt.f32 %v2289_v37  ;;  %v2288_v39 = vmul.f32 0.03125, %v2286_v27 }
0x1120   :  { %v2290_v44 = vadd.f32 1e-05, %v2288_v39 }
0x1122   :  { %4304 = vrsqrt.f32 %v2290_v44 }
0x112b   :  { %v4303_v46 = vpop.eup %4302 }
0x112c   :  { %v2293_v50 = vmul.f32 %v4303_v46, %v2277_v38 }
0x112e   :  { %v2301_v53 = vmul.f32 %v3777_v49, %v2293_v50 }
0x112f   :  { %v4305_v62 = vpop.eup %4304 }
0x1130   :  { %v2294_v54 = vmul.f32 %v4305_v62, %v2278_v24  ;;  %v2309_v8 = vadd.f32 %v3778_v51, %v2301_v53 }
0x1132   :  { %v2302_v55 = vmul.f32 %v3777_v49, %v2294_v54  ;;  %v2313_v56 = vmin.f32 %v2309_v8, 0.0  ;;  %vm2311_vm9 = vcmp.gt.f32.partialorder %v2309_v8, 0.0 }
0x1134   :  { %v2310_v47 = vadd.f32 %v3778_v51, %v2302_v55  ;;  %v2315_v57 = vmul.f32 1.442695, %v2313_v56 }
0x1136   :  { %v2314_v59 = vmin.f32 %v2310_v47, 0.0  ;;  %4306 = vpow2.f32 %v2315_v57  ;;  %vm2312_vm10 = vcmp.gt.f32.partialorder %v2310_v47, 0.0 }
0x1138   :  { %v2317_v58 = vmul.f32 1.442695, %v2314_v59 }
0x113a   :  { %4308 = vpow2.f32 %v2317_v58 }
0x1143   :  { %v4307_v61 = vpop.eup %4306 }
0x1144   :  { %v3779_v2 = vadd.f32 -1.0, %v4307_v61 }
0x1146   :  { %v5031_v4 = vsel %vm2311_vm9, %v2309_v8, %v3779_v2 }
0x1147   :  { %v4309_v5 = vpop.eup %4308  ;;  %4111 = vmatprep.mubr.msk.f32.mxu1 %vm234_vm2, %v5031_v4 }
0x1148   :  { %v3780_v6 = vadd.f32 -1.0, %v4309_v5 }
0x114a   :  { %v5035_v7 = vsel %vm2312_vm10, %v2310_v47, %v3780_v6 }
0x114b   :  { %4112 = vmatmul.mubr.msk.f32.vlgmr.msra.gmra.mxu1 %vm234_vm2, %v5035_v7 }
0x120b   :  { %v4113_v11 = vpop.f32.mrf.mxu1 }
0x120c   :  { %v5042_v13 = vadd.f32 %v4113_v11, %v3786_v9 }
0x120d   :  { %v2408_v15 = vpop.f32.mrf.mxu1 }
0x120e   :  { %v5044_v16 = vadd.f32 %v3786_v9, %v2408_v15  ;;  %2421 = vrot.lane.b32.xlu1 %v5042_v13, %s4499_s16  ;;  %2542 = vrot.lane.b32.xlu0 %v5042_v13, %s4500_s17  ;;  %v2535_v55 = vmul.f32 %v5042_v13, %v4751_v48  ;;  %v2656_v56 = vmul.f32 %v5042_v13, %v4745_v43 }
0x120f   :  { %v2955_v57 = vmul.f32 %v5042_v13, %v4760_v52 }
0x1210   :  { %4118 = vmatprep.mubr.msk.f32.mxu0 %vm378_vm3, %v5044_v16  ;;  %v2655_v8 = vmul.f32 %v5044_v16, %v4745_v43  ;;  %v2534_v47 = vmul.f32 %v5044_v16, %v4751_v48  ;;  %v2954_v59 = vmul.f32 %v5044_v16, %v4760_v52 }
0x1212   :  { %2419 = vrot.lane.b32.xlu0 %v5044_v16, %s4499_s16  ;;  %2540 = vrot.lane.b32.xlu1 %v5044_v16, %s4500_s17 }
0x1216   :  { %2841 = vrot.lane.b32.xlu0 %v5042_v13, %s4501_s20  ;;  %2536 = vrot.lane.b32.xlu1 %v5044_v16, %s4502_s21 }
0x121a   :  { %2835 = vrot.lane.b32.xlu0 %v5044_v16, %s4503_s0  ;;  %2538 = vrot.lane.b32.xlu1 %v5042_v13, %s4502_s21 }
0x121e   :  { %2839 = vrot.lane.b32.xlu1 %v5044_v16, %s4501_s20 }
0x1222   :  { %2837 = vrot.lane.b32.xlu1 %v5042_v13, %s4503_s0 }
0x1280   :  { %v2422_v12 = vpop.permute.xlu1 %2421  ;;  %v2543_v17 = vpop.permute.xlu0 %2542 }
0x1281   :  { %4114 = vmatprep.subr.msk.mxu0 %vm378_vm3, %v2422_v12  ;;  %4121 = vmatprep.subr.msk.mxu1 %vm378_vm3, %v2543_v17 }
0x1282   :  { %4115 = vmatpush3.xpose.msk.msra.mxu0 %vm378_vm3, %v2422_v12  ;;  %4122 = vmatpush3.xpose.msk.msra.mxu1 %vm378_vm3, %v2543_v17 }
0x1284   :  { %v2420_v18 = vpop.permute.xlu0 %2419  ;;  %v2541_v14 = vpop.permute.xlu1 %2540 }
0x1285   :  { %4116 = vmatprep.subr.msk.mxu0 %vm378_vm3, %v2420_v18  ;;  %4123 = vmatprep.subr.msk.mxu1 %vm378_vm3, %v2541_v14 }
0x1286   :  { %4117 = vmatpush3.xpose.msk.msra.mxu0 %vm378_vm3, %v2420_v18  ;;  %4124 = vmatpush3.xpose.msk.msra.mxu1 %vm378_vm3, %v2541_v14 }
0x1288   :  { %v2842_v19 = vpop.permute.xlu0 %2841  ;;  %v2537_v20 = vpop.permute.xlu1 %2536 }
0x1289   :  { %4119 = vmatmul.mubr.msk.f32.vlgmr.msra.gmra.mxu0 %vm378_vm3, %v5042_v13  ;;  %4125 = vmatprep.mubr.msk.f32.mxu1 %vm378_vm3, %v2537_v20 }
0x128a   :  { %4142 = vmatprep.subr.msk.mxu1 %vm378_vm3, %v2842_v19 }
0x128c   :  { %v2836_v21 = vpop.permute.xlu0 %2835  ;;  %v2539_v22 = vpop.permute.xlu1 %2538 }
0x128d   :  { %4126 = vmatmul.mubr.msk.f32.vlgmr.msra.gmra.mxu1 %vm378_vm3, %v2539_v22 }
0x128e   :  { %4143 = vmatpush3.xpose.msk.msra.mxu1 %vm378_vm3, %v2842_v19  ;;  %4146 = vmatprep.mubr.msk.f32.mxu1 %vm378_vm3, %v2836_v21 }
0x1290   :  { %v2840_v23 = vpop.permute.xlu1 %2839 }
0x1291   :  { %4144 = vmatprep.subr.msk.mxu1 %vm378_vm3, %v2840_v23 }
0x1292   :  { %4145 = vmatpush3.xpose.msk.msra.mxu1 %vm378_vm3, %v2840_v23 }
0x1294   :  { %v2838_v41 = vpop.permute.xlu1 %2837 }
0x1295   :  { %4147 = vmatmul.mubr.msk.f32.vlgmr.msra.gmra.mxu1 %vm378_vm3, %v2838_v41 }
0x1349   :  { %v4120_v42 = vpop.f32.mrf.mxu0 }
0x134a   :  { %v2507_v24 = vmul.f32 0.35355338, %v4120_v42 }
0x134b   :  { %v2497_v40 = vpop.f32.mrf.mxu0 }
0x134c   :  { %v2509_v38 = vadd.f32 %v2507_v24, %v4700_v60  ;;  %v2506_v31 = vmul.f32 0.35355338, %v2497_v40 }
0x134d   :  { %v4127_v28 = vpop.f32.mrf.mxu1 }
0x134e   :  { %v2628_v29 = vmul.f32 0.35355338, %v4127_v28  ;;  %v2513_v0 = vsel %vm124_vm4, %v2509_v38, -inf  ;;  %v2508_v37 = vadd.f32 %v2506_v31, %v4711_v10 }
0x134f   :  { %v2618_v45 = vpop.f32.mrf.mxu1  ;;  %2514 = vmax.xlane.f32.xlu0 %v2513_v0 }
0x1350   :  { %v2630_v32 = vadd.f32 %v2628_v29, %v4700_v60  ;;  %v2627_v33 = vmul.f32 0.35355338, %v2618_v45  ;;  %v2510_v51 = vsel %vm124_vm4, %v2508_v37, -inf }
0x1352   :  { %v2629_v35 = vadd.f32 %v2627_v33, %v4711_v10  ;;  %v2634_v36 = vsel %vm124_vm4, %v2630_v32, -inf }
0x1353   :  { %2635 = vmax.xlane.f32.xlu1 %v2634_v36 }
0x1354   :  { %v2631_v27 = vsel %vm124_vm4, %v2629_v35, -inf }
0x1355   :  { %v4148_v39 = vpop.f32.mrf.mxu1  ;;  %2632 = vmax.xlane.f32.xlu0 %v2631_v27 }
0x1356   :  { %v2927_v44 = vmul.f32 0.35355338, %v4148_v39 }
0x1357   :  { %v2917_v46 = vpop.f32.mrf.mxu1 }
0x1358   :  { %v2929_v49 = vadd.f32 %v2927_v44, %v4700_v60  ;;  %v2926_v50 = vmul.f32 0.35355338, %v2917_v46 }
0x1359   :  { %2511 = vmax.xlane.f32.xlu0 %v2510_v51 }
0x135a   :  { %v2928_v53 = vadd.f32 %v2926_v50, %v4711_v10  ;;  %v2933_v62 = vsel %vm124_vm4, %v2929_v49, -inf }
0x135b   :  { %2934 = vmax.xlane.f32.xlu1 %v2933_v62 }
0x135c   :  { %v2930_v54 = vsel %vm124_vm4, %v2928_v53, -inf }
0x135d   :  { %2931 = vmax.xlane.f32.xlu0 %v2930_v54 }
0x136c   :  { %2659 = vrot.lane.b32.xlu1 %v2655_v8, %s4504_s12 }
0x1370   :  { %2750 = vrot.lane.b32.xlu1 %v2535_v55, %s4504_s12 }
0x1373   :  { %2661 = vrot.lane.b32.xlu0 %v2656_v56, %s4504_s12 }
0x1374   :  { %2748 = vrot.lane.b32.xlu1 %v2534_v47, %s4504_s12 }
0x1377   :  { %2960 = vrot.lane.b32.xlu0 %v2955_v57, %s4504_s12 }
0x1378   :  { %2958 = vrot.lane.b32.xlu1 %v2954_v59, %s4504_s12 }
0x13d8   :  { %v2515_v58 = vpop.xlane.xlu0 %2514 }
0x13d9   :  { %v2517_v61 = vsub.f32 %v2509_v38, %v2515_v58 }
0x13db   :  { %v2520_v5 = vmul.f32 1.442695, %v2517_v61 }
0x13dc   :  { %v2636_v43 = vpop.xlane.xlu1 %2635 }
0x13dd   :  { %v2638_v2 = vsub.f32 %v2630_v32, %v2636_v43 }
0x13de   :  { %v2633_v48 = vpop.xlane.xlu0 %2632 }
0x13df   :  { %v2641_v6 = vmul.f32 1.442695, %v2638_v2  ;;  %v2637_v9 = vsub.f32 %v2629_v35, %v2633_v48 }
0x13e1   :  { %4310 = vpow2.f32 %v2641_v6  ;;  %v2639_v11 = vmul.f32 1.442695, %v2637_v9 }
0x13e2   :  { %4312 = vpow2.f32 %v2520_v5  ;;  %v2512_v15 = vpop.xlane.xlu0 %2511 }
0x13e3   :  { %4314 = vpow2.f32 %v2639_v11  ;;  %v2516_v12 = vsub.f32 %v2508_v37, %v2512_v15 }
0x13e4   :  { %v2935_v17 = vpop.xlane.xlu1 %2934 }
0x13e5   :  { %v2518_v52 = vmul.f32 1.442695, %v2516_v12  ;;  %v2937_v18 = vsub.f32 %v2929_v49, %v2935_v17 }
0x13e6   :  { %v2932_v14 = vpop.xlane.xlu0 %2931 }
0x13e7   :  { %4316 = vpow2.f32 %v2518_v52  ;;  %v2940_v19 = vmul.f32 1.442695, %v2937_v18  ;;  %v2936_v20 = vsub.f32 %v2928_v53, %v2932_v14 }
0x13e8   :  { %v2660_v21 = vpop.permute.xlu1 %2659 }
0x13e9   :  { %4318 = vpow2.f32 %v2940_v19  ;;  %v2938_v22 = vmul.f32 1.442695, %v2936_v20 }
0x13ea   :  { %v2662_v23 = vpop.permute.xlu0 %2661 }
0x13eb   :  { %4320 = vpow2.f32 %v2938_v22  ;;  %4128 = vmatprep.subr.mxu0 %v2662_v23 }
0x13ec   :  { %4129 = vmatpush3.msra.mxu0 %v2662_v23  ;;  %v2751_v42 = vpop.permute.xlu1 %2750 }
0x13ed   :  { %4130 = vmatprep.subr.mxu0 %v2660_v21 }
0x13ee   :  { %v4311_v41 = vpop.eup %4310  ;;  %4131 = vmatpush3.msra.mxu0 %v2660_v21  ;;  %v2961_v27 = vpop.permute.xlu0 %2960 }
0x13ef   :  { %v4313_v24 = vpop.eup %4312  ;;  %4135 = vmatprep.subr.mxu0 %v2751_v42  ;;  %v2646_v38 = vsel %vm124_vm4, %v4311_v41, 0.0 }
0x13f0   :  { %v4315_v40 = vpop.eup %4314  ;;  %2647 = vadd.xlane.f32.xlu1 %v2646_v38  ;;  %v2525_v29 = vsel %vm124_vm4, %v4313_v24, 0.0  ;;  %v2749_v36 = vpop.permute.xlu1 %2748 }
0x13f1   :  { %v2643_v28 = vsel %vm124_vm4, %v4315_v40, 0.0 }
0x13f2   :  { %2644 = vadd.xlane.f32.xlu0 %v2643_v28 }
0x13f4   :  { %v4317_v0 = vpop.eup %4316  ;;  %2526 = vadd.xlane.f32.xlu1 %v2525_v29  ;;  %v2959_v37 = vpop.permute.xlu1 %2958 }
0x13f5   :  { %v2522_v45 = vsel %vm124_vm4, %v4317_v0, 0.0 }
0x13f6   :  { %v4319_v31 = vpop.eup %4318  ;;  %2523 = vadd.xlane.f32.xlu0 %v2522_v45 }
0x13f7   :  { %v2945_v32 = vsel %vm124_vm4, %v4319_v31, 0.0 }
0x13f8   :  { %v4321_v33 = vpop.eup %4320  ;;  %2946 = vadd.xlane.f32.xlu1 %v2945_v32 }
0x13f9   :  { %v2942_v35 = vsel %vm124_vm4, %v4321_v33, 0.0 }
0x13fa   :  { %2943 = vadd.xlane.f32.xlu0 %v2942_v35 }
0x1409   :  { %3051 = vrot.lane.b32.xlu1 %v5044_v16, %s4505_s3 }
0x140d   :  { %3049 = vrot.lane.b32.xlu1 %v5042_v13, %s4506_s5 }
0x1410   :  { %3053 = vrot.lane.b32.xlu0 %v5042_v13, %s4505_s3 }
0x1414   :  { %3047 = vrot.lane.b32.xlu0 %v5044_v16, %s4506_s5 }
0x1479   :  { %v2648_v39 = vpop.xlane.xlu1 %2647 }
0x147a   :  { %v2650_v44 = vmax.f32 %v2648_v39, 1e-16 }
0x147b   :  { %v2645_v46 = vpop.xlane.xlu0 %2644 }
0x147c   :  { %v2649_v49 = vmax.f32 %v2645_v46, 1e-16  ;;  %4322 = vrcp.f32 %v2650_v44 }
0x147d   :  { %v2527_v50 = vpop.xlane.xlu1 %2526 }
0x147e   :  { %4324 = vrcp.f32 %v2649_v49  ;;  %v2529_v51 = vmax.f32 %v2527_v50, 1e-16  ;;  %v3167_v50 = vmul.f32 %v5042_v13, %v4820_v34 }
0x147f   :  { %v2524_v53 = vpop.xlane.xlu0 %2523 }
0x1480   :  { %v2528_v62 = vmax.f32 %v2524_v53, 1e-16  ;;  %4326 = vrcp.f32 %v2529_v51 }
0x1481   :  { %v2947_v54 = vpop.xlane.xlu1 %2946 }
0x1482   :  { %4328 = vrcp.f32 %v2528_v62  ;;  %v2949_v8 = vmax.f32 %v2947_v54, 1e-16 }
0x1483   :  { %v2944_v55 = vpop.xlane.xlu0 %2943 }
0x1484   :  { %v2948_v56 = vmax.f32 %v2944_v55, 1e-16  ;;  %4330 = vrcp.f32 %v2949_v8 }
0x1485   :  { %v3052_v17 = vpop.permute.xlu1 %3051 }
0x1486   :  { %4332 = vrcp.f32 %v2948_v56 }
0x1487   :  { %v3054_v5 = vpop.permute.xlu0 %3053 }
0x1489   :  { %v4323_v47 = vpop.eup %4322  ;;  %v3050_v52 = vpop.permute.xlu1 %3049 }
0x148a   :  { %v2654_v58 = vmul.f32 %v4323_v47, %v4311_v41 }
0x148b   :  { %v4325_v57 = vpop.eup %4324  ;;  %v3048_v12 = vpop.permute.xlu0 %3047 }
0x148c   :  { %v2653_v59 = vmul.f32 %v4325_v57, %v4315_v40 }
0x148d   :  { %v4327_v61 = vpop.eup %4326 }
0x148e   :  { %4132 = vmatprep.mubr.msk.f32.mxu0 %vm124_vm4, %v2653_v59  ;;  %v2533_v48 = vmul.f32 %v4327_v61, %v4313_v24 }
0x148f   :  { %v4329_v43 = vpop.eup %4328  ;;  %4133 = vmatmul.mubr.msk.f32.vlgmr.msra.gmra.mxu0 %vm124_vm4, %v2654_v58 }
0x1490   :  { %4136 = vmatpush3.msra.mxu0 %v2751_v42  ;;  %v2532_v2 = vmul.f32 %v4329_v43, %v4317_v0 }
0x1491   :  { %4137 = vmatprep.subr.mxu0 %v2749_v36  ;;  %v4331_v6 = vpop.eup %4330 }
0x1492   :  { %4138 = vmatpush3.msra.mxu0 %v2749_v36  ;;  %4139 = vmatprep.mubr.msk.f32.mxu0 %vm124_vm4, %v2532_v2  ;;  %v2953_v15 = vmul.f32 %v4331_v6, %v4319_v31 }
0x1493   :  { %v4333_v9 = vpop.eup %4332  ;;  %4149 = vmatprep.subr.mxu0 %v2961_v27  ;;  %4140 = vmatmul.mubr.msk.f32.vlgmr.msra.gmra.mxu0 %vm124_vm4, %v2533_v48 }
0x1494   :  { %4150 = vmatpush3.msra.mxu0 %v2961_v27  ;;  %v2952_v11 = vmul.f32 %v4333_v9, %v4321_v33  ;;  %v3166_v33 = vmul.f32 %v5044_v16, %v4820_v34 }
0x1495   :  { %4151 = vmatprep.subr.mxu0 %v2959_v37 }
0x1496   :  { %4152 = vmatpush3.msra.mxu0 %v2959_v37  ;;  %4153 = vmatprep.mubr.msk.f32.mxu0 %vm124_vm4, %v2952_v11 }
0x1497   :  { %4156 = vmatprep.subr.msk.mxu0 %vm378_vm3, %v3054_v5  ;;  %4154 = vmatmul.mubr.msk.f32.vlgmr.msra.gmra.mxu0 %vm124_vm4, %v2953_v15 }
0x1498   :  { %4157 = vmatpush3.xpose.msk.msra.mxu0 %vm378_vm3, %v3054_v5  ;;  %4160 = vmatprep.mubr.msk.f32.mxu0 %vm378_vm3, %v3048_v12 }
0x1499   :  { %4158 = vmatprep.subr.msk.mxu0 %vm378_vm3, %v3052_v17 }
0x149c   :  { %4159 = vmatpush3.xpose.msk.msra.mxu0 %vm378_vm3, %v3052_v17 }
0x149d   :  { %4177 = vmatprep.subr.mxu0 %v4508_v63 }
0x149f   :  { %4161 = vmatmul.mubr.msk.f32.vlgmr.msra.gmra.mxu0 %vm378_vm3, %v3050_v52 }
0x14a0   :  { %4193 = vmatprep.mubr.msk.f32.mxu0 %vm4509_vm14, %v4508_v63 }
0x154f   :  { %v4134_v18 = vpop.f32.mrf.mxu0 }
0x1551   :  { %v2737_v14 = vpop.f32.mrf.mxu0 }
0x1553   :  { %v4141_v19 = vpop.f32.mrf.mxu0 }
0x1554   :  { %v2832_v20 = vadd.f32 %v4141_v19, %v4134_v18 }
0x1555   :  { %v2826_v21 = vpop.f32.mrf.mxu0 }
0x1556   :  { %v2827_v22 = vadd.f32 %v2826_v21, %v2737_v14 }
0x1557   :  { %v4155_v23 = vpop.f32.mrf.mxu0 }
0x1558   :  { %v3046_v41 = vadd.f32 %v4155_v23, %v2832_v20 }
0x1559   :  { %v3036_v42 = vpop.f32.mrf.mxu0 }
0x155a   :  { %v3045_v24 = vadd.f32 %v3036_v42, %v2827_v22 }
0x155f   :  { %v4162_v38 = vpop.f32.mrf.mxu0 }
0x1560   :  { %v3139_v40 = vmul.f32 0.35355338, %v4162_v38 }
0x1561   :  { %v3129_v28 = vpop.f32.mrf.mxu0 }
0x1562   :  { %v3141_v29 = vadd.f32 %v3139_v40, %v4700_v60  ;;  %v3138_v0 = vmul.f32 0.35355338, %v3129_v28  ;;  %v3815_v40 = vld [vmem:[%s5250_s6 + $0x3] ss:$0 sm:$0xff] }
0x1564   :  { %v3140_v45 = vadd.f32 %v3138_v0, %v4711_v10  ;;  %v3145_v31 = vsel %vm124_vm4, %v3141_v29, -inf }
0x1565   :  { %3146 = vmax.xlane.f32.xlu1 %v3145_v31 }
0x1566   :  { %v3142_v32 = vsel %vm124_vm4, %v3140_v45, -inf }
0x1567   :  { %3143 = vmax.xlane.f32.xlu0 %v3142_v32 }
0x1576   :  { %3170 = vrot.lane.b32.xlu1 %v3166_v33, %s4504_s12 }
0x157a   :  { %3263 = vrot.lane.b32.xlu1 %v5042_v13, %s4507_s18 }
0x157e   :  { %3261 = vrot.lane.b32.xlu1 %v5044_v16, %s4507_s18 }
0x15ee   :  { %v3147_v60 = vpop.xlane.xlu1 %3146 }
0x15ef   :  { %v3149_v35 = vsub.f32 %v3141_v29, %v3147_v60  ;;  %v3816_v29 = vld [vmem:[%s5251_s7 + $0x3] ss:$0 sm:$0xff] }
0x15f0   :  { %v3144_v10 = vpop.xlane.xlu0 %3143 }
0x15f1   :  { %v3152_v36 = vmul.f32 1.442695, %v3149_v35  ;;  %v3148_v37 = vsub.f32 %v3140_v45, %v3144_v10 }
0x15f2   :  { %v3171_v8 = vpop.permute.xlu1 %3170 }
0x15f3   :  { %4334 = vpow2.f32 %v3152_v36  ;;  %v3150_v27 = vmul.f32 1.442695, %v3148_v37 }
0x15f5   :  { %4336 = vpow2.f32 %v3150_v27 }
0x15f6   :  { %v3264_v13 = vpop.permute.xlu1 %3263 }
0x15fa   :  { %v3262_v48 = vpop.permute.xlu1 %3261 }
0x1600   :  { %v4335_v39 = vpop.eup %4334 }
0x1601   :  { %v3157_v44 = vsel %vm124_vm4, %v4335_v39, 0.0 }
0x1602   :  { %v4337_v46 = vpop.eup %4336  ;;  %3158 = vadd.xlane.f32.xlu0 %v3157_v44 }
0x1603   :  { %v3154_v49 = vsel %vm124_vm4, %v4337_v46, 0.0 }
0x1606   :  { %3155 = vadd.xlane.f32.xlu0 %v3154_v49 }
0x161c   :  { %3172 = vrot.lane.b32.xlu0 %v3167_v50, %s4504_s12 }
0x168b   :  { %v3159_v16 = vpop.xlane.xlu0 %3158 }
0x168c   :  { %v3161_v51 = vmax.f32 %v3159_v16, 1e-16 }
0x168e   :  { %4338 = vrcp.f32 %v3161_v51 }
0x168f   :  { %v3156_v53 = vpop.xlane.xlu0 %3155 }
0x1690   :  { %v3160_v62 = vmax.f32 %v3156_v53, 1e-16 }
0x1692   :  { %4340 = vrcp.f32 %v3160_v62 }
0x1693   :  { %v3173_v54 = vpop.permute.xlu0 %3172 }
0x1694   :  { %4163 = vmatprep.subr.mxu1 %v3173_v54 }
0x1695   :  { %4164 = vmatpush3.msra.mxu1 %v3173_v54 }
0x1696   :  { %4165 = vmatprep.subr.mxu1 %v3171_v8 }
0x1697   :  { %4166 = vmatpush3.msra.mxu1 %v3171_v8 }
0x1698   :  { %4170 = vmatprep.subr.mxu1 %v4508_v63 }
0x169b   :  { %v4339_v55 = vpop.eup %4338 }
0x169c   :  { %v3165_v34 = vmul.f32 %v4339_v55, %v4335_v39 }
0x169f   :  { %v4341_v56 = vpop.eup %4340 }
0x16a0   :  { %v3164_v47 = vmul.f32 %v4341_v56, %v4337_v46  ;;  %v118_v46 = vld [vmem:[#allocation7] sm:$0x3] }
0x16a1   :  { %v3350_v51 = vsel %vm3349_vm12, %v118_v46, 0.0  ;;  %v3432_v54 = vrot.slane %v118_v46, %v492_v26  ;;  %v3443_v8 = vrot.slane %v118_v46, %v621_v30 }
0x16a2   :  { %4167 = vmatprep.mubr.msk.f32.mxu1 %vm124_vm4, %v3164_v47 }
0x16a3   :  { %4168 = vmatmul.mubr.msk.f32.vlgmr.msra.gmra.mxu1 %vm124_vm4, %v3165_v34 }
0x16a4   :  { %4174 = vmatprep.mubr.msk.f32.mxu1 %vm4509_vm14, %v4508_v63 }
0x1763   :  { %v4169_v57 = vpop.f32.mrf.mxu1 }
0x1764   :  { %v3258_v59 = vadd.f32 %v4169_v57, %v3046_v41 }
0x1765   :  { %v3248_v58 = vpop.f32.mrf.mxu1 }
0x1766   :  { %v3260_v61 = vmul.f32 %v4841_v1, %v3258_v59  ;;  %v3257_v43 = vadd.f32 %v3248_v58, %v3045_v24 }
0x1768   :  { %v3268_v2 = vadd.f32 %v3264_v13, %v3260_v61  ;;  %v3259_v5 = vmul.f32 %v4845_v3, %v3257_v43 }
0x176a   :  { %v3267_v6 = vadd.f32 %v3262_v48, %v3259_v5  ;;  %v3270_v9 = vadd.f32 %v3268_v2, %v5035_v7 }
0x176c   :  { %v3278_v11 = vsel %vm234_vm2, %v3270_v9, 0.0  ;;  %v3269_v15 = vadd.f32 %v3267_v6, %v5031_v4 }
0x176d   :  { %3279 = vadd.xlane.f32.xlu0 %v3278_v11 }
0x176e   :  { %v3275_v12 = vsel %vm234_vm2, %v3269_v15, 0.0 }
0x176f   :  { %3276 = vadd.xlane.f32.xlu1 %v3275_v12 }
0x17f6   :  { %v3280_v17 = vpop.xlane.xlu0 %3279 }
0x17f7   :  { %v3282_v52 = vmul.f32 0.03125, %v3280_v17 }
0x17f8   :  { %v3277_v18 = vpop.xlane.xlu1 %3276 }
0x17f9   :  { %v3284_v1 = vsub.f32 %v3270_v9, %v3282_v52  ;;  %v3281_v14 = vmul.f32 0.03125, %v3277_v18 }
0x17fb   :  { %v3283_v19 = vsub.f32 %v3269_v15, %v3281_v14  ;;  %v3286_v20 = vmul.f32 %v3284_v1, %v3284_v1 }
0x17fd   :  { %v3290_v3 = vsel %vm234_vm2, %v3286_v20, 0.0  ;;  %v3285_v21 = vmul.f32 %v3283_v19, %v3283_v19 }
0x17fe   :  { %3291 = vadd.xlane.f32.xlu0 %v3290_v3 }
0x17ff   :  { %v3287_v7 = vsel %vm234_vm2, %v3285_v21, 0.0 }
0x1802   :  { %3288 = vadd.xlane.f32.xlu0 %v3287_v7 }
0x1887   :  { %v3292_v22 = vpop.xlane.xlu0 %3291 }
0x1888   :  { %v3294_v4 = vmul.f32 0.03125, %v3292_v22 }
0x188a   :  { %v3296_v23 = vadd.f32 1e-05, %v3294_v4 }
0x188b   :  { %v3289_v41 = vpop.xlane.xlu0 %3288 }
0x188c   :  { %4342 = vrsqrt.f32 %v3296_v23  ;;  %v3293_v42 = vmul.f32 0.03125, %v3289_v41 }
0x188e   :  { %v3295_v24 = vadd.f32 1e-05, %v3293_v42 }
0x1890   :  { %4344 = vrsqrt.f32 %v3295_v24 }
0x1899   :  { %v4343_v38 = vpop.eup %4342 }
0x189a   :  { %v3300_v28 = vmul.f32 %v4343_v38, %v3284_v1 }
0x189c   :  { %v3308_v0 = vmul.f32 %v3815_v40, %v3300_v28 }
0x189d   :  { %v4345_v45 = vpop.eup %4344 }
0x189e   :  { %v3316_v31 = vadd.f32 %v3816_v29, %v3308_v0  ;;  %v3299_v32 = vmul.f32 %v4345_v45, %v3283_v19  ;;  %v3501_v0 = vld [vmem:[%s5254_s10 + $0x30] sm:$0xff]  ;;  %v3500_v45 = vld [vmem:[%s5254_s10 + $0x28] sm:$0xff] }
0x18a0   :  { %v3320_v33 = vmin.f32 %v3316_v31, 0.0  ;;  %v3307_v60 = vmul.f32 %v3815_v40, %v3299_v32  ;;  %vm3318_vm11 = vcmp.gt.f32.partialorder %v3316_v31, 0.0  ;;  %v3498_v32 = vld [vmem:[%s5254_s10 + $0x18] sm:$0xff] }
0x18a2   :  { %v3323_v35 = vmul.f32 1.442695, %v3320_v33  ;;  %v3315_v10 = vadd.f32 %v3816_v29, %v3307_v60  ;;  %v3502_v29 = vld [vmem:[%s5254_s10 + $0x38] sm:$0xff]  ;;  %v3497_v33 = vld [vmem:[%s5254_s10 + $0x10] sm:$0xff]  ;;  %v3496_v60 = vld [vmem:[%s5254_s10 + $0x8] sm:$0xff] }
0x18a3   :  { %4178 = vmatpush3.msra.mxu0 %v3502_v29 }
0x18a4   :  { %4346 = vpow2.f32 %v3323_v35  ;;  %v3319_v36 = vmin.f32 %v3315_v10, 0.0  ;;  %vm3317_vm13 = vcmp.gt.f32.partialorder %v3315_v10, 0.0  ;;  %4179 = vmatprep.subr.mxu0 %v4508_v63 }
0x18a5   :  { %4180 = vmatpush3.msra.mxu0 %v3501_v0 }
0x18a6   :  { %v3321_v37 = vmul.f32 1.442695, %v3319_v36  ;;  %4181 = vmatprep.subr.mxu0 %v4508_v63 }
0x18a7   :  { %4182 = vmatpush3.msra.mxu0 %v3500_v45 }
0x18a8   :  { %4348 = vpow2.f32 %v3321_v37  ;;  %4183 = vmatprep.subr.mxu0 %v4508_v63 }
0x18b1   :  { %v4347_v27 = vpop.eup %4346 }
0x18b2   :  { %v3818_v39 = vadd.f32 -1.0, %v4347_v27 }
0x18b4   :  { %v3328_v44 = vsel %vm3318_vm11, %v3316_v31, %v3818_v39  ;;  %v3499_v31 = vld [vmem:[%s5254_s10 + $0x20] sm:$0xff] }
0x18b5   :  { %v4349_v49 = vpop.eup %4348  ;;  %v3332_v50 = vsel %vm234_vm2, %v3328_v44, 0.0  ;;  %4184 = vmatpush3.msra.mxu0 %v3499_v31 }
0x18b6   :  { %3333 = vadd.xlane.f32.xlu0 %v3332_v50  ;;  %v3817_v16 = vadd.f32 -1.0, %v4349_v49  ;;  %4185 = vmatprep.subr.mxu0 %v4508_v63  ;;  %v3593_v49 = vld [vmem:[#allocation10 + $0x18] sm:$0xff]  ;;  %v3592_v50 = vld [vmem:[#allocation10 + $0x10] sm:$0xff] }
0x18b7   :  { %4186 = vmatpush3.msra.mxu0 %v3498_v32 }
0x18b8   :  { %v3327_v53 = vsel %vm3317_vm13, %v3315_v10, %v3817_v16  ;;  %4187 = vmatprep.subr.mxu0 %v4508_v63  ;;  %v3495_v10 = vld [vmem:[%s5254_s10] sm:$0xff] }
0x18b9   :  { %v3329_v62 = vsel %vm234_vm2, %v3327_v53, 0.0  ;;  %4188 = vmatpush3.msra.mxu0 %v3497_v33  ;;  %v3591_v16 = vld [vmem:[#allocation10 + $0x8] sm:$0xff] }
0x18ba   :  { %3330 = vadd.xlane.f32.xlu1 %v3329_v62  ;;  %3351 = vadd.xlane.f32.xlu0 %v3350_v51  ;;  %v3590_v51 = vld [vmem:[#allocation10] sm:$0xff] }
0x18bb   :  { %4189 = vmatprep.subr.mxu0 %v4508_v63 }
0x18bc   :  { %4190 = vmatpush3.msra.mxu0 %v3496_v60 }
0x18bd   :  { %4191 = vmatprep.subr.mxu0 %v4508_v63 }
0x18be   :  { %4192 = vmatpush3.msra.mxu0 %v3495_v10 }
0x18cb   :  { %3434 = vbcast.lane.b32.xlu1 %v3432_v54, 256 }
0x18cf   :  { %3445 = vbcast.lane.b32.xlu1 %v3443_v8, 256 }
0x18d0   :  { %3438 = vbcast.lane.b32.xlu0 %v3432_v54, 264 }
0x18d3   :  { %3449 = vbcast.lane.b32.xlu1 %v3443_v8, 264 }
0x193f   :  { %v3334_v55 = vpop.xlane.xlu0 %3333 }
0x1940   :  { %v3820_v56 = vmul.f32 -1.442695, %v3334_v55 }
0x1942   :  { %4350 = vpow2.f32 %v3820_v56 }
0x1943   :  { %v3331_v47 = vpop.xlane.xlu1 %3330  ;;  %v5186_v58 = vpop.xlane.xlu0 %3351 }
0x1944   :  { %v3819_v34 = vmul.f32 -1.442695, %v3331_v47  ;;  %v3353_v35 = vmax.f32 %v5186_v58, 1.0 }
0x1946   :  { %4352 = vpow2.f32 %v3819_v34 }
0x1947   :  { %v3435_v25 = vpop.permute.xlu1 %3434  ;;  %v3439_v43 = vpop.permute.xlu0 %3438 }
0x1948   :  { %vm3452_vm0 = vcmp.gt.f32.partialorder %v3439_v43, 0.0  ;;  %vm3451_vm1 = vcmp.gt.f32.partialorder %v3435_v25, 0.0 }
0x194b   :  { %v3446_v59 = vpop.permute.xlu1 %3445 }
0x194c   :  { %vm3453_vm3 = vcmp.gt.f32.partialorder %v3446_v59, 0.0 }
0x194f   :  { %v4351_v26 = vpop.eup %4350  ;;  %v3450_v61 = vpop.permute.xlu1 %3449 }
0x1950   :  { %v3342_v13 = vadd.f32 1.0, %v4351_v26  ;;  %vm3454_vm15 = vcmp.gt.f32.partialorder %v3450_v61, 0.0 }
0x1952   :  { %4354 = vrcp.f32 %v3342_v13 }
0x1953   :  { %v4353_v30 = vpop.eup %4352 }
0x1954   :  { %v3341_v57 = vadd.f32 1.0, %v4353_v30 }
0x1956   :  { %4356 = vrcp.f32 %v3341_v57 }
0x1957   :  { %4358 = vrcp.f32 %v3353_v35 }
0x195f   :  { %v4355_v2 = vpop.eup %4354 }
0x1960   :  { %v3348_v5 = vmul.f32 %v4355_v2, %v3328_v44 }
0x1962   :  { %4171 = vmatpush3.msra.mxu1 %v3348_v5  ;;  %v3466_v9 = vsel %vm3454_vm15, %v3348_v5, -1e+30  ;;  %v3464_v11 = vsel %vm3452_vm0, %v3348_v5, -1e+30 }
0x1963   :  { %v4357_v48 = vpop.eup %4356  ;;  %4172 = vmatprep.subr.mxu1 %v4508_v63  ;;  %v3477_v18 = vsel %vm234_vm2, %v3466_v9, -inf  ;;  %v3468_v1 = vsel %vm234_vm2, %v3464_v11, -inf }
0x1964   :  { %v3347_v6 = vmul.f32 %v4357_v48, %v3327_v53  ;;  %v4359_v36 = vpop.eup %4358  ;;  %v3822_v53 = vld [vmem:[%s5255_s11] ss:$0 sm:$0xff]  ;;  %s4510_s11 = smov [#allocation11]  }
0x1965   :  { %s3689_s4 = sshll.u32 %s4510_s11, 4  ;;  %s3690_s4 = int_to_ptr.vmem [resolvable:$true] %s3689_s4 }
0x1966   :  { %v3463_v15 = vsel %vm3451_vm1, %v3347_v6, -1e+30  ;;  %v3465_v12 = vsel %vm3453_vm3, %v3347_v6, -1e+30  ;;  %4173 = vmatpush3.msra.mxu1 %v3347_v6  ;;  %s4464_s15 = scalar_lea.vmem %s3690_s4, 32  ;;  %p4469_p12 = scmp.lt.s32.totalorder %s3690_s4, %s3690_s4 }
0x1967   :  { %v3467_v17 = vsel %vm234_vm2, %v3463_v15, -inf  ;;  %v3476_v52 = vsel %vm234_vm2, %v3465_v12, -inf  ;;  %4175 = vmatmul.mubr.msk.f32.vlgmr.msra.gmra.mxu1 %vm124_vm4, %v118_v46  ;;  %4196 = vmatprep.subr.mxu1 %v4508_v63  ;;  %vm3510_vm4 = vcmask 523264   ;;  %p4465_p11 = scmp.ne.s32.totalorder %s3690_s4, %s4464_s15  ;;  %p4470_p13 = scmp.lt.s32.totalorder %s4464_s15, %s4464_s15 }
0x1968   :  { %v3478_v14 = vmax.f32 %v3476_v52, %v3477_v18  ;;  %v3469_v19 = vmax.f32 %v3467_v17, %v3468_v1  ;;  %4204 = vmatprep.mubr.msk.f32.mxu1 %vm4509_vm14, %v4508_v63  ;;  %4197 = vmatpush3.msra.mxu1 %v3593_v49 }
0x1969   :  { %4198 = vmatprep.subr.mxu1 %v4508_v63  ;;  %p4471_p0 = por %p4470_p13, %p4469_p12 }
0x196a   :  { %v3479_v20 = vrot.slane %v3478_v14, 4  ;;  %v3470_v3 = vrot.slane %v3469_v19, 4  ;;  %4199 = vmatpush3.msra.mxu1 %v3592_v50 }
0x196b   :  { %4200 = vmatprep.subr.mxu1 %v4508_v63  ;;  %p4472_p1 = pnand %p4471_p0, %p4465_p11 }
0x196c   :  { %v3480_v21 = vmax.f32 %v3478_v14, %v3479_v20  ;;  %v3471_v7 = vmax.f32 %v3469_v19, %v3470_v3  ;;  %4201 = vmatpush3.msra.mxu1 %v3591_v16 }
0x196d   :  { %4202 = vmatprep.subr.mxu1 %v4508_v63  ;;  %v3825_v63 = vld [vmem:[%s5257_s13] ss:$0 sm:$0xff] }
0x196e   :  { %v3481_v22 = vrot.slane %v3480_v21, 2  ;;  %v3472_v4 = vrot.slane %v3471_v7, 2  ;;  %4203 = vmatpush3.msra.mxu1 %v3590_v51 }
0x1970   :  { %v3482_v23 = vmax.f32 %v3480_v21, %v3481_v22  ;;  %v3473_v41 = vmax.f32 %v3471_v7, %v3472_v4 }
0x1972   :  { %v3483_v42 = vrot.slane %v3482_v23, 1  ;;  %v3474_v24 = vrot.slane %v3473_v41, 1 }
0x1974   :  { %v3484_v38 = vmax.f32 %v3482_v23, %v3483_v42  ;;  %v3475_v40 = vmax.f32 %v3473_v41, %v3474_v24 }
0x1976   :  { %v3488_v28 = vsel %vm3487_vm5, %v3484_v38, %v3475_v40 }
0x1a27   :  { %v3423_v37 = vpop.f32.mrf.mxu1 }
0x1a28   :  { %v3428_v27 = vmul.f32 %v4359_v36, %v3423_v37 }
0x1a29   :  { %v4176_v39 = vpop.f32.mrf.mxu1 }
0x1a2a   :  { %3491 = vrot.lane.b32.xlu1 %v3428_v27, %s4507_s18 }
0x1a9c   :  { %v3492_v44 = vpop.permute.xlu1 %3491 }
0x1a9d   :  { %v3494_v46 = vsel %vm234_vm2, %v3488_v28, %v3492_v44 }
0x1a9e   :  { %4194 = vmatmul.mubr.msk.f32.vlgmr.msra.gmra.mxu0 %vm3510_vm4, %v3494_v46 }
0x1b5e   :  { %v3580_v62 = vpop.f32.mrf.mxu0 }
0x1b5f   :  { %v3581_v54 = vadd.f32 %v3822_v53, %v3580_v62 }
0x1b60   :  { %v4195_v8 = vpop.f32.mrf.mxu0 }
0x1b61   :  { %v3585_v55 = vmin.f32 %v3581_v54, 0.0  ;;  %vm3584_vm6 = vcmp.gt.f32.partialorder %v3581_v54, 0.0 }
0x1b63   :  { %v3586_v56 = vmul.f32 1.442695, %v3585_v55 }
0x1b65   :  { %4360 = vpow2.f32 %v3586_v56 }
0x1b72   :  { %v4361_v47 = vpop.eup %4360 }
0x1b73   :  { %v3824_v34 = vadd.f32 -1.0, %v4361_v47 }
0x1b75   :  { %v3589_v26 = vsel %vm3584_vm6, %v3581_v54, %v3824_v34 }
0x1b76   :  { %4205 = vmatmul.mubr.msk.f32.vlgmr.msra.gmra.mxu1 %vm234_vm2, %v3589_v26 }
0x1c36   :  { %v3670_v13 = vpop.f32.mrf.mxu1 }
0x1c37   :  { %v3671_v25 = vadd.f32 %v3825_v63, %v3670_v13 }
0x1c38   :  { %v4206_v30 = vpop.f32.mrf.mxu1 }
0x1c39   :  { %v3674_v57 = vmul.f32 %v3671_v25, %v3671_v25 }
0x1c3b   :  { %v3676_v59 = vsel %vm3675_vm7, %v3674_v57, 0.0 }
0x1c3c   :  { %3677 = vadd.xlane.f32.xlu0 %v3676_v59 }
0x1cc5   :  { %v3678_v58 = vpop.xlane.xlu0 %3677 }
0x1cc6   :  { %v3679_v61 = vmax.f32 %v3678_v58, 1e-24 }
0x1cc8   :  { %4362 = vrsqrt.f32 %v3679_v61 }
0x1cd5   :  { %v4363_v43 = vpop.eup %4362 }
0x1cd6   :  { %v3681_v2 = vmul.f32 %v4363_v43, %v3671_v25 }
0x1cd8   :  { %3682 = vst [vmem:[#allocation11] sm:$0x3] %v3681_v2 }
0x1cd9   :  { %4475 = shalt.err (!%p4472_p1)
}
0x1cda   :  { %3692 = dma.vmem_to_hbm [thread:$0]  %s3690_s4, 32, %s5258_s14, [#allocation4]  }
0x1cdb   :  { %4490 = dma.done.wait [#allocation4], 32  }
0x1cdc   :  { %4491 = vsyncadd [#allocation4], 4294967264 }
0x1cdd   :  { %3696 = vsyncpa [#allocation3], 1 }
0x1cde   :  { %3697 = vsyncpa [#allocation6], 1 }
0x1cdf   :  { %3698 = vsyncpa [#allocation9], 1 }
0x1ce0   :  { %3699 = vsyncpa [#allocation4], 1 }

</bundles_post_ra>
